<compile_context>
chip_gen: v7x
topology: tpu7x:2x2x1
jax: 0.10.0
libtpu: 0.0.40
codegen_flags: <defaults>
</compile_context>

<pallas_src>
import functools
import math

import jax
import jax.numpy as jnp
from jax.experimental import pallas as pl
from jax.experimental.pallas import tpu as pltpu


# ----------------------------- static geometry ------------------------------

W = 32                        # input spatial width (= height)
CH = 16                       # channel rows for every conv activation (padded)
K_CONV = 25 * CH              # stacked contraction depth for conv1/conv2/fc1

# Flattened 32x32 grid lives on the lane axis.  Layer l computes L_l lanes;
# garbage lanes (5x5 windows wrapping a row edge / reading zero padding) are
# never consumed downstream because of the margins asserted below.
L_X = 13 * 128                # 1664: padded input grid lanes
L_R1 = 11 * 128               # 1408: conv1 + relu lanes
L_P1 = 10 * 128               # 1280: pool1 lanes
L_R2 = 7 * 128                # 896:  conv2 + relu lanes
L_P2 = 6 * 128                # 768:  pool2 lanes
L_FC = 128                    # fc1 "grid" lanes (lane 0 is the real output)

_MAX_TAP = 4 * W + 4          # largest 5x5 tap lane offset (undilated)
_MAX_POOL = W + 1             # largest 2x2 pool lane offset (undilated)
# Reachable-lane bounds: every downstream read of layer l stays inside the
# lanes layer l actually computed (see review correctness concern).
assert L_X >= L_R1 + 1 * _MAX_TAP
assert L_R1 >= L_P1 + 1 * _MAX_POOL
assert L_P1 >= L_R2 + 2 * _MAX_TAP
assert L_R2 >= L_P2 + 2 * _MAX_POOL
assert L_P2 >= L_FC + 4 * _MAX_TAP
assert W * W <= L_X


# ------------------------------ kernel helpers ------------------------------

def _conv5x5(w, src, dilation, out_lanes):
    """5x5 conv as ONE MXU matmul.

    src: (CH, lanes) bf16 with the spatial grid flattened on lanes (sub-grid of
    stride `dilation`).  The 25 taps become 25 static lane shifts; the shifted
    views are stacked along sublanes (K = 25*CH, tile-aligned for bf16) and
    contracted against the packed weight w: (Cout, 25*CH) bf16.  f32 acc.
    """
    taps = []
    for kh in range(5):
        for kw in range(5):
            s = dilation * (kh * W + kw)
            taps.append(src[:, s:s + out_lanes])
    stk = jnp.concatenate(taps, axis=0)                    # (25*CH, out_lanes)
    return jnp.dot(w, stk, preferred_element_type=jnp.float32)


def _pool2x2(src, dilation, out_lanes):
    """2x2/stride-2 max-pool as a max over 4 lane-shifted copies (dilated)."""
    d = dilation
    a = jnp.maximum(src[:, 0:out_lanes], src[:, d:d + out_lanes])
    b = jnp.maximum(src[:, d * W:d * W + out_lanes],
                    src[:, d * W + d:d * W + d + out_lanes])
    return jnp.maximum(a, b)


# ------------------------------ fused kernel --------------------------------

def _net_kernel(x_ref, w1_ref, b1_ref, w2_ref, b2_ref,
                wf1_ref, bf1_ref, wf2_ref, bf2_ref, wf3_ref, bf3_ref,
                out_ref):
    bf16, f32 = jnp.bfloat16, jnp.float32
    x = x_ref[0]                                               # (16, 1664) bf16

    # conv1 (5x5, 3->6 padded to 16) + bias + ReLU  (single stacked matmul)
    r1 = jnp.maximum(_conv5x5(w1_ref[...], x, 1, L_R1) + b1_ref[...], 0.0)
    # maxpool 2x2/2 (results live on the even positions of the same grid)
    p1 = _pool2x2(r1, 1, L_P1).astype(bf16)                    # cast ONCE
    # conv2 (5x5, 6->16) + bias + ReLU, taps dilated x2
    r2 = jnp.maximum(_conv5x5(w2_ref[...], p1, 2, L_R2) + b2_ref[...], 0.0)
    # maxpool 2x2/2 on the x2-dilated conv2 outputs
    p2 = _pool2x2(r2, 2, L_P2).astype(bf16)                    # cast ONCE

    # fc1 == 5x5 "conv" over the x4-dilated pool2 grid (lane 0 is real)
    h1 = _conv5x5(wf1_ref[...], p2, 4, L_FC)                   # (128, 128) f32
    h1c = jnp.maximum(h1[:, 0:1] + bf1_ref[...], 0.0).astype(bf16)  # (128, 1)

    # fc2 + ReLU, fc3 (no ReLU) on the single real column
    h2 = jnp.maximum(
        jnp.dot(wf2_ref[...], h1c, preferred_element_type=f32) + bf2_ref[...],
        0.0).astype(bf16)                                      # (128, 1)
    out_ref[0] = (jnp.dot(wf3_ref[...], h2, preferred_element_type=f32)
                  + bf3_ref[...])                              # (128, 1) logits


# --------------------------- weight / input packing -------------------------

def prepare_params(p):
    """One-time repack of all weights to the lane-dense kernel layouts."""
    bf16, f32 = jnp.bfloat16, jnp.float32

    def pack_conv(w_oihw):
        # OIHW -> (CH, 25*CH) with K index = (kh*5 + kw)*CH + cin
        o, i, kh, kw = w_oihw.shape
        w = jnp.transpose(w_oihw, (0, 2, 3, 1))                # (O, 5, 5, I)
        w = jnp.pad(w, ((0, CH - o), (0, 0), (0, 0), (0, CH - i)))
        return w.reshape(CH, K_CONV).astype(bf16)

    w1 = pack_conv(p["conv1_w"])                               # (16, 400)
    b1 = jnp.pad(p["conv1_b"], (0, CH - 6)).reshape(CH, 1).astype(f32)
    w2 = pack_conv(p["conv2_w"])                               # (16, 400)
    b2 = p["conv2_b"].reshape(CH, 1).astype(f32)

    # fc1: torch feature index = c*25 + kh*5 + kw  ->  (128, 400) with
    # K index = (kh*5 + kw)*16 + c  (matches the stacked p2 operand)
    wf1 = p["fc1_w"].reshape(120, 16, 5, 5)
    wf1 = jnp.transpose(wf1, (0, 2, 3, 1)).reshape(120, 25 * 16)
    wf1 = jnp.pad(wf1, ((0, 8), (0, 0))).astype(bf16)          # (128, 400)
    bf1 = jnp.pad(p["fc1_b"], (0, 8)).reshape(128, 1).astype(f32)

    # fc2: (84,120) -> (128,128);  fc3: (n_cls,84) -> (128,128)
    wf2 = jnp.pad(p["fc2_w"], ((0, 44), (0, 8))).astype(bf16)
    bf2 = jnp.pad(p["fc2_b"], (0, 44)).reshape(128, 1).astype(f32)
    n_cls = p["fc3_w"].shape[0]
    wf3 = jnp.pad(p["fc3_w"], ((0, 128 - n_cls), (0, 44))).astype(bf16)
    bf3 = jnp.pad(p["fc3_b"], (0, 128 - n_cls)).reshape(128, 1).astype(f32)

    return dict(w1=w1, b1=b1, w2=w2, b2=b2, wf1=wf1, bf1=bf1,
                wf2=wf2, bf2=bf2, wf3=wf3, bf3=bf3)


@functools.partial(jax.jit, static_argnames=("n_classes",))
def net_forward(prep, x_nchw, n_classes=10):
    """Full forward pass in a single fused Pallas kernel."""
    B = x_nchw.shape[0]
    # NCHW -> channels-first flat grid (B, 16, 1664), shipped as bf16.
    xg = x_nchw.reshape(B, 3, W * W)
    xg = jnp.pad(xg, ((0, 0), (0, CH - 3), (0, L_X - W * W))).astype(jnp.bfloat16)

    out = pl.pallas_call(
        _net_kernel,
        out_shape=jax.ShapeDtypeStruct((B, 128, 1), jnp.float32),
        grid=(B,),
        in_specs=[
            pl.BlockSpec((1, CH, L_X), lambda b: (b, 0, 0)),
            pl.BlockSpec((CH, K_CONV), lambda b: (0, 0)),
            pl.BlockSpec((CH, 1), lambda b: (0, 0)),
            pl.BlockSpec((CH, K_CONV), lambda b: (0, 0)),
            pl.BlockSpec((CH, 1), lambda b: (0, 0)),
            pl.BlockSpec((128, K_CONV), lambda b: (0, 0)),
            pl.BlockSpec((128, 1), lambda b: (0, 0)),
            pl.BlockSpec((128, 128), lambda b: (0, 0)),
            pl.BlockSpec((128, 1), lambda b: (0, 0)),
            pl.BlockSpec((128, 128), lambda b: (0, 0)),
            pl.BlockSpec((128, 1), lambda b: (0, 0)),
        ],
        out_specs=pl.BlockSpec((1, 128, 1), lambda b: (b, 0, 0)),
        compiler_params=pltpu.CompilerParams(
            dimension_semantics=("parallel",)),   # 2 TCs on v7x; no-op v5e/v6e
    )(xg, prep["w1"], prep["b1"], prep["w2"], prep["b2"],
      prep["wf1"], prep["bf1"], prep["wf2"], prep["bf2"],
      prep["wf3"], prep["bf3"])

    return out[:, :n_classes, 0]     # n_classes is static -> static slice


# --------------------------- params / reference -----------------------------

def init_params(key, n_classes=10):
    """Deterministic PyTorch-style uniform(+-1/sqrt(fan_in)) init."""
    def u(k, shape, fan_in):
        bound = 1.0 / math.sqrt(fan_in)
        return jax.random.uniform(k, shape, jnp.float32, -bound, bound)

    ks = jax.random.split(key, 10)
    return {
        "conv1_w": u(ks[0], (6, 3, 5, 5), 3 * 5 * 5),
        "conv1_b": u(ks[1], (6,), 3 * 5 * 5),
        "conv2_w": u(ks[2], (16, 6, 5, 5), 6 * 5 * 5),
        "conv2_b": u(ks[3], (16,), 6 * 5 * 5),
        "fc1_w": u(ks[4], (120, 16 * 5 * 5), 16 * 5 * 5),
        "fc1_b": u(ks[5], (120,), 16 * 5 * 5),
        "fc2_w": u(ks[6], (84, 120), 120),
        "fc2_b": u(ks[7], (84,), 120),
        "fc3_w": u(ks[8], (n_classes, 84), 84),
        "fc3_b": u(ks[9], (n_classes,), 84),
    }


def net_reference(params, x_nchw):
    """Pure-JAX f32 reference (same math as the PyTorch forward)."""
    hp = jax.lax.Precision.HIGHEST

    def conv(x, w, b):
        dn = jax.lax.conv_dimension_numbers(x.shape, w.shape,
                                            ("NCHW", "OIHW", "NCHW"))
        y = jax.lax.conv_general_dilated(x, w, (1, 1), "VALID",
                                         dimension_numbers=dn, precision=hp)
        return jnp.maximum(y + b[None, :, None, None], 0.0)

    def pool(x):
        return jax.lax.reduce_window(x, -jnp.inf, jax.lax.max,
                                     (1, 1, 2, 2), (1, 1, 2, 2), "VALID")

    x = pool(conv(x_nchw, params["conv1_w"], params["conv1_b"]))
    x = pool(conv(x, params["conv2_w"], params["conv2_b"]))
    x = x.reshape(x.shape[0], -1)
    x = jnp.maximum(jnp.dot(x, params["fc1_w"].T, precision=hp) + params["fc1_b"], 0.0)
    x = jnp.maximum(jnp.dot(x, params["fc2_w"].T, precision=hp) + params["fc2_b"], 0.0)
    return jnp.dot(x, params["fc3_w"].T, precision=hp) + params["fc3_b"]


# ---------------------------------- main -------------------------------------

if __name__ == "__main__":
    key = jax.random.PRNGKey(0)
    pkey, xkey = jax.random.split(key)
    params = init_params(pkey, n_classes=10)
    # fc1 (16*5*5 inputs) implies 3x32x32 CIFAR images.
    x = jax.random.normal(xkey, (2, 3, 32, 32), dtype=jnp.float32)

    prep = prepare_params(params)
    out = jax.block_until_ready(net_forward(prep, x, n_classes=10))
    assert out.shape == (2, 10) and out.dtype == jnp.float32
    assert bool(jnp.all(jnp.isfinite(out)))

    # bf16 MXU operands / f32 accumulation vs. an f32 HIGHEST-precision ref.
    ref = net_reference(params, x)
    assert float(jnp.max(jnp.abs(out - ref))) < 3e-2

    print("KERNEL_OK")
</pallas_src>

<mosaic_0001>
module attributes {stable_mosaic.version = 11 : i64} {
  func.func @_net_kernel(%arg0: i32, %arg1: memref<1x16x1664xbf16, #tpu.memory_space<vmem>>, %arg2: memref<16x400xbf16, #tpu.memory_space<vmem>>, %arg3: memref<16x1xf32, #tpu.memory_space<vmem>>, %arg4: memref<16x400xbf16, #tpu.memory_space<vmem>>, %arg5: memref<16x1xf32, #tpu.memory_space<vmem>>, %arg6: memref<128x400xbf16, #tpu.memory_space<vmem>>, %arg7: memref<128x1xf32, #tpu.memory_space<vmem>>, %arg8: memref<128x128xbf16, #tpu.memory_space<vmem>>, %arg9: memref<128x1xf32, #tpu.memory_space<vmem>>, %arg10: memref<128x128xbf16, #tpu.memory_space<vmem>>, %arg11: memref<128x1xf32, #tpu.memory_space<vmem>>, %arg12: memref<1x128x1xf32, #tpu.memory_space<vmem>>) attributes {dimension_semantics = [#tpu.dimension_semantics<parallel>], iteration_bounds = array<i64: 2>, scalar_prefetch = 0 : i64, scratch_operands = 0 : i64, tpu.core_type = #tpu.core_type<tc>, window_params = [{transform_indices = @transform_0, window_bounds = array<i64: 1, 16, 1664>}, {pipeline_mode = #tpu.pipeline_mode<synchronous>, transform_indices = @transform_1, window_bounds = array<i64: 16, 400>}, {pipeline_mode = #tpu.pipeline_mode<synchronous>, transform_indices = @transform_2, window_bounds = array<i64: 16, 1>}, {pipeline_mode = #tpu.pipeline_mode<synchronous>, transform_indices = @transform_3, window_bounds = array<i64: 16, 400>}, {pipeline_mode = #tpu.pipeline_mode<synchronous>, transform_indices = @transform_4, window_bounds = array<i64: 16, 1>}, {pipeline_mode = #tpu.pipeline_mode<synchronous>, transform_indices = @transform_5, window_bounds = array<i64: 128, 400>}, {pipeline_mode = #tpu.pipeline_mode<synchronous>, transform_indices = @transform_6, window_bounds = array<i64: 128, 1>}, {pipeline_mode = #tpu.pipeline_mode<synchronous>, transform_indices = @transform_7, window_bounds = array<i64: 128, 128>}, {pipeline_mode = #tpu.pipeline_mode<synchronous>, transform_indices = @transform_8, window_bounds = array<i64: 128, 1>}, {pipeline_mode = #tpu.pipeline_mode<synchronous>, transform_indices = @transform_9, window_bounds = array<i64: 128, 128>}, {pipeline_mode = #tpu.pipeline_mode<synchronous>, transform_indices = @transform_10, window_bounds = array<i64: 128, 1>}, {transform_indices = @transform_11, window_bounds = array<i64: 1, 128, 1>}]} {
    %c0 = arith.constant 0 : index
    %c0_0 = arith.constant 0 : index
    %c0_1 = arith.constant 0 : index
    %0 = vector.load %arg1[%c0, %c0_0, %c0_1] : memref<1x16x1664xbf16, #tpu.memory_space<vmem>>, vector<1x16x1664xbf16>
    %1 = vector.shape_cast %0 : vector<1x16x1664xbf16> to vector<16x1664xbf16>
    %c0_2 = arith.constant 0 : index
    %c0_3 = arith.constant 0 : index
    %2 = vector.load %arg2[%c0_2, %c0_3] : memref<16x400xbf16, #tpu.memory_space<vmem>>, vector<16x400xbf16>
    %3 = vector.extract_strided_slice %1 {offsets = [0, 0], sizes = [16, 1408], strides = [1, 1]} : vector<16x1664xbf16> to vector<16x1408xbf16>
    %4 = vector.extract_strided_slice %1 {offsets = [0, 1], sizes = [16, 1408], strides = [1, 1]} : vector<16x1664xbf16> to vector<16x1408xbf16>
    %5 = vector.extract_strided_slice %1 {offsets = [0, 2], sizes = [16, 1408], strides = [1, 1]} : vector<16x1664xbf16> to vector<16x1408xbf16>
    %6 = vector.extract_strided_slice %1 {offsets = [0, 3], sizes = [16, 1408], strides = [1, 1]} : vector<16x1664xbf16> to vector<16x1408xbf16>
    %7 = vector.extract_strided_slice %1 {offsets = [0, 4], sizes = [16, 1408], strides = [1, 1]} : vector<16x1664xbf16> to vector<16x1408xbf16>
    %8 = vector.extract_strided_slice %1 {offsets = [0, 32], sizes = [16, 1408], strides = [1, 1]} : vector<16x1664xbf16> to vector<16x1408xbf16>
    %9 = vector.extract_strided_slice %1 {offsets = [0, 33], sizes = [16, 1408], strides = [1, 1]} : vector<16x1664xbf16> to vector<16x1408xbf16>
    %10 = vector.extract_strided_slice %1 {offsets = [0, 34], sizes = [16, 1408], strides = [1, 1]} : vector<16x1664xbf16> to vector<16x1408xbf16>
    %11 = vector.extract_strided_slice %1 {offsets = [0, 35], sizes = [16, 1408], strides = [1, 1]} : vector<16x1664xbf16> to vector<16x1408xbf16>
    %12 = vector.extract_strided_slice %1 {offsets = [0, 36], sizes = [16, 1408], strides = [1, 1]} : vector<16x1664xbf16> to vector<16x1408xbf16>
    %13 = vector.extract_strided_slice %1 {offsets = [0, 64], sizes = [16, 1408], strides = [1, 1]} : vector<16x1664xbf16> to vector<16x1408xbf16>
    %14 = vector.extract_strided_slice %1 {offsets = [0, 65], sizes = [16, 1408], strides = [1, 1]} : vector<16x1664xbf16> to vector<16x1408xbf16>
    %15 = vector.extract_strided_slice %1 {offsets = [0, 66], sizes = [16, 1408], strides = [1, 1]} : vector<16x1664xbf16> to vector<16x1408xbf16>
    %16 = vector.extract_strided_slice %1 {offsets = [0, 67], sizes = [16, 1408], strides = [1, 1]} : vector<16x1664xbf16> to vector<16x1408xbf16>
    %17 = vector.extract_strided_slice %1 {offsets = [0, 68], sizes = [16, 1408], strides = [1, 1]} : vector<16x1664xbf16> to vector<16x1408xbf16>
    %18 = vector.extract_strided_slice %1 {offsets = [0, 96], sizes = [16, 1408], strides = [1, 1]} : vector<16x1664xbf16> to vector<16x1408xbf16>
    %19 = vector.extract_strided_slice %1 {offsets = [0, 97], sizes = [16, 1408], strides = [1, 1]} : vector<16x1664xbf16> to vector<16x1408xbf16>
    %20 = vector.extract_strided_slice %1 {offsets = [0, 98], sizes = [16, 1408], strides = [1, 1]} : vector<16x1664xbf16> to vector<16x1408xbf16>
    %21 = vector.extract_strided_slice %1 {offsets = [0, 99], sizes = [16, 1408], strides = [1, 1]} : vector<16x1664xbf16> to vector<16x1408xbf16>
    %22 = vector.extract_strided_slice %1 {offsets = [0, 100], sizes = [16, 1408], strides = [1, 1]} : vector<16x1664xbf16> to vector<16x1408xbf16>
    %23 = vector.extract_strided_slice %1 {offsets = [0, 128], sizes = [16, 1408], strides = [1, 1]} : vector<16x1664xbf16> to vector<16x1408xbf16>
    %24 = vector.extract_strided_slice %1 {offsets = [0, 129], sizes = [16, 1408], strides = [1, 1]} : vector<16x1664xbf16> to vector<16x1408xbf16>
    %25 = vector.extract_strided_slice %1 {offsets = [0, 130], sizes = [16, 1408], strides = [1, 1]} : vector<16x1664xbf16> to vector<16x1408xbf16>
    %26 = vector.extract_strided_slice %1 {offsets = [0, 131], sizes = [16, 1408], strides = [1, 1]} : vector<16x1664xbf16> to vector<16x1408xbf16>
    %27 = vector.extract_strided_slice %1 {offsets = [0, 132], sizes = [16, 1408], strides = [1, 1]} : vector<16x1664xbf16> to vector<16x1408xbf16>
    %28 = tpu.concatenate %3, %4, %5, %6, %7, %8, %9, %10, %11, %12, %13, %14, %15, %16, %17, %18 in 0 : vector<16x1408xbf16>, vector<16x1408xbf16>, vector<16x1408xbf16>, vector<16x1408xbf16>, vector<16x1408xbf16>, vector<16x1408xbf16>, vector<16x1408xbf16>, vector<16x1408xbf16>, vector<16x1408xbf16>, vector<16x1408xbf16>, vector<16x1408xbf16>, vector<16x1408xbf16>, vector<16x1408xbf16>, vector<16x1408xbf16>, vector<16x1408xbf16>, vector<16x1408xbf16> -> vector<256x1408xbf16>
    %29 = tpu.concatenate %19, %20, %21, %22, %23, %24, %25, %26, %27 in 0 : vector<16x1408xbf16>, vector<16x1408xbf16>, vector<16x1408xbf16>, vector<16x1408xbf16>, vector<16x1408xbf16>, vector<16x1408xbf16>, vector<16x1408xbf16>, vector<16x1408xbf16>, vector<16x1408xbf16> -> vector<144x1408xbf16>
    %30 = tpu.concatenate %28, %29 in 0 : vector<256x1408xbf16>, vector<144x1408xbf16> -> vector<400x1408xbf16>
    %cst = arith.constant dense<0.000000e+00> : vector<16x1408xf32>
    %31 = tpu.matmul %2, %30, %cst {dimension_numbers = #tpu.dot_dimension_numbers<[1], [0], [0], [1], [0, 0, 1, 1], [], []>} : vector<16x400xbf16>, vector<400x1408xbf16>, vector<16x1408xf32> -> vector<16x1408xf32>
    %c0_4 = arith.constant 0 : index
    %c0_5 = arith.constant 0 : index
    %32 = vector.load %arg3[%c0_4, %c0_5] : memref<16x1xf32, #tpu.memory_space<vmem>>, vector<16x1xf32>
    %33 = vector.broadcast %32 : vector<16x1xf32> to vector<16x1408xf32>
    %34 = arith.addf %31, %33 : vector<16x1408xf32>
    %cst_6 = arith.constant 0.000000e+00 : f32
    %35 = vector.broadcast %cst_6 : f32 to vector<16x1408xf32>
    %36 = arith.maximumf %34, %35 : vector<16x1408xf32>
    %37 = vector.extract_strided_slice %36 {offsets = [0, 0], sizes = [16, 1280], strides = [1, 1]} : vector<16x1408xf32> to vector<16x1280xf32>
    %38 = vector.extract_strided_slice %36 {offsets = [0, 1], sizes = [16, 1280], strides = [1, 1]} : vector<16x1408xf32> to vector<16x1280xf32>
    %39 = arith.maximumf %37, %38 : vector<16x1280xf32>
    %40 = vector.extract_strided_slice %36 {offsets = [0, 32], sizes = [16, 1280], strides = [1, 1]} : vector<16x1408xf32> to vector<16x1280xf32>
    %41 = vector.extract_strided_slice %36 {offsets = [0, 33], sizes = [16, 1280], strides = [1, 1]} : vector<16x1408xf32> to vector<16x1280xf32>
    %42 = arith.maximumf %40, %41 : vector<16x1280xf32>
    %43 = arith.maximumf %39, %42 : vector<16x1280xf32>
    %44 = arith.truncf %43 : vector<16x1280xf32> to vector<16x1280xbf16>
    %c0_7 = arith.constant 0 : index
    %c0_8 = arith.constant 0 : index
    %45 = vector.load %arg4[%c0_7, %c0_8] : memref<16x400xbf16, #tpu.memory_space<vmem>>, vector<16x400xbf16>
    %46 = vector.extract_strided_slice %44 {offsets = [0, 0], sizes = [16, 896], strides = [1, 1]} : vector<16x1280xbf16> to vector<16x896xbf16>
    %47 = vector.extract_strided_slice %44 {offsets = [0, 2], sizes = [16, 896], strides = [1, 1]} : vector<16x1280xbf16> to vector<16x896xbf16>
    %48 = vector.extract_strided_slice %44 {offsets = [0, 4], sizes = [16, 896], strides = [1, 1]} : vector<16x1280xbf16> to vector<16x896xbf16>
    %49 = vector.extract_strided_slice %44 {offsets = [0, 6], sizes = [16, 896], strides = [1, 1]} : vector<16x1280xbf16> to vector<16x896xbf16>
    %50 = vector.extract_strided_slice %44 {offsets = [0, 8], sizes = [16, 896], strides = [1, 1]} : vector<16x1280xbf16> to vector<16x896xbf16>
    %51 = vector.extract_strided_slice %44 {offsets = [0, 64], sizes = [16, 896], strides = [1, 1]} : vector<16x1280xbf16> to vector<16x896xbf16>
    %52 = vector.extract_strided_slice %44 {offsets = [0, 66], sizes = [16, 896], strides = [1, 1]} : vector<16x1280xbf16> to vector<16x896xbf16>
    %53 = vector.extract_strided_slice %44 {offsets = [0, 68], sizes = [16, 896], strides = [1, 1]} : vector<16x1280xbf16> to vector<16x896xbf16>
    %54 = vector.extract_strided_slice %44 {offsets = [0, 70], sizes = [16, 896], strides = [1, 1]} : vector<16x1280xbf16> to vector<16x896xbf16>
    %55 = vector.extract_strided_slice %44 {offsets = [0, 72], sizes = [16, 896], strides = [1, 1]} : vector<16x1280xbf16> to vector<16x896xbf16>
    %56 = vector.extract_strided_slice %44 {offsets = [0, 128], sizes = [16, 896], strides = [1, 1]} : vector<16x1280xbf16> to vector<16x896xbf16>
    %57 = vector.extract_strided_slice %44 {offsets = [0, 130], sizes = [16, 896], strides = [1, 1]} : vector<16x1280xbf16> to vector<16x896xbf16>
    %58 = vector.extract_strided_slice %44 {offsets = [0, 132], sizes = [16, 896], strides = [1, 1]} : vector<16x1280xbf16> to vector<16x896xbf16>
    %59 = vector.extract_strided_slice %44 {offsets = [0, 134], sizes = [16, 896], strides = [1, 1]} : vector<16x1280xbf16> to vector<16x896xbf16>
    %60 = vector.extract_strided_slice %44 {offsets = [0, 136], sizes = [16, 896], strides = [1, 1]} : vector<16x1280xbf16> to vector<16x896xbf16>
    %61 = vector.extract_strided_slice %44 {offsets = [0, 192], sizes = [16, 896], strides = [1, 1]} : vector<16x1280xbf16> to vector<16x896xbf16>
    %62 = vector.extract_strided_slice %44 {offsets = [0, 194], sizes = [16, 896], strides = [1, 1]} : vector<16x1280xbf16> to vector<16x896xbf16>
    %63 = vector.extract_strided_slice %44 {offsets = [0, 196], sizes = [16, 896], strides = [1, 1]} : vector<16x1280xbf16> to vector<16x896xbf16>
    %64 = vector.extract_strided_slice %44 {offsets = [0, 198], sizes = [16, 896], strides = [1, 1]} : vector<16x1280xbf16> to vector<16x896xbf16>
    %65 = vector.extract_strided_slice %44 {offsets = [0, 200], sizes = [16, 896], strides = [1, 1]} : vector<16x1280xbf16> to vector<16x896xbf16>
    %66 = vector.extract_strided_slice %44 {offsets = [0, 256], sizes = [16, 896], strides = [1, 1]} : vector<16x1280xbf16> to vector<16x896xbf16>
    %67 = vector.extract_strided_slice %44 {offsets = [0, 258], sizes = [16, 896], strides = [1, 1]} : vector<16x1280xbf16> to vector<16x896xbf16>
    %68 = vector.extract_strided_slice %44 {offsets = [0, 260], sizes = [16, 896], strides = [1, 1]} : vector<16x1280xbf16> to vector<16x896xbf16>
    %69 = vector.extract_strided_slice %44 {offsets = [0, 262], sizes = [16, 896], strides = [1, 1]} : vector<16x1280xbf16> to vector<16x896xbf16>
    %70 = vector.extract_strided_slice %44 {offsets = [0, 264], sizes = [16, 896], strides = [1, 1]} : vector<16x1280xbf16> to vector<16x896xbf16>
    %71 = tpu.concatenate %46, %47, %48, %49, %50, %51, %52, %53, %54, %55, %56, %57, %58, %59, %60, %61 in 0 : vector<16x896xbf16>, vector<16x896xbf16>, vector<16x896xbf16>, vector<16x896xbf16>, vector<16x896xbf16>, vector<16x896xbf16>, vector<16x896xbf16>, vector<16x896xbf16>, vector<16x896xbf16>, vector<16x896xbf16>, vector<16x896xbf16>, vector<16x896xbf16>, vector<16x896xbf16>, vector<16x896xbf16>, vector<16x896xbf16>, vector<16x896xbf16> -> vector<256x896xbf16>
    %72 = tpu.concatenate %62, %63, %64, %65, %66, %67, %68, %69, %70 in 0 : vector<16x896xbf16>, vector<16x896xbf16>, vector<16x896xbf16>, vector<16x896xbf16>, vector<16x896xbf16>, vector<16x896xbf16>, vector<16x896xbf16>, vector<16x896xbf16>, vector<16x896xbf16> -> vector<144x896xbf16>
    %73 = tpu.concatenate %71, %72 in 0 : vector<256x896xbf16>, vector<144x896xbf16> -> vector<400x896xbf16>
    %cst_9 = arith.constant dense<0.000000e+00> : vector<16x896xf32>
    %74 = tpu.matmul %45, %73, %cst_9 {dimension_numbers = #tpu.dot_dimension_numbers<[1], [0], [0], [1], [0, 0, 1, 1], [], []>} : vector<16x400xbf16>, vector<400x896xbf16>, vector<16x896xf32> -> vector<16x896xf32>
    %c0_10 = arith.constant 0 : index
    %c0_11 = arith.constant 0 : index
    %75 = vector.load %arg5[%c0_10, %c0_11] : memref<16x1xf32, #tpu.memory_space<vmem>>, vector<16x1xf32>
    %76 = vector.broadcast %75 : vector<16x1xf32> to vector<16x896xf32>
    %77 = arith.addf %74, %76 : vector<16x896xf32>
    %cst_12 = arith.constant 0.000000e+00 : f32
    %78 = vector.broadcast %cst_12 : f32 to vector<16x896xf32>
    %79 = arith.maximumf %77, %78 : vector<16x896xf32>
    %80 = vector.extract_strided_slice %79 {offsets = [0, 0], sizes = [16, 768], strides = [1, 1]} : vector<16x896xf32> to vector<16x768xf32>
    %81 = vector.extract_strided_slice %79 {offsets = [0, 2], sizes = [16, 768], strides = [1, 1]} : vector<16x896xf32> to vector<16x768xf32>
    %82 = arith.maximumf %80, %81 : vector<16x768xf32>
    %83 = vector.extract_strided_slice %79 {offsets = [0, 64], sizes = [16, 768], strides = [1, 1]} : vector<16x896xf32> to vector<16x768xf32>
    %84 = vector.extract_strided_slice %79 {offsets = [0, 66], sizes = [16, 768], strides = [1, 1]} : vector<16x896xf32> to vector<16x768xf32>
    %85 = arith.maximumf %83, %84 : vector<16x768xf32>
    %86 = arith.maximumf %82, %85 : vector<16x768xf32>
    %87 = arith.truncf %86 : vector<16x768xf32> to vector<16x768xbf16>
    %c0_13 = arith.constant 0 : index
    %c0_14 = arith.constant 0 : index
    %88 = vector.load %arg6[%c0_13, %c0_14] : memref<128x400xbf16, #tpu.memory_space<vmem>>, vector<128x400xbf16>
    %89 = vector.extract_strided_slice %87 {offsets = [0, 0], sizes = [16, 128], strides = [1, 1]} : vector<16x768xbf16> to vector<16x128xbf16>
    %90 = vector.extract_strided_slice %87 {offsets = [0, 4], sizes = [16, 128], strides = [1, 1]} : vector<16x768xbf16> to vector<16x128xbf16>
    %91 = vector.extract_strided_slice %87 {offsets = [0, 8], sizes = [16, 128], strides = [1, 1]} : vector<16x768xbf16> to vector<16x128xbf16>
    %92 = vector.extract_strided_slice %87 {offsets = [0, 12], sizes = [16, 128], strides = [1, 1]} : vector<16x768xbf16> to vector<16x128xbf16>
    %93 = vector.extract_strided_slice %87 {offsets = [0, 16], sizes = [16, 128], strides = [1, 1]} : vector<16x768xbf16> to vector<16x128xbf16>
    %94 = vector.extract_strided_slice %87 {offsets = [0, 128], sizes = [16, 128], strides = [1, 1]} : vector<16x768xbf16> to vector<16x128xbf16>
    %95 = vector.extract_strided_slice %87 {offsets = [0, 132], sizes = [16, 128], strides = [1, 1]} : vector<16x768xbf16> to vector<16x128xbf16>
    %96 = vector.extract_strided_slice %87 {offsets = [0, 136], sizes = [16, 128], strides = [1, 1]} : vector<16x768xbf16> to vector<16x128xbf16>
    %97 = vector.extract_strided_slice %87 {offsets = [0, 140], sizes = [16, 128], strides = [1, 1]} : vector<16x768xbf16> to vector<16x128xbf16>
    %98 = vector.extract_strided_slice %87 {offsets = [0, 144], sizes = [16, 128], strides = [1, 1]} : vector<16x768xbf16> to vector<16x128xbf16>
    %99 = vector.extract_strided_slice %87 {offsets = [0, 256], sizes = [16, 128], strides = [1, 1]} : vector<16x768xbf16> to vector<16x128xbf16>
    %100 = vector.extract_strided_slice %87 {offsets = [0, 260], sizes = [16, 128], strides = [1, 1]} : vector<16x768xbf16> to vector<16x128xbf16>
    %101 = vector.extract_strided_slice %87 {offsets = [0, 264], sizes = [16, 128], strides = [1, 1]} : vector<16x768xbf16> to vector<16x128xbf16>
    %102 = vector.extract_strided_slice %87 {offsets = [0, 268], sizes = [16, 128], strides = [1, 1]} : vector<16x768xbf16> to vector<16x128xbf16>
    %103 = vector.extract_strided_slice %87 {offsets = [0, 272], sizes = [16, 128], strides = [1, 1]} : vector<16x768xbf16> to vector<16x128xbf16>
    %104 = vector.extract_strided_slice %87 {offsets = [0, 384], sizes = [16, 128], strides = [1, 1]} : vector<16x768xbf16> to vector<16x128xbf16>
    %105 = vector.extract_strided_slice %87 {offsets = [0, 388], sizes = [16, 128], strides = [1, 1]} : vector<16x768xbf16> to vector<16x128xbf16>
    %106 = vector.extract_strided_slice %87 {offsets = [0, 392], sizes = [16, 128], strides = [1, 1]} : vector<16x768xbf16> to vector<16x128xbf16>
    %107 = vector.extract_strided_slice %87 {offsets = [0, 396], sizes = [16, 128], strides = [1, 1]} : vector<16x768xbf16> to vector<16x128xbf16>
    %108 = vector.extract_strided_slice %87 {offsets = [0, 400], sizes = [16, 128], strides = [1, 1]} : vector<16x768xbf16> to vector<16x128xbf16>
    %109 = vector.extract_strided_slice %87 {offsets = [0, 512], sizes = [16, 128], strides = [1, 1]} : vector<16x768xbf16> to vector<16x128xbf16>
    %110 = vector.extract_strided_slice %87 {offsets = [0, 516], sizes = [16, 128], strides = [1, 1]} : vector<16x768xbf16> to vector<16x128xbf16>
    %111 = vector.extract_strided_slice %87 {offsets = [0, 520], sizes = [16, 128], strides = [1, 1]} : vector<16x768xbf16> to vector<16x128xbf16>
    %112 = vector.extract_strided_slice %87 {offsets = [0, 524], sizes = [16, 128], strides = [1, 1]} : vector<16x768xbf16> to vector<16x128xbf16>
    %113 = vector.extract_strided_slice %87 {offsets = [0, 528], sizes = [16, 128], strides = [1, 1]} : vector<16x768xbf16> to vector<16x128xbf16>
    %114 = tpu.concatenate %89, %90, %91, %92, %93, %94, %95, %96, %97, %98, %99, %100, %101, %102, %103, %104 in 0 : vector<16x128xbf16>, vector<16x128xbf16>, vector<16x128xbf16>, vector<16x128xbf16>, vector<16x128xbf16>, vector<16x128xbf16>, vector<16x128xbf16>, vector<16x128xbf16>, vector<16x128xbf16>, vector<16x128xbf16>, vector<16x128xbf16>, vector<16x128xbf16>, vector<16x128xbf16>, vector<16x128xbf16>, vector<16x128xbf16>, vector<16x128xbf16> -> vector<256x128xbf16>
    %115 = tpu.concatenate %105, %106, %107, %108, %109, %110, %111, %112, %113 in 0 : vector<16x128xbf16>, vector<16x128xbf16>, vector<16x128xbf16>, vector<16x128xbf16>, vector<16x128xbf16>, vector<16x128xbf16>, vector<16x128xbf16>, vector<16x128xbf16>, vector<16x128xbf16> -> vector<144x128xbf16>
    %116 = tpu.concatenate %114, %115 in 0 : vector<256x128xbf16>, vector<144x128xbf16> -> vector<400x128xbf16>
    %cst_15 = arith.constant dense<0.000000e+00> : vector<128x128xf32>
    %117 = tpu.matmul %88, %116, %cst_15 {dimension_numbers = #tpu.dot_dimension_numbers<[1], [0], [0], [1], [0, 0, 1, 1], [], []>} : vector<128x400xbf16>, vector<400x128xbf16>, vector<128x128xf32> -> vector<128x128xf32>
    %118 = vector.extract_strided_slice %117 {offsets = [0, 0], sizes = [128, 1], strides = [1, 1]} : vector<128x128xf32> to vector<128x1xf32>
    %c0_16 = arith.constant 0 : index
    %c0_17 = arith.constant 0 : index
    %119 = vector.load %arg7[%c0_16, %c0_17] : memref<128x1xf32, #tpu.memory_space<vmem>>, vector<128x1xf32>
    %120 = arith.addf %118, %119 : vector<128x1xf32>
    %cst_18 = arith.constant 0.000000e+00 : f32
    %121 = vector.broadcast %cst_18 : f32 to vector<128x1xf32>
    %122 = arith.maximumf %120, %121 : vector<128x1xf32>
    %123 = arith.truncf %122 : vector<128x1xf32> to vector<128x1xbf16>
    %c0_19 = arith.constant 0 : index
    %c0_20 = arith.constant 0 : index
    %124 = vector.load %arg8[%c0_19, %c0_20] : memref<128x128xbf16, #tpu.memory_space<vmem>>, vector<128x128xbf16>
    %cst_21 = arith.constant dense<0.000000e+00> : vector<128x1xf32>
    %125 = tpu.matmul %124, %123, %cst_21 {dimension_numbers = #tpu.dot_dimension_numbers<[1], [0], [0], [1], [0, 0, 1, 1], [], []>} : vector<128x128xbf16>, vector<128x1xbf16>, vector<128x1xf32> -> vector<128x1xf32>
    %c0_22 = arith.constant 0 : index
    %c0_23 = arith.constant 0 : index
    %126 = vector.load %arg9[%c0_22, %c0_23] : memref<128x1xf32, #tpu.memory_space<vmem>>, vector<128x1xf32>
    %127 = arith.addf %125, %126 : vector<128x1xf32>
    %cst_24 = arith.constant 0.000000e+00 : f32
    %128 = vector.broadcast %cst_24 : f32 to vector<128x1xf32>
    %129 = arith.maximumf %127, %128 : vector<128x1xf32>
    %130 = arith.truncf %129 : vector<128x1xf32> to vector<128x1xbf16>
    %c0_25 = arith.constant 0 : index
    %c0_26 = arith.constant 0 : index
    %131 = vector.load %arg10[%c0_25, %c0_26] : memref<128x128xbf16, #tpu.memory_space<vmem>>, vector<128x128xbf16>
    %cst_27 = arith.constant dense<0.000000e+00> : vector<128x1xf32>
    %132 = tpu.matmul %131, %130, %cst_27 {dimension_numbers = #tpu.dot_dimension_numbers<[1], [0], [0], [1], [0, 0, 1, 1], [], []>} : vector<128x128xbf16>, vector<128x1xbf16>, vector<128x1xf32> -> vector<128x1xf32>
    %c0_28 = arith.constant 0 : index
    %c0_29 = arith.constant 0 : index
    %133 = vector.load %arg11[%c0_28, %c0_29] : memref<128x1xf32, #tpu.memory_space<vmem>>, vector<128x1xf32>
    %134 = arith.addf %132, %133 : vector<128x1xf32>
    %c0_30 = arith.constant 0 : index
    %c0_31 = arith.constant 0 : index
    %c0_32 = arith.constant 0 : index
    %135 = vector.load %arg12[%c0_30, %c0_31, %c0_32] : memref<1x128x1xf32, #tpu.memory_space<vmem>>, vector<1x128x1xf32>
    %136 = vector.shape_cast %135 : vector<1x128x1xf32> to vector<128x1xf32>
    %137 = vector.shape_cast %134 : vector<128x1xf32> to vector<1x128x1xf32>
    tpu.vector_store %arg12[%c0_30, %c0_31, %c0_32], %137 {strides = array<i32>} : memref<1x128x1xf32, #tpu.memory_space<vmem>>, vector<1x128x1xf32>,
    return
  }
  func.func @transform_0(%arg0: i32) -> (i32, i32, i32) {
    %c0_i32 = arith.constant 0 : i32
    %c0_i32_0 = arith.constant 0 : i32
    %c0_i32_1 = arith.constant 0 : i32
    return %arg0, %c0_i32, %c0_i32_0 : i32, i32, i32
  }
  func.func @transform_1(%arg0: i32) -> (i32, i32) {
    %c0_i32 = arith.constant 0 : i32
    %c0_i32_0 = arith.constant 0 : i32
    %c0_i32_1 = arith.constant 0 : i32
    return %c0_i32, %c0_i32_0 : i32, i32
  }
  func.func @transform_2(%arg0: i32) -> (i32, i32) {
    %c0_i32 = arith.constant 0 : i32
    %c0_i32_0 = arith.constant 0 : i32
    %c0_i32_1 = arith.constant 0 : i32
    return %c0_i32, %c0_i32_0 : i32, i32
  }
  func.func @transform_3(%arg0: i32) -> (i32, i32) {
    %c0_i32 = arith.constant 0 : i32
    %c0_i32_0 = arith.constant 0 : i32
    %c0_i32_1 = arith.constant 0 : i32
    return %c0_i32, %c0_i32_0 : i32, i32
  }
  func.func @transform_4(%arg0: i32) -> (i32, i32) {
    %c0_i32 = arith.constant 0 : i32
    %c0_i32_0 = arith.constant 0 : i32
    %c0_i32_1 = arith.constant 0 : i32
    return %c0_i32, %c0_i32_0 : i32, i32
  }
  func.func @transform_5(%arg0: i32) -> (i32, i32) {
    %c0_i32 = arith.constant 0 : i32
    %c0_i32_0 = arith.constant 0 : i32
    %c0_i32_1 = arith.constant 0 : i32
    return %c0_i32, %c0_i32_0 : i32, i32
  }
  func.func @transform_6(%arg0: i32) -> (i32, i32) {
    %c0_i32 = arith.constant 0 : i32
    %c0_i32_0 = arith.constant 0 : i32
    %c0_i32_1 = arith.constant 0 : i32
    return %c0_i32, %c0_i32_0 : i32, i32
  }
  func.func @transform_7(%arg0: i32) -> (i32, i32) {
    %c0_i32 = arith.constant 0 : i32
    %c0_i32_0 = arith.constant 0 : i32
    %c0_i32_1 = arith.constant 0 : i32
    return %c0_i32, %c0_i32_0 : i32, i32
  }
  func.func @transform_8(%arg0: i32) -> (i32, i32) {
    %c0_i32 = arith.constant 0 : i32
    %c0_i32_0 = arith.constant 0 : i32
    %c0_i32_1 = arith.constant 0 : i32
    return %c0_i32, %c0_i32_0 : i32, i32
  }
  func.func @transform_9(%arg0: i32) -> (i32, i32) {
    %c0_i32 = arith.constant 0 : i32
    %c0_i32_0 = arith.constant 0 : i32
    %c0_i32_1 = arith.constant 0 : i32
    return %c0_i32, %c0_i32_0 : i32, i32
  }
  func.func @transform_10(%arg0: i32) -> (i32, i32) {
    %c0_i32 = arith.constant 0 : i32
    %c0_i32_0 = arith.constant 0 : i32
    %c0_i32_1 = arith.constant 0 : i32
    return %c0_i32, %c0_i32_0 : i32, i32
  }
  func.func @transform_11(%arg0: i32) -> (i32, i32, i32) {
    %c0_i32 = arith.constant 0 : i32
    %c0_i32_0 = arith.constant 0 : i32
    %c0_i32_1 = arith.constant 0 : i32
    return %arg0, %c0_i32, %c0_i32_0 : i32, i32, i32
  }
}

</mosaic_0001>

<bundles_post_ra>
// kernel: net_forward.1
= control target key start
LH: loop header
LB: loop body
LE: loop exit
PB: predicated region body
PF: predicated region fallthrough
CT: control target
= control target key end

     0   :  { %s5428_s17 = smov 0   ;;  %s8928_s0 = inlined_call_operand.vmem [shape: bf16[2,16,1664], index: 0, kind: input, shape index: {}]   ;;  %s8929_s1 = inlined_call_operand.vmem [shape: bf16[16,400], index: 1, kind: input, shape index: {}]   ;;  %s8930_s2 = inlined_call_operand.vmem [shape: f32[16,1], index: 2, kind: input, shape index: {}]   ;;  %s8931_s3 = inlined_call_operand.vmem [shape: bf16[16,400], index: 3, kind: input, shape index: {}]   ;;  %s8932_s4 = inlined_call_operand.vmem [shape: f32[16,1], index: 4, kind: input, shape index: {}]   ;;  %s8933_s5 = inlined_call_operand.vmem [shape: bf16[128,400], index: 5, kind: input, shape index: {}]   ;;  %s8934_s6 = inlined_call_operand.vmem [shape: f32[128,1], index: 6, kind: input, shape index: {}]   ;;  %s8935_s7 = inlined_call_operand.vmem [shape: bf16[128,128], index: 7, kind: input, shape index: {}]   ;;  %s8936_s8 = inlined_call_operand.vmem [shape: f32[128,1], index: 8, kind: input, shape index: {}]   ;;  %s8937_s9 = inlined_call_operand.vmem [shape: bf16[128,128], index: 9, kind: input, shape index: {}]   ;;  %s8938_s10 = inlined_call_operand.vmem [shape: f32[128,1], index: 10, kind: input, shape index: {}]   ;;  %s8939_s11 = inlined_call_operand.vmem [shape: f32[2,128,1], index: 11, kind: output, shape index: {}]  }
   0x1 LB: > { %s4652_s18 = sadd.s32 4294967295, %s5340_s17   ;;  %p4656_p0 = scmp.ge.s32.totalorder %s5340_s17, 1  ;;  %s5340_s17 = sphi %s5428_s17, %s21_s17  }
   0x2   : > { %p337_p1 = scmp.lt.s32.totalorder %s5340_s17, 3 }
   0x4   : > { %p338_p2 = pnand %p4656_p0, %p337_p1 }
   0x5   : > { %p377_p3 = scmp.lt.s32.totalorder (!%p338_p2), %s4652_s18, 1  ;;  %s8949_s23 = smov (!%p338_p2), 127   ;;  %v5571_v4 = vld [vmem:[%s8929_s1 + $0x4] ss:$16 sps:$4 sm:$0xff] (!%p338_p2)   ;;  %vm489_vm0 = vcmask (!%p338_p2), 1039360   ;;  %vm8964_vm1 = vcmask (!%p338_p2), 1031168  }
   0x6   : > { %341 = sbr.rel (%p338_p2) target bundleno = 3307 (0xceb), region = 64  ;;  %s8962_s24 = smov (!%p338_p2), 126   ;;  %1702 = vmatprep.mubr.bf16.mxu0 (!%p338_p2), %v5571_v4  ;;  %1788 = vmatprep.mubr.bf16.mxu1 (!%p338_p2), %v5571_v4  ;;  %vm8959_vm2 = vcmask (!%p338_p2), 1022976   ;;  %vm8958_vm3 = vcmask (!%p338_p2), 1014784   ;;  %vm677_vm4 = vcmask (!%p338_p2), 785408   ;;  %vm1192_vm5 = vcmask (!%p338_p2), 793600  }
   0x7   : > { %s5344_s25 = smov (!%p338_p2), 125   ;;  %s5345_s26 = smov (!%p338_p2), 124   ;;  %vm724_vm6 = vcmask (!%p338_p2), 777216   ;;  %vm771_vm7 = vcmask (!%p338_p2), 769024   ;;  %vm818_vm8 = vcmask (!%p338_p2), 760832   ;;  %vm865_vm9 = vcmask (!%p338_p2), 752640  }
   0x8   : > { %s5346_s27 = smov (!%p338_p2), 96   ;;  %s5347_s28 = smov (!%p338_p2), 97   ;;  %vm912_vm10 = vcmask (!%p338_p2), 523264   ;;  %vm959_vm11 = vcmask (!%p338_p2), 515072   ;;  %vm1006_vm12 = vcmask (!%p338_p2), 506880   ;;  %vm1053_vm13 = vcmask (!%p338_p2), 498688  }
   0x9   : > { %s5348_s29 = smov (!%p338_p2), 95   ;;  %s8956_s30 = smov (!%p338_p2), 94   ;;  %vm8948_vm14 = vcmask (!%p338_p2), 490496   ;;  %vm8953_vm15 = vcmask (!%p338_p2), 261120  }
   0xa   : > { %s8954_s12 = smov (!%p338_p2), 93   ;;  %s8951_s13 = smov (!%p338_p2), 92  }
   0xb   : > { %s8946_s14 = smov (!%p338_p2), 64   ;;  %s8944_s15 = smov (!%p338_p2), 63  }
   0xc   : > { %s8940_s16 = smov (!%p338_p2), 62   ;;  %s8965_s20 = smov (!%p338_p2), 60  }
   0xd   : > { %s9049_s18 = smov (!%p377_p3, %s4652_s18), 1  ;;  %s8960_s21 = smov 32  }
   0xe   : > { %s5018_s19 = smul.u32 104, %s9049_s18 }
  0x10   : > { %s5442_s22 = scalar_lea.vmem %s8928_s0, %s5018_s19  ;;  %s8942_s19 = smov 61  }
  0x11   : > { %v5445_v0 = vld [vmem:[%s5442_s22 + $0x4] ss:$52 sps:$4 sm:$0xff]   ;;  %v5448_v1 = vld [vmem:[%s5442_s22] ss:$52 sps:$4 sm:$0xff]   ;;  %v5453_v2 = vld [vmem:[%s5442_s22 + $0x8] ss:$52 sps:$4 sm:$0xff]  }
  0x12   : > { %467 = vrot.lane.b32.xlu0 %v5445_v0, %s8949_s23  ;;  %v5456_v3 = vld [vmem:[%s5442_s22 + $0xc] ss:$52 sps:$4 sm:$0xff]   ;;  %1670 = vmatprep.subr.bf16.mxu0 %v5445_v0  ;;  %v5584_v5 = vld [vmem:[%s5442_s22 + $0x10] ss:$52 sps:$4 sm:$0xff]   ;;  %v5612_v23 = vld [vmem:[%s5442_s22 + $0x14] ss:$52 sps:$4 sm:$0xff]  }
  0x13   : > { %465 = vrot.lane.b32.xlu1 %v5448_v1, %s8949_s23  ;;  %1671 = vmatpush1.bf16.msra.mxu0 %v5448_v1 }
  0x14   : > { %1756 = vmatprep.subr.bf16.mxu1 %v5456_v3 }
  0x15   : > { %1757 = vmatpush1.bf16.msra.mxu1 %v5453_v2 }
  0x16   : > { %469 = vrot.lane.b32.xlu0 %v5453_v2, %s8949_s23 }
  0x17   : > { %514 = vrot.lane.b32.xlu1 %v5445_v0, %s8962_s24 }
  0x1a   : > { %516 = vrot.lane.b32.xlu0 %v5453_v2, %s8962_s24 }
  0x1b   : > { %471 = vrot.lane.b32.xlu1 %v5456_v3, %s8949_s23 }
  0x1e   : > { %512 = vrot.lane.b32.xlu0 %v5448_v1, %s8962_s24 }
  0x1f   : > { %561 = vrot.lane.b32.xlu1 %v5445_v0, %s5344_s25 }
  0x22   : > { %563 = vrot.lane.b32.xlu0 %v5453_v2, %s5344_s25 }
  0x23   : > { %518 = vrot.lane.b32.xlu1 %v5456_v3, %s8962_s24 }
  0x26   : > { %559 = vrot.lane.b32.xlu0 %v5448_v1, %s5344_s25 }
  0x27   : > { %608 = vrot.lane.b32.xlu1 %v5445_v0, %s5345_s26 }
  0x2a   : > { %610 = vrot.lane.b32.xlu0 %v5453_v2, %s5345_s26 }
  0x2b   : > { %565 = vrot.lane.b32.xlu1 %v5456_v3, %s5344_s25 }
  0x2e   : > { %606 = vrot.lane.b32.xlu0 %v5448_v1, %s5345_s26 }
  0x2f   : > { %655 = vrot.lane.b32.xlu1 %v5445_v0, %s5346_s27 }
  0x32   : > { %657 = vrot.lane.b32.xlu0 %v5453_v2, %s5346_s27 }
  0x33   : > { %653 = vrot.lane.b32.xlu1 %v5448_v1, %s5346_s27 }
  0x36   : > { %1170 = vrot.lane.b32.xlu0 %v5445_v0, %s5347_s28 }
  0x37   : > { %1172 = vrot.lane.b32.xlu1 %v5453_v2, %s5347_s28 }
  0x3a   : > { %1174 = vrot.lane.b32.xlu0 %v5456_v3, %s5347_s28 }
  0x3b   : > { %702 = vrot.lane.b32.xlu1 %v5445_v0, %s5348_s29 }
  0x3e   : > { %704 = vrot.lane.b32.xlu0 %v5453_v2, %s5348_s29 }
  0x3f   : > { %659 = vrot.lane.b32.xlu1 %v5456_v3, %s5346_s27 }
  0x42   : > { %700 = vrot.lane.b32.xlu0 %v5448_v1, %s5348_s29 }
  0x43   : > { %749 = vrot.lane.b32.xlu1 %v5445_v0, %s8956_s30 }
  0x46   : > { %751 = vrot.lane.b32.xlu0 %v5453_v2, %s8956_s30 }
  0x47   : > { %706 = vrot.lane.b32.xlu1 %v5456_v3, %s5348_s29 }
  0x4a   : > { %747 = vrot.lane.b32.xlu0 %v5448_v1, %s8956_s30 }
  0x4b   : > { %796 = vrot.lane.b32.xlu1 %v5445_v0, %s8954_s12 }
  0x4e   : > { %798 = vrot.lane.b32.xlu0 %v5453_v2, %s8954_s12 }
  0x4f   : > { %753 = vrot.lane.b32.xlu1 %v5456_v3, %s8956_s30 }
  0x52   : > { %794 = vrot.lane.b32.xlu0 %v5448_v1, %s8954_s12 }
  0x53   : > { %843 = vrot.lane.b32.xlu1 %v5445_v0, %s8951_s13 }
  0x56   : > { %845 = vrot.lane.b32.xlu0 %v5453_v2, %s8951_s13 }
  0x57   : > { %800 = vrot.lane.b32.xlu1 %v5456_v3, %s8954_s12 }
  0x5a   : > { %841 = vrot.lane.b32.xlu0 %v5448_v1, %s8951_s13 }
  0x5b   : > { %890 = vrot.lane.b32.xlu1 %v5445_v0, %s8946_s14 }
  0x5e   : > { %892 = vrot.lane.b32.xlu0 %v5453_v2, %s8946_s14 }
  0x5f   : > { %888 = vrot.lane.b32.xlu1 %v5448_v1, %s8946_s14 }
  0x62   : > { %937 = vrot.lane.b32.xlu0 %v5445_v0, %s8944_s15 }
  0x63   : > { %939 = vrot.lane.b32.xlu1 %v5453_v2, %s8944_s15 }
  0x66   : > { %935 = vrot.lane.b32.xlu0 %v5448_v1, %s8944_s15  ;;  %s5358_s15 = smov 31  }
  0x67   : > { %984 = vrot.lane.b32.xlu1 %v5445_v0, %s8940_s16 }
  0x6a   : > { %986 = vrot.lane.b32.xlu0 %v5453_v2, %s8940_s16 }
  0x6b   : > { %982 = vrot.lane.b32.xlu1 %v5448_v1, %s8940_s16  ;;  %s8972_s16 = smov 92  }
  0x6e   : > { %1031 = vrot.lane.b32.xlu0 %v5445_v0, %s8942_s19 }
  0x6f   : > { %1033 = vrot.lane.b32.xlu1 %v5453_v2, %s8942_s19 }
  0x72   : > { %1029 = vrot.lane.b32.xlu0 %v5448_v1, %s8942_s19  ;;  %s8973_s19 = smov 64  }
  0x73   : > { %1078 = vrot.lane.b32.xlu1 %v5445_v0, %s8965_s20 }
  0x76   : > { %1080 = vrot.lane.b32.xlu0 %v5453_v2, %s8965_s20 }
  0x77   : > { %1076 = vrot.lane.b32.xlu1 %v5448_v1, %s8965_s20 }
  0x7a   : > { %1125 = vrot.lane.b32.xlu0 %v5445_v0, %s8960_s21 }
  0x7b   : > { %1127 = vrot.lane.b32.xlu1 %v5453_v2, %s8960_s21 }
  0x7e   : > { %1123 = vrot.lane.b32.xlu0 %v5448_v1, %s8960_s21 }
  0x7f   : > { %1222 = vrot.lane.b32.xlu1 %v5445_v0, %s5358_s15 }
  0x82   : > { %1224 = vrot.lane.b32.xlu0 %v5453_v2, %s5358_s15 }
  0x83   : > { %1220 = vrot.lane.b32.xlu1 %v5448_v1, %s5358_s15 }
  0x84   : > { %v468_v6 = vpop.permute.xlu0 %467 }
  0x85   : > { %v466_v7 = vpop.permute.xlu1 %465 }
  0x86   : > { %v490_v11 = vsel %vm489_vm0, %v466_v7, %v468_v6 }
  0x87   : > { %473 = vrot.lane.b32.xlu1 %v5584_v5, %s8949_s23 }
  0x88   : > { %v470_v8 = vpop.permute.xlu0 %469 }
  0x89   : > { %v515_v9 = vpop.permute.xlu1 %514  ;;  %v491_v10 = vsel %vm489_vm0, %v468_v6, %v470_v8 }
  0x8a   : > { %1246 = vrot.lane.b32.xlu0 %v491_v10, %s5358_s15  ;;  %1672 = vmatprep.subr.bf16.mxu0 %v491_v10 }
  0x8b   : > { %1673 = vmatpush1.bf16.msra.mxu0 %v490_v11 }
  0x8c   : > { %v517_v12 = vpop.permute.xlu0 %516 }
  0x8d   : > { %v5591_v13 = vpop.permute.xlu1 %471  ;;  %v538_v14 = vsel %vm8964_vm1, %v515_v9, %v517_v12 }
  0x8e   : > { %1244 = vrot.lane.b32.xlu0 %v490_v11, %s5358_s15  ;;  %v5597_v15 = vsel %vm489_vm0, %v470_v8, %v5591_v13  ;;  %1674 = vmatprep.subr.bf16.mxu0 %v538_v14 }
  0x8f   : > { %1248 = vrot.lane.b32.xlu1 %v5597_v15, %s5358_s15 }
  0x90   : > { %v513_v16 = vpop.permute.xlu0 %512 }
  0x91   : > { %v562_v17 = vpop.permute.xlu1 %561  ;;  %v537_v18 = vsel %vm8964_vm1, %v513_v16, %v515_v9 }
  0x92   : > { %1270 = vrot.lane.b32.xlu0 %v538_v14, %s5358_s15  ;;  %1675 = vmatpush1.bf16.msra.mxu0 %v537_v18 }
  0x94   : > { %v564_v19 = vpop.permute.xlu0 %563 }
  0x95   : > { %v5603_v20 = vpop.permute.xlu1 %518  ;;  %v585_v21 = vsel %vm8959_vm2, %v562_v17, %v564_v19 }
  0x96   : > { %1268 = vrot.lane.b32.xlu0 %v537_v18, %s5358_s15  ;;  %v5609_v22 = vsel %vm8964_vm1, %v517_v12, %v5603_v20  ;;  %1676 = vmatprep.subr.bf16.mxu0 %v585_v21 }
  0x97   : > { %1272 = vrot.lane.b32.xlu1 %v5609_v22, %s5358_s15 }
  0x98   : > { %v560_v24 = vpop.permute.xlu0 %559 }
  0x99   : > { %v609_v25 = vpop.permute.xlu1 %608  ;;  %v584_v26 = vsel %vm8959_vm2, %v560_v24, %v562_v17 }
  0x9a   : > { %475 = vrot.lane.b32.xlu0 %v5612_v23, %s8949_s23  ;;  %1677 = vmatpush1.bf16.msra.mxu0 %v584_v26 }
  0x9b   : > { %520 = vrot.lane.b32.xlu1 %v5584_v5, %s8962_s24 }
  0x9c   : > { %v5621_v27 = vpop.permute.xlu0 %610 }
  0x9d   : > { %v5623_v28 = vpop.permute.xlu1 %565  ;;  %v632_v29 = vsel %vm8958_vm3, %v609_v25, %v5621_v27 }
  0x9e   : > { %v5629_v30 = vsel %vm8959_vm2, %v564_v19, %v5623_v28  ;;  %1678 = vmatprep.subr.bf16.mxu0 %v632_v29 }
  0x9f   : > { %1294 = vrot.lane.b32.xlu1 %v585_v21, %s5358_s15  ;;  %1296 = vrot.lane.b32.xlu0 %v5629_v30, %s5358_s15 }
  0xa0   : > { %v607_v31 = vpop.permute.xlu0 %606 }
  0xa1   : > { %v656_v32 = vpop.permute.xlu1 %655  ;;  %v631_v33 = vsel %vm8958_vm3, %v607_v31, %v609_v25 }
  0xa2   : > { %1679 = vmatpush1.bf16.msra.mxu0 %v631_v33 }
  0xa3   : > { %1292 = vrot.lane.b32.xlu1 %v584_v26, %s5358_s15  ;;  %567 = vrot.lane.b32.xlu0 %v5584_v5, %s5344_s25 }
  0xa4   : > { %v658_v34 = vpop.permute.xlu0 %657 }
  0xa5   : > { %v654_v35 = vpop.permute.xlu1 %653  ;;  %v679_v36 = vsel %vm677_vm4, %v656_v32, %v658_v34 }
  0xa6   : > { %1680 = vmatprep.subr.bf16.mxu0 %v679_v36  ;;  %v678_v37 = vsel %vm677_vm4, %v654_v35, %v656_v32  ;;  %v5745_v35 = vld [vmem:[%s5442_s22 + $0x18] ss:$52 sps:$4 sm:$0xff]  }
  0xa7   : > { %522 = vrot.lane.b32.xlu1 %v5612_v23, %s8962_s24  ;;  %1681 = vmatpush1.bf16.msra.mxu0 %v678_v37 }
  0xa8   : > { %v1171_v38 = vpop.permute.xlu0 %1170 }
  0xa9   : > { %v1173_v39 = vpop.permute.xlu1 %1172 }
  0xaa   : > { %v1193_v40 = vsel %vm1192_vm5, %v1171_v38, %v1173_v39 }
  0xab   : > { %1318 = vrot.lane.b32.xlu0 %v1193_v40, %s5358_s15 }
  0xac   : > { %v5644_v41 = vpop.permute.xlu0 %1174 }
  0xad   : > { %v703_v42 = vpop.permute.xlu1 %702  ;;  %v1194_v43 = vsel %vm1192_vm5, %v1173_v39, %v5644_v41 }
  0xae   : > { %1320 = vrot.lane.b32.xlu1 %v1194_v43, %s5358_s15 }
  0xaf   : > { %1316 = vrot.lane.b32.xlu0 %v1171_v38, %s5358_s15 }
  0xb0   : > { %v705_v44 = vpop.permute.xlu0 %704 }
  0xb1   : > { %v5650_v45 = vpop.permute.xlu1 %659  ;;  %v726_v46 = vsel %vm724_vm6, %v703_v42, %v705_v44 }
  0xb2   : > { %612 = vrot.lane.b32.xlu1 %v5456_v3, %s5345_s26  ;;  %1682 = vmatprep.subr.bf16.mxu0 %v726_v46  ;;  %v5665_v52 = vsel %vm677_vm4, %v658_v34, %v5650_v45 }
  0xb3   : > { %614 = vrot.lane.b32.xlu0 %v5584_v5, %s5345_s26 }
  0xb4   : > { %v701_v47 = vpop.permute.xlu0 %700 }
  0xb5   : > { %v750_v48 = vpop.permute.xlu1 %749  ;;  %v725_v49 = vsel %vm724_vm6, %v701_v47, %v703_v42 }
  0xb6   : > { %569 = vrot.lane.b32.xlu1 %v5612_v23, %s5344_s25  ;;  %1683 = vmatpush1.bf16.msra.mxu0 %v725_v49 }
  0xb7   : > { %1342 = vrot.lane.b32.xlu0 %v679_v36, %s5358_s15 }
  0xb8   : > { %v752_v50 = vpop.permute.xlu0 %751 }
  0xb9   : > { %v5661_v51 = vpop.permute.xlu1 %706  ;;  %v773_v53 = vsel %vm771_vm7, %v750_v48, %v752_v50 }
  0xba   : > { %1344 = vrot.lane.b32.xlu1 %v5665_v52, %s5358_s15  ;;  %1684 = vmatprep.subr.bf16.mxu0 %v773_v53  ;;  %v5684_v62 = vsel %vm724_vm6, %v705_v44, %v5661_v51 }
  0xbb   : > { %1340 = vrot.lane.b32.xlu0 %v656_v32, %s5358_s15 }
  0xbc   : > { %v748_v54 = vpop.permute.xlu0 %747 }
  0xbd   : > { %v797_v55 = vpop.permute.xlu1 %796  ;;  %v772_v56 = vsel %vm771_vm7, %v748_v54, %v750_v48 }
  0xbe   : > { %661 = vrot.lane.b32.xlu1 %v5584_v5, %s5346_s27  ;;  %1685 = vmatpush1.bf16.msra.mxu0 %v772_v56 }
  0xbf   : > { %1176 = vrot.lane.b32.xlu0 %v5584_v5, %s5347_s28 }
  0xc0   : > { %v799_v57 = vpop.permute.xlu0 %798 }
  0xc1   : > { %v5676_v58 = vpop.permute.xlu1 %753  ;;  %v820_v59 = vsel %vm818_vm8, %v797_v55, %v799_v57 }
  0xc2   : > { %1178 = vrot.lane.b32.xlu1 %v5612_v23, %s5347_s28  ;;  %1686 = vmatprep.subr.bf16.mxu0 %v820_v59  ;;  %v5704_v9 = vsel %vm771_vm7, %v752_v50, %v5676_v58 }
  0xc3   : > { %1366 = vrot.lane.b32.xlu0 %v726_v46, %s5358_s15  ;;  %v5766_v46 = vld [vmem:[%s5442_s22 + $0x1c] ss:$52 sps:$4 sm:$0xff]  }
  0xc4   : > { %v795_v60 = vpop.permute.xlu0 %794 }
  0xc5   : > { %v844_v61 = vpop.permute.xlu1 %843  ;;  %v819_v63 = vsel %vm818_vm8, %v795_v60, %v797_v55 }
  0xc6   : > { %1368 = vrot.lane.b32.xlu1 %v5684_v62, %s5358_s15  ;;  %1687 = vmatpush1.bf16.msra.mxu0 %v819_v63 }
  0xc7   : > { %1364 = vrot.lane.b32.xlu0 %v703_v42, %s5358_s15 }
  0xc8   : > { %v5690_v0 = vpop.permute.xlu0 %845 }
  0xc9   : > { %v5692_v1 = vpop.permute.xlu1 %800  ;;  %v867_v2 = vsel %vm865_vm9, %v844_v61, %v5690_v0 }
  0xca   : > { %708 = vrot.lane.b32.xlu1 %v5584_v5, %s5348_s29  ;;  %1688 = vmatprep.subr.bf16.mxu0 %v867_v2  ;;  %v5725_v24 = vsel %vm818_vm8, %v799_v57, %v5692_v1  ;;  %v5791_v57 = vld [vmem:[%s8929_s1 + $0xc] ss:$16 sps:$4 sm:$0xff]  }
  0xcb   : > { %663 = vrot.lane.b32.xlu0 %v5612_v23, %s5346_s27 }
  0xcc   : > { %v842_v6 = vpop.permute.xlu0 %841 }
  0xcd   : > { %v891_v7 = vpop.permute.xlu1 %890  ;;  %v866_v8 = vsel %vm865_vm9, %v842_v6, %v844_v61 }
  0xce   : > { %1390 = vrot.lane.b32.xlu1 %v773_v53, %s5358_s15  ;;  %1689 = vmatpush1.bf16.msra.mxu0 %v866_v8 }
  0xcf   : > { %1392 = vrot.lane.b32.xlu0 %v5704_v9, %s5358_s15 }
  0xd0   : > { %v5708_v10 = vpop.permute.xlu0 %892 }
  0xd1   : > { %v889_v11 = vpop.permute.xlu1 %888  ;;  %v914_v12 = vsel %vm912_vm10, %v891_v7, %v5708_v10 }
  0xd2   : > { %1388 = vrot.lane.b32.xlu1 %v750_v48, %s5358_s15  ;;  %1690 = vmatprep.subr.bf16.mxu0 %v914_v12  ;;  %v913_v14 = vsel %vm912_vm10, %v889_v11, %v891_v7 }
  0xd3   : > { %755 = vrot.lane.b32.xlu0 %v5584_v5, %s8956_s30  ;;  %1691 = vmatpush1.bf16.msra.mxu0 %v913_v14 }
  0xd4   : > { %v938_v16 = vpop.permute.xlu0 %937 }
  0xd5   : > { %v5716_v17 = vpop.permute.xlu1 %939 }
  0xd6   : > { %710 = vrot.lane.b32.xlu1 %v5612_v23, %s5348_s29  ;;  %v961_v18 = vsel %vm959_vm11, %v938_v16, %v5716_v17 }
  0xd7   : > { %1414 = vrot.lane.b32.xlu0 %v820_v59, %s5358_s15  ;;  %1692 = vmatprep.subr.bf16.mxu0 %v961_v18 }
  0xd8   : > { %v936_v19 = vpop.permute.xlu0 %935 }
  0xd9   : > { %v985_v21 = vpop.permute.xlu1 %984  ;;  %v960_v25 = vsel %vm959_vm11, %v936_v19, %v938_v16 }
  0xda   : > { %1416 = vrot.lane.b32.xlu1 %v5725_v24, %s5358_s15  ;;  %1693 = vmatpush1.bf16.msra.mxu0 %v960_v25 }
  0xdb   : > { %1412 = vrot.lane.b32.xlu0 %v797_v55, %s5358_s15  ;;  %v5780_v55 = vld [vmem:[%s8929_s1] ss:$16 sps:$4 sm:$0xff]  }
  0xdc   : > { %v5731_v26 = vpop.permute.xlu0 %986 }
  0xdd   : > { %v983_v29 = vpop.permute.xlu1 %982  ;;  %v1008_v31 = vsel %vm1006_vm12, %v985_v21, %v5731_v26 }
  0xde   : > { %802 = vrot.lane.b32.xlu1 %v5584_v5, %s8954_s12  ;;  %1694 = vmatprep.subr.bf16.mxu0 %v1008_v31  ;;  %v1007_v32 = vsel %vm1006_vm12, %v983_v29, %v985_v21 }
  0xdf   : > { %757 = vrot.lane.b32.xlu0 %v5612_v23, %s8956_s30  ;;  %1695 = vmatpush1.bf16.msra.mxu0 %v1007_v32 }
  0xe0   : > { %v1032_v33 = vpop.permute.xlu0 %1031 }
  0xe1   : > { %v5740_v34 = vpop.permute.xlu1 %1033 }
  0xe2   : > { %847 = vrot.lane.b32.xlu1 %v5456_v3, %s8951_s13  ;;  %v1055_v36 = vsel %vm1053_vm13, %v1032_v33, %v5740_v34 }
  0xe3   : > { %849 = vrot.lane.b32.xlu0 %v5584_v5, %s8951_s13  ;;  %1696 = vmatprep.subr.bf16.mxu0 %v1055_v36  ;;  %s8971_s13 = smov 61  }
  0xe4   : > { %v1030_v37 = vpop.permute.xlu0 %1029 }
  0xe5   : > { %v1079_v38 = vpop.permute.xlu1 %1078  ;;  %v1054_v39 = vsel %vm1053_vm13, %v1030_v37, %v1032_v33 }
  0xe6   : > { %477 = vrot.lane.b32.xlu1 %v5745_v35, %s8949_s23  ;;  %1697 = vmatpush1.bf16.msra.mxu0 %v1054_v39 }
  0xe7   : > { %804 = vrot.lane.b32.xlu0 %v5612_v23, %s8954_s12 }
  0xe8   : > { %v5756_v40 = vpop.permute.xlu0 %1080 }
  0xe9   : > { %v1077_v42 = vpop.permute.xlu1 %1076  ;;  %v1102_v43 = vsel %vm8948_vm14, %v1079_v38, %v5756_v40 }
  0xea   : > { %894 = vrot.lane.b32.xlu1 %v5456_v3, %s8946_s14  ;;  %1698 = vmatprep.subr.bf16.mxu0 %v1102_v43  ;;  %v1101_v44 = vsel %vm8948_vm14, %v1077_v42, %v1079_v38  ;;  %vm1436_vm14 = vcmask 252928  }
  0xeb   : > { %896 = vrot.lane.b32.xlu0 %v5584_v5, %s8946_s14  ;;  %1699 = vmatpush1.bf16.msra.mxu0 %v1101_v44  ;;  %s8969_s14 = smov 63  }
  0xec   : > { %v1126_v47 = vpop.permute.xlu0 %1125 }
  0xed   : > { %v5768_v48 = vpop.permute.xlu1 %1127 }
  0xee   : > { %524 = vrot.lane.b32.xlu1 %v5745_v35, %s8962_s24  ;;  %v1149_v49 = vsel %vm8953_vm15, %v1126_v47, %v5768_v48 }
  0xef   : > { %479 = vrot.lane.b32.xlu0 %v5766_v46, %s8949_s23  ;;  %1700 = vmatprep.subr.bf16.mxu0 %v1149_v49  ;;  %s8970_s23 = smov 62  }
  0xf0   : > { %v1124_v50 = vpop.permute.xlu0 %1123 }
  0xf1   : > { %v1223_v53 = vpop.permute.xlu1 %1222  ;;  %v1148_v54 = vsel %vm8953_vm15, %v1124_v50, %v1126_v47  ;;  %vm1666_vm15 = vcmask 130048  }
  0xf2   : > { %941 = vrot.lane.b32.xlu1 %v5456_v3, %s8969_s14  ;;  %1701 = vmatpush1.bf16.msra.mxu0 %v1148_v54 }
  0xf3   : > { %943 = vrot.lane.b32.xlu0 %v5584_v5, %s8969_s14 }
  0xf4   : > { %v5786_v56 = vpop.permute.xlu0 %1224 }
  0xf5   : > { %v1221_v59 = vpop.permute.xlu1 %1220  ;;  %v1438_v60 = vsel %vm1436_vm14, %v1223_v53, %v5786_v56  ;;  %1703 = vmatmul.mubr.bf16.vlgmr.msra.gmra.mrb[0].mxu0 %v5780_v55 }
  0xf6   : > { %v1437_v61 = vsel %vm1436_vm14, %v1221_v59, %v1223_v53  ;;  %571 = vrot.lane.b32.xlu1 %v5745_v35, %s5344_s25  ;;  %1713 = vmatprep.subr.bf16.mxu0 %v1438_v60 }
  0xf7   : > { %526 = vrot.lane.b32.xlu0 %v5766_v46, %s8962_s24  ;;  %1714 = vmatpush1.bf16.msra.mxu0 %v1437_v61 }
  0xf8   : > { %4677 = vmatprep.mubr.msk.bf16.mxu0 %vm1666_vm15, %v5791_v57 }
  0xf9   : > { %v5803_v63 = vpop.permute.xlu1 %473 }
  0xfa   : > { %988 = vrot.lane.b32.xlu1 %v5456_v3, %s8970_s23  ;;  %v5810_v2 = vsel %vm489_vm0, %v5591_v13, %v5803_v63 }
  0xfb   : > { %990 = vrot.lane.b32.xlu0 %v5584_v5, %s8970_s23  ;;  %1758 = vmatprep.subr.bf16.mxu1 %v5810_v2 }
  0xfc   : > { %1759 = vmatpush1.bf16.msra.mxu1 %v5597_v15  ;;  %v1247_v6 = vpop.permute.xlu0 %1246 }
  0xfe   : > { %616 = vrot.lane.b32.xlu1 %v5612_v23, %s5345_s26 }
  0xff   : > { %618 = vrot.lane.b32.xlu0 %v5745_v35, %s5345_s26 }
 0x100   : > { %v1245_v7 = vpop.permute.xlu0 %1244 }
 0x101   : > { %v1448_v8 = vsel %vm1436_vm14, %v1245_v7, %v1247_v6  ;;  %v5821_v11 = vpop.permute.xlu1 %1248 }
 0x102   : > { %573 = vrot.lane.b32.xlu1 %v5766_v46, %s5344_s25  ;;  %v1449_v13 = vsel %vm1436_vm14, %v1247_v6, %v5821_v11 }
 0x103   : > { %1035 = vrot.lane.b32.xlu0 %v5456_v3, %s8971_s13  ;;  %1715 = vmatprep.subr.bf16.mxu0 %v1449_v13 }
 0x104   : > { %1716 = vmatpush1.bf16.msra.mxu0 %v1448_v8  ;;  %v1271_v15 = vpop.permute.xlu0 %1270 }
 0x106   : > { %1037 = vrot.lane.b32.xlu1 %v5584_v5, %s8971_s13 }
 0x107   : > { %665 = vrot.lane.b32.xlu0 %v5745_v35, %s5346_s27 }
 0x108   : > { %v1269_v12 = vpop.permute.xlu0 %1268 }
 0x109   : > { %v1459_v14 = vsel %vm1436_vm14, %v1269_v12, %v1271_v15  ;;  %v5834_v16 = vpop.permute.xlu1 %1272 }
 0x10a   : > { %1180 = vrot.lane.b32.xlu1 %v5745_v35, %s5347_s28  ;;  %v1460_v18 = vsel %vm1436_vm14, %v1271_v15, %v5834_v16 }
 0x10b   : > { %1182 = vrot.lane.b32.xlu0 %v5766_v46, %s5347_s28  ;;  %1717 = vmatprep.subr.bf16.mxu0 %v1460_v18 }
 0x10c   : > { %1718 = vmatpush1.bf16.msra.mxu0 %v1459_v14  ;;  %v5842_v19 = vpop.permute.xlu0 %475 }
 0x10d   : > { %v521_v21 = vpop.permute.xlu1 %520  ;;  %v5893_v47 = vsel %vm489_vm0, %v5803_v63, %v5842_v19 }
 0x10e   : > { %1082 = vrot.lane.b32.xlu1 %v5456_v3, %s8965_s20  ;;  %v540_v25 = vsel %vm8964_vm1, %v5603_v20, %v521_v21 }
 0x10f   : > { %1084 = vrot.lane.b32.xlu0 %v5584_v5, %s8965_s20  ;;  %1760 = vmatprep.subr.bf16.mxu1 %v540_v25 }
 0x110   : > { %1761 = vmatpush1.bf16.msra.mxu1 %v5609_v22 }
 0x111   : > { %v5851_v29 = vpop.permute.xlu0 %1296  ;;  %v1295_v31 = vpop.permute.xlu1 %1294 }
 0x112   : > { %712 = vrot.lane.b32.xlu1 %v5745_v35, %s5348_s29  ;;  %v1471_v32 = vsel %vm1436_vm14, %v1295_v31, %v5851_v29 }
 0x113   : > { %667 = vrot.lane.b32.xlu0 %v5766_v46, %s5346_s27  ;;  %1719 = vmatprep.subr.bf16.mxu0 %v1471_v32 }
 0x115   : > { %v568_v20 = vpop.permute.xlu0 %567  ;;  %v1293_v33 = vpop.permute.xlu1 %1292 }
 0x116   : > { %v1470_v36 = vsel %vm1436_vm14, %v1293_v33, %v1295_v31  ;;  %1129 = vrot.lane.b32.xlu1 %v5456_v3, %s8960_s21  ;;  %v587_v22 = vsel %vm8959_vm2, %v5623_v28, %v568_v20 }
 0x117   : > { %1131 = vrot.lane.b32.xlu0 %v5584_v5, %s8960_s21  ;;  %1720 = vmatpush1.bf16.msra.mxu0 %v1470_v36 }
 0x118   : > { %1762 = vmatprep.subr.bf16.mxu1 %v587_v22 }
 0x119   : > { %1763 = vmatpush1.bf16.msra.mxu1 %v5629_v30  ;;  %v5871_v37 = vpop.permute.xlu1 %522 }
 0x11a   : > { %759 = vrot.lane.b32.xlu1 %v5745_v35, %s8956_s30 }
 0x11b   : > { %714 = vrot.lane.b32.xlu0 %v5766_v46, %s5348_s29 }
 0x11d   : > { %v1319_v38 = vpop.permute.xlu0 %1318 }
 0x11e   : > { %1226 = vrot.lane.b32.xlu1 %v5456_v3, %s5358_s15 }
 0x11f   : > { %1228 = vrot.lane.b32.xlu0 %v5584_v5, %s5358_s15 }
 0x120   : > { %v5877_v28 = vpop.permute.xlu1 %1320 }
 0x121   : > { %v1317_v39 = vpop.permute.xlu0 %1316  ;;  %v1482_v30 = vsel %vm1436_vm14, %v1319_v38, %v5877_v28 }
 0x122   : > { %v1481_v42 = vsel %vm1436_vm14, %v1317_v39, %v1319_v38  ;;  %806 = vrot.lane.b32.xlu1 %v5745_v35, %s8954_s12  ;;  %1721 = vmatprep.subr.bf16.mxu0 %v1482_v30 }
 0x123   : > { %761 = vrot.lane.b32.xlu0 %v5766_v46, %s8956_s30  ;;  %1722 = vmatpush1.bf16.msra.mxu0 %v1481_v42  ;;  %s8974_s30 = smov 127  }
 0x124   : > { %v613_v3 = vpop.permute.xlu1 %612 }
 0x125   : > { %v5886_v43 = vpop.permute.xlu0 %614  ;;  %v633_v44 = vsel %vm8958_vm3, %v5621_v27, %v613_v3 }
 0x126   : > { %1250 = vrot.lane.b32.xlu1 %v5810_v2, %s5358_s15  ;;  %v634_v49 = vsel %vm8958_vm3, %v613_v3, %v5886_v43  ;;  %v5917_v2 = vsel %vm8964_vm1, %v521_v21, %v5871_v37 }
 0x127   : > { %1252 = vrot.lane.b32.xlu0 %v5893_v47, %s5358_s15  ;;  %1764 = vmatprep.subr.bf16.mxu1 %v634_v49 }
 0x128   : > { %1765 = vmatpush1.bf16.msra.mxu1 %v633_v44  ;;  %v5901_v50 = vpop.permute.xlu1 %569  ;;  %v5992_v44 = vld [vmem:[%s8929_s1 + $0x8] ss:$16 sps:$4 sm:$0xff]  }
 0x129   : > { %v1343_v53 = vpop.permute.xlu0 %1342  ;;  %v5935_v15 = vsel %vm8959_vm2, %v568_v20, %v5901_v50 }
 0x12a   : > { %851 = vrot.lane.b32.xlu1 %v5612_v23, %s8972_s16 }
 0x12b   : > { %853 = vrot.lane.b32.xlu0 %v5745_v35, %s8972_s16 }
 0x12c   : > { %v5907_v27 = vpop.permute.xlu1 %1344 }
 0x12d   : > { %v1341_v54 = vpop.permute.xlu0 %1340  ;;  %v1493_v59 = vsel %vm1436_vm14, %v1343_v53, %v5907_v27 }
 0x12e   : > { %v1492_v60 = vsel %vm1436_vm14, %v1341_v54, %v1343_v53  ;;  %808 = vrot.lane.b32.xlu1 %v5766_v46, %s8954_s12  ;;  %1723 = vmatprep.subr.bf16.mxu0 %v1493_v59  ;;  %s8979_s12 = smov 94  }
 0x12f   : > { %1274 = vrot.lane.b32.xlu0 %v540_v25, %s5358_s15  ;;  %1724 = vmatpush1.bf16.msra.mxu0 %v1492_v60 }
 0x130   : > { %v662_v61 = vpop.permute.xlu1 %661 }
 0x131   : > { %v1177_v63 = vpop.permute.xlu0 %1176  ;;  %v681_v6 = vsel %vm677_vm4, %v5650_v45, %v662_v61 }
 0x132   : > { %1276 = vrot.lane.b32.xlu1 %v5917_v2, %s5358_s15  ;;  %1766 = vmatprep.subr.bf16.mxu1 %v681_v6  ;;  %v1195_v25 = vsel %vm1192_vm5, %v5644_v41, %v1177_v63 }
 0x133   : > { %898 = vrot.lane.b32.xlu0 %v5612_v23, %s8973_s19  ;;  %1767 = vmatpush1.bf16.msra.mxu1 %v5665_v52 }
 0x134   : > { %v5926_v7 = vpop.permute.xlu1 %1178 }
 0x135   : > { %v1367_v8 = vpop.permute.xlu0 %1366  ;;  %v1196_v20 = vsel %vm1192_vm5, %v1177_v63, %v5926_v7 }
 0x136   : > { %900 = vrot.lane.b32.xlu1 %v5745_v35, %s8973_s19 }
 0x137   : > { %1298 = vrot.lane.b32.xlu0 %v587_v22, %s5358_s15 }
 0x138   : > { %v5931_v13 = vpop.permute.xlu1 %1368 }
 0x139   : > { %v1365_v45 = vpop.permute.xlu0 %1364  ;;  %v1504_v12 = vsel %vm1436_vm14, %v1367_v8, %v5931_v13 }
 0x13a   : > { %v1503_v52 = vsel %vm1436_vm14, %v1365_v45, %v1367_v8  ;;  %1300 = vrot.lane.b32.xlu1 %v5935_v15, %s5358_s15  ;;  %1725 = vmatprep.subr.bf16.mxu0 %v1504_v12 }
 0x13b   : > { %945 = vrot.lane.b32.xlu0 %v5612_v23, %s8969_s14  ;;  %1726 = vmatpush1.bf16.msra.mxu0 %v1503_v52 }
 0x13c   : > { %v709_v14 = vpop.permute.xlu1 %708 }
 0x13d   : > { %v5944_v18 = vpop.permute.xlu0 %663  ;;  %v728_v21 = vsel %vm724_vm6, %v5661_v51, %v709_v14 }
 0x13e   : > { %947 = vrot.lane.b32.xlu1 %v5745_v35, %s8969_s14  ;;  %1768 = vmatprep.subr.bf16.mxu1 %v728_v21  ;;  %v5974_v39 = vsel %vm677_vm4, %v662_v61, %v5944_v18 }
 0x13f   : > { %1322 = vrot.lane.b32.xlu0 %v1195_v25, %s5358_s15  ;;  %1769 = vmatpush1.bf16.msra.mxu1 %v5684_v62  ;;  %v6064_v25 = vld [vmem:[%s5442_s22 + $0x20] ss:$52 sps:$4 sm:$0xff]  }
 0x140   : > { %v1391_v31 = vpop.permute.xlu1 %1390 }
 0x141   : > { %v5954_v32 = vpop.permute.xlu0 %1392 }
 0x142   : > { %1324 = vrot.lane.b32.xlu1 %v1196_v20, %s5358_s15  ;;  %v1515_v51 = vsel %vm1436_vm14, %v1391_v31, %v5954_v32 }
 0x143   : > { %992 = vrot.lane.b32.xlu0 %v5612_v23, %s8970_s23  ;;  %1727 = vmatprep.subr.bf16.mxu0 %v1515_v51 }
 0x144   : > { %v1389_v41 = vpop.permute.xlu1 %1388 }
 0x145   : > { %v756_v33 = vpop.permute.xlu0 %755  ;;  %v1514_v36 = vsel %vm1436_vm14, %v1389_v41, %v1391_v31 }
 0x146   : > { %994 = vrot.lane.b32.xlu1 %v5745_v35, %s8970_s23  ;;  %1728 = vmatpush1.bf16.msra.mxu0 %v1514_v36  ;;  %v775_v62 = vsel %vm771_vm7, %v5676_v58, %v756_v33 }
 0x147   : > { %1346 = vrot.lane.b32.xlu0 %v681_v6, %s5358_s15  ;;  %1770 = vmatprep.subr.bf16.mxu1 %v775_v62 }
 0x148   : > { %1771 = vmatpush1.bf16.msra.mxu1 %v5704_v9  ;;  %v5970_v22 = vpop.permute.xlu1 %710 }
 0x149   : > { %v1415_v38 = vpop.permute.xlu0 %1414  ;;  %v5998_v53 = vsel %vm724_vm6, %v709_v14, %v5970_v22 }
 0x14a   : > { %1348 = vrot.lane.b32.xlu1 %v5974_v39, %s5358_s15 }
 0x14b   : > { %1039 = vrot.lane.b32.xlu0 %v5612_v23, %s8971_s13 }
 0x14c   : > { %v5980_v30 = vpop.permute.xlu1 %1416 }
 0x14d   : > { %v1413_v58 = vpop.permute.xlu0 %1412  ;;  %v1526_v42 = vsel %vm1436_vm14, %v1415_v38, %v5980_v30 }
 0x14e   : > { %v1525_v9 = vsel %vm1436_vm14, %v1413_v58, %v1415_v38  ;;  %1041 = vrot.lane.b32.xlu1 %v5745_v35, %s8971_s13  ;;  %1729 = vmatprep.subr.bf16.mxu0 %v1526_v42 }
 0x14f   : > { %1370 = vrot.lane.b32.xlu0 %v728_v21, %s5358_s15  ;;  %1730 = vmatpush1.bf16.msra.mxu0 %v1525_v9 }
 0x150   : > { %v803_v3 = vpop.permute.xlu1 %802  ;;  %1842 = vmatprep.subr.bf16.mxu0 %v5612_v23 }
 0x151   : > { %v5994_v49 = vpop.permute.xlu0 %757  ;;  %v822_v54 = vsel %vm818_vm8, %v5692_v1, %v803_v3 }
 0x152   : > { %1372 = vrot.lane.b32.xlu1 %v5998_v53, %s5358_s15  ;;  %1772 = vmatprep.subr.bf16.mxu1 %v822_v54 }
 0x153   : > { %1086 = vrot.lane.b32.xlu0 %v5612_v23, %s8965_s20  ;;  %1773 = vmatpush1.bf16.msra.mxu1 %v5725_v24 }
 0x154   : > { %v848_v59 = vpop.permute.xlu1 %847  ;;  %1746 = vmatmul.mubr.bf16.vlgmr.msra.gmra.mrb[0].mxu0 %v5992_v44 }
 0x155   : > { %v6008_v60 = vpop.permute.xlu0 %849  ;;  %v868_v61 = vsel %vm865_vm9, %v5690_v0, %v848_v59  ;;  %1843 = vmatpush1.bf16.msra.mxu0 %v5584_v5  ;;  %1874 = vmatprep.mubr.bf16.mxu0 %v5571_v4  ;;  %v6023_v0 = vsel %vm771_vm7, %v756_v33, %v5994_v49 }
 0x156   : > { %1088 = vrot.lane.b32.xlu1 %v5745_v35, %s8965_s20  ;;  %v869_v1 = vsel %vm865_vm9, %v848_v59, %v6008_v60 }
 0x157   : > { %1394 = vrot.lane.b32.xlu0 %v775_v62, %s5358_s15  ;;  %1774 = vmatprep.subr.bf16.mxu1 %v869_v1 }
 0x158   : > { %1775 = vmatpush1.bf16.msra.mxu1 %v868_v61  ;;  %v478_v24 = vpop.permute.xlu1 %477 }
 0x159   : > { %v6019_v63 = vpop.permute.xlu0 %804  ;;  %v495_v4 = vsel %vm489_vm0, %v5842_v19, %v478_v24 }
 0x15a   : > { %1396 = vrot.lane.b32.xlu1 %v6023_v0, %s5358_s15  ;;  %1844 = vmatprep.subr.bf16.mxu0 %v495_v4 }
 0x15b   : > { %1133 = vrot.lane.b32.xlu0 %v5612_v23, %s8960_s21  ;;  %1845 = vmatpush1.bf16.msra.mxu0 %v5893_v47  ;;  %v6045_v47 = vsel %vm818_vm8, %v803_v3, %v6019_v63 }
 0x15c   : > { %v895_v5 = vpop.permute.xlu1 %894 }
 0x15d   : > { %v6032_v6 = vpop.permute.xlu0 %896  ;;  %v915_v8 = vsel %vm912_vm10, %v5708_v10, %v895_v5 }
 0x15e   : > { %1135 = vrot.lane.b32.xlu1 %v5745_v35, %s8960_s21  ;;  %v916_v19 = vsel %vm912_vm10, %v895_v5, %v6032_v6  ;;  %s8980_s21 = smov 93  }
 0x15f   : > { %1418 = vrot.lane.b32.xlu0 %v822_v54, %s5358_s15  ;;  %1776 = vmatprep.subr.bf16.mxu1 %v916_v19 }
 0x160   : > { %1777 = vmatpush1.bf16.msra.mxu1 %v915_v8  ;;  %v525_v45 = vpop.permute.xlu1 %524 }
 0x161   : > { %v6041_v12 = vpop.permute.xlu0 %479  ;;  %v542_v10 = vsel %vm8964_vm1, %v5871_v37, %v525_v45 }
 0x162   : > { %1420 = vrot.lane.b32.xlu1 %v6045_v47, %s5358_s15  ;;  %1846 = vmatprep.subr.bf16.mxu0 %v542_v10  ;;  %v6070_v31 = vsel %vm489_vm0, %v478_v24, %v6041_v12 }
 0x163   : > { %1230 = vrot.lane.b32.xlu0 %v5612_v23, %s5358_s15  ;;  %1847 = vmatpush1.bf16.msra.mxu0 %v5917_v2 }
 0x164   : > { %v942_v52 = vpop.permute.xlu1 %941 }
 0x165   : > { %v6054_v14 = vpop.permute.xlu0 %943  ;;  %v962_v21 = vsel %vm959_vm11, %v5716_v17, %v942_v52 }
 0x166   : > { %1232 = vrot.lane.b32.xlu1 %v5745_v35, %s5358_s15  ;;  %v963_v37 = vsel %vm959_vm11, %v942_v52, %v6054_v14 }
 0x167   : > { %1254 = vrot.lane.b32.xlu0 %v495_v4, %s5358_s15  ;;  %1778 = vmatprep.subr.bf16.mxu1 %v963_v37 }
 0x168   : > { %1779 = vmatpush1.bf16.msra.mxu1 %v962_v21  ;;  %v572_v23 = vpop.permute.xlu1 %571 }
 0x169   : > { %v6066_v2 = vpop.permute.xlu0 %526  ;;  %v589_v17 = vsel %vm8959_vm2, %v5901_v50, %v572_v23 }
 0x16a   : > { %1256 = vrot.lane.b32.xlu1 %v6070_v31, %s5358_s15  ;;  %1848 = vmatprep.subr.bf16.mxu0 %v589_v17  ;;  %v6085_v33 = vsel %vm8964_vm1, %v525_v45, %v6066_v2 }
 0x16b   : > { %481 = vrot.lane.b32.xlu0 %v6064_v25, %s8974_s30  ;;  %1849 = vmatpush1.bf16.msra.mxu0 %v5935_v15  ;;  %v6093_v15 = vld [vmem:[%s5442_s22 + $0x24] ss:$52 sps:$4 sm:$0xff]  }
 0x16c   : > { %v989_v20 = vpop.permute.xlu1 %988 }
 0x16d   : > { %v6079_v51 = vpop.permute.xlu0 %990  ;;  %v1009_v41 = vsel %vm1006_vm12, %v5731_v26, %v989_v20 }
 0x16e   : > { %1278 = vrot.lane.b32.xlu1 %v542_v10, %s5358_s15  ;;  %v1010_v50 = vsel %vm1006_vm12, %v989_v20, %v6079_v51 }
 0x16f   : > { %1280 = vrot.lane.b32.xlu0 %v6085_v33, %s5358_s15  ;;  %1780 = vmatprep.subr.bf16.mxu1 %v1010_v50 }
 0x170   : > { %1781 = vmatpush1.bf16.msra.mxu1 %v1009_v41  ;;  %v617_v36 = vpop.permute.xlu1 %616 }
 0x171   : > { %v6095_v62 = vpop.permute.xlu0 %618  ;;  %v635_v26 = vsel %vm8958_vm3, %v5886_v43, %v617_v36 }
 0x172   : > { %528 = vrot.lane.b32.xlu1 %v6064_v25, %s8962_s24  ;;  %v636_v38 = vsel %vm8958_vm3, %v617_v36, %v6095_v62  ;;  %vm8975_vm3 = vcmask 490496  }
 0x173   : > { %483 = vrot.lane.b32.xlu0 %v6093_v15, %s8974_s30  ;;  %1850 = vmatprep.subr.bf16.mxu0 %v636_v38 }
 0x174   : > { %1851 = vmatpush1.bf16.msra.mxu0 %v635_v26  ;;  %v6105_v58 = vpop.permute.xlu1 %573 }
 0x175   : > { %v1036_v42 = vpop.permute.xlu0 %1035  ;;  %v6109_v9 = vsel %vm8959_vm2, %v572_v23, %v6105_v58  ;;  %vm8976_vm2 = vmmov %vm8975_vm3 }
 0x176   : > { %1302 = vrot.lane.b32.xlu1 %v589_v17, %s5358_s15  ;;  %v1056_v61 = vsel %vm1053_vm13, %v5740_v34, %v1036_v42 }
 0x177   : > { %1304 = vrot.lane.b32.xlu0 %v6109_v9, %s5358_s15 }
 0x178   : > { %v6114_v43 = vpop.permute.xlu1 %1037 }
 0x179   : > { %v666_v3 = vpop.permute.xlu0 %665  ;;  %v1057_v54 = vsel %vm1053_vm13, %v1036_v42, %v6114_v43 }
 0x17a   : > { %575 = vrot.lane.b32.xlu1 %v6064_v25, %s5344_s25  ;;  %1782 = vmatprep.subr.bf16.mxu1 %v1057_v54  ;;  %v683_v59 = vsel %vm677_vm4, %v5944_v18, %v666_v3 }
 0x17b   : > { %530 = vrot.lane.b32.xlu0 %v6093_v15, %s8962_s24  ;;  %1852 = vmatprep.subr.bf16.mxu0 %v683_v59 }
 0x17c   : > { %1783 = vmatpush1.bf16.msra.mxu1 %v1056_v61  ;;  %1853 = vmatpush1.bf16.msra.mxu0 %v5974_v39  ;;  %v1181_v1 = vpop.permute.xlu1 %1180 }
 0x17d   : > { %v6127_v24 = vpop.permute.xlu0 %1182  ;;  %v1197_v4 = vsel %vm1192_vm5, %v5926_v7, %v1181_v1 }
 0x17e   : > { %v1198_v5 = vsel %vm1192_vm5, %v1181_v1, %v6127_v24  ;;  %1326 = vrot.lane.b32.xlu1 %v1197_v4, %s5358_s15 }
 0x17f   : > { %1328 = vrot.lane.b32.xlu0 %v1198_v5, %s5358_s15 }
 0x180   : > { %v1083_v18 = vpop.permute.xlu1 %1082 }
 0x181   : > { %v6135_v8 = vpop.permute.xlu0 %1084  ;;  %v1103_v34 = vsel %vm8975_vm3, %v5756_v40, %v1083_v18 }
 0x182   : > { %620 = vrot.lane.b32.xlu1 %v5766_v46, %s5345_s26  ;;  %v1104_v39 = vsel %vm8976_vm2, %v1083_v18, %v6135_v8  ;;  %vm8977_vm2 = vcmask 261120  }
 0x183   : > { %622 = vrot.lane.b32.xlu0 %v6064_v25, %s5345_s26  ;;  %1784 = vmatprep.subr.bf16.mxu1 %v1104_v39  ;;  %vm8978_vm3 = vmmov %vm8977_vm2 }
 0x184   : > { %1785 = vmatpush1.bf16.msra.mxu1 %v1103_v34  ;;  %v713_v7 = vpop.permute.xlu1 %712 }
 0x185   : > { %v6145_v19 = vpop.permute.xlu0 %667  ;;  %v730_v45 = vsel %vm724_vm6, %v5970_v22, %v713_v7 }
 0x186   : > { %577 = vrot.lane.b32.xlu1 %v6093_v15, %s5344_s25  ;;  %1854 = vmatprep.subr.bf16.mxu0 %v730_v45  ;;  %v6157_v52 = vsel %vm677_vm4, %v666_v3, %v6145_v19 }
 0x187   : > { %1350 = vrot.lane.b32.xlu0 %v683_v59, %s5358_s15  ;;  %1855 = vmatpush1.bf16.msra.mxu0 %v5998_v53 }
 0x188   : > { %v1130_v40 = vpop.permute.xlu1 %1129 }
 0x189   : > { %v6153_v10 = vpop.permute.xlu0 %1131  ;;  %v1150_v21 = vsel %vm8977_vm2, %v5768_v48, %v1130_v40  ;;  %vm8981_vm2 = vcmask 490496  }
 0x18a   : > { %1352 = vrot.lane.b32.xlu1 %v6157_v52, %s5358_s15  ;;  %v1151_v22 = vsel %vm8978_vm3, %v1130_v40, %v6153_v10  ;;  %v6252_v40 = vld [vmem:[%s5442_s22 + $0x28] ss:$52 sps:$4 sm:$0xff]   ;;  %vm8982_vm3 = vmmov %vm8981_vm2 }
 0x18b   : > { %669 = vrot.lane.b32.xlu0 %v6064_v25, %s5346_s27  ;;  %1786 = vmatprep.subr.bf16.mxu1 %v1151_v22 }
 0x18c   : > { %1787 = vmatpush1.bf16.msra.mxu1 %v1150_v21  ;;  %v760_v53 = vpop.permute.xlu1 %759 }
 0x18d   : > { %v6167_v37 = vpop.permute.xlu0 %714  ;;  %v777_v23 = vsel %vm771_vm7, %v5994_v49, %v760_v53 }
 0x18e   : > { %1184 = vrot.lane.b32.xlu1 %v6064_v25, %s5347_s28  ;;  %1856 = vmatprep.subr.bf16.mxu0 %v777_v23  ;;  %v6185_v49 = vsel %vm724_vm6, %v713_v7, %v6167_v37 }
 0x18f   : > { %1186 = vrot.lane.b32.xlu0 %v6093_v15, %s5347_s28  ;;  %1857 = vmatpush1.bf16.msra.mxu0 %v6023_v0 }
 0x190   : > { %v1227_v48 = vpop.permute.xlu1 %1226  ;;  %1789 = vmatmul.mubr.bf16.vlgmr.msra.gmra.mrb[0].mxu1 %v5780_v55 }
 0x191   : > { %v6177_v17 = vpop.permute.xlu0 %1228  ;;  %v1439_v20 = vsel %vm1436_vm14, %v5786_v56, %v1227_v48  ;;  %4678 = vmatprep.mubr.msk.bf16.mxu1 %vm1666_vm15, %v5791_v57 }
 0x192   : > { %1374 = vrot.lane.b32.xlu1 %v730_v45, %s5358_s15  ;;  %v1440_v0 = vsel %vm1436_vm14, %v1227_v48, %v6177_v17 }
 0x193   : > { %1376 = vrot.lane.b32.xlu0 %v6185_v49, %s5358_s15  ;;  %1799 = vmatprep.subr.bf16.mxu1 %v1440_v0 }
 0x194   : > { %1800 = vmatpush1.bf16.msra.mxu1 %v1439_v20  ;;  %v807_v41 = vpop.permute.xlu1 %806 }
 0x195   : > { %v6192_v50 = vpop.permute.xlu0 %761  ;;  %v824_v56 = vsel %vm818_vm8, %v6019_v63, %v807_v41 }
 0x196   : > { %716 = vrot.lane.b32.xlu1 %v6064_v25, %s5348_s29  ;;  %1858 = vmatprep.subr.bf16.mxu0 %v824_v56  ;;  %v6207_v42 = vsel %vm771_vm7, %v760_v53, %v6192_v50 }
 0x197   : > { %671 = vrot.lane.b32.xlu0 %v6093_v15, %s5346_s27  ;;  %1859 = vmatpush1.bf16.msra.mxu0 %v6045_v47 }
 0x198   : > { %v1251_v36 = vpop.permute.xlu1 %1250 }
 0x199   : > { %v6201_v26 = vpop.permute.xlu0 %1252  ;;  %v1450_v38 = vsel %vm1436_vm14, %v5821_v11, %v1251_v36 }
 0x19a   : > { %1398 = vrot.lane.b32.xlu1 %v777_v23, %s5358_s15  ;;  %v1451_v63 = vsel %vm1436_vm14, %v1251_v36, %v6201_v26 }
 0x19b   : > { %1400 = vrot.lane.b32.xlu0 %v6207_v42, %s5358_s15  ;;  %1801 = vmatprep.subr.bf16.mxu1 %v1451_v63 }
 0x19c   : > { %1802 = vmatpush1.bf16.msra.mxu1 %v1450_v38  ;;  %v852_v47 = vpop.permute.xlu1 %851 }
 0x19d   : > { %v6214_v3 = vpop.permute.xlu0 %853  ;;  %v870_v11 = vsel %vm865_vm9, %v6008_v60, %v852_v47 }
 0x19e   : > { %763 = vrot.lane.b32.xlu1 %v6064_v25, %s8979_s12  ;;  %v871_v54 = vsel %vm865_vm9, %v852_v47, %v6214_v3 }
 0x19f   : > { %718 = vrot.lane.b32.xlu0 %v6093_v15, %s5348_s29  ;;  %1860 = vmatprep.subr.bf16.mxu0 %v871_v54 }
 0x1a0   : > { %1861 = vmatpush1.bf16.msra.mxu0 %v870_v11  ;;  %v6224_v59 = vpop.permute.xlu1 %808 }
 0x1a1   : > { %v1275_v61 = vpop.permute.xlu0 %1274  ;;  %v6228_v1 = vsel %vm818_vm8, %v807_v41, %v6224_v59 }
 0x1a2   : > { %1422 = vrot.lane.b32.xlu1 %v824_v56, %s5358_s15  ;;  %v1461_v18 = vsel %vm1436_vm14, %v5834_v16, %v1275_v61 }
 0x1a3   : > { %1424 = vrot.lane.b32.xlu0 %v6228_v1, %s5358_s15 }
 0x1a4   : > { %v6233_v60 = vpop.permute.xlu1 %1276 }
 0x1a5   : > { %v899_v4 = vpop.permute.xlu0 %898  ;;  %v1462_v5 = vsel %vm1436_vm14, %v1275_v61, %v6233_v60 }
 0x1a6   : > { %810 = vrot.lane.b32.xlu1 %v6064_v25, %s8980_s21  ;;  %1803 = vmatprep.subr.bf16.mxu1 %v1462_v5  ;;  %v917_v45 = vsel %vm912_vm10, %v6032_v6, %v899_v4 }
 0x1a7   : > { %765 = vrot.lane.b32.xlu0 %v6093_v15, %s8979_s12  ;;  %1804 = vmatpush1.bf16.msra.mxu1 %v1461_v18 }
 0x1a8   : > { %v6243_v34 = vpop.permute.xlu1 %900 }
 0x1a9   : > { %v1299_v39 = vpop.permute.xlu0 %1298  ;;  %v918_v7 = vsel %vm912_vm10, %v899_v4, %v6243_v34 }
 0x1aa   : > { %855 = vrot.lane.b32.xlu1 %v5766_v46, %s8972_s16  ;;  %1862 = vmatprep.subr.bf16.mxu0 %v918_v7  ;;  %v1472_v6 = vsel %vm1436_vm14, %v5851_v29, %v1299_v39  ;;  %v6277_v29 = vld [vmem:[%s5442_s22 + $0x2c] ss:$52 sps:$4 sm:$0xff]  }
 0x1ab   : > { %857 = vrot.lane.b32.xlu0 %v6064_v25, %s8972_s16  ;;  %1863 = vmatpush1.bf16.msra.mxu0 %v917_v45 }
 0x1ac   : > { %v6256_v16 = vpop.permute.xlu1 %1300 }
 0x1ad   : > { %v946_v21 = vpop.permute.xlu0 %945  ;;  %v1473_v22 = vsel %vm1436_vm14, %v1299_v39, %v6256_v16 }
 0x1ae   : > { %485 = vrot.lane.b32.xlu1 %v6252_v40, %s8974_s30  ;;  %1805 = vmatprep.subr.bf16.mxu1 %v1473_v22  ;;  %v964_v20 = vsel %vm959_vm11, %v6054_v14, %v946_v21 }
 0x1af   : > { %812 = vrot.lane.b32.xlu0 %v6093_v15, %s8980_s21  ;;  %1806 = vmatpush1.bf16.msra.mxu1 %v1472_v6 }
 0x1b0   : > { %v6266_v53 = vpop.permute.xlu1 %947 }
 0x1b1   : > { %v1323_v23 = vpop.permute.xlu0 %1322  ;;  %v965_v48 = vsel %vm959_vm11, %v946_v21, %v6266_v53 }
 0x1b2   : > { %902 = vrot.lane.b32.xlu1 %v5766_v46, %s8973_s19  ;;  %1864 = vmatprep.subr.bf16.mxu0 %v965_v48  ;;  %v1483_v36 = vsel %vm1436_vm14, %v5877_v28, %v1323_v23 }
 0x1b3   : > { %904 = vrot.lane.b32.xlu0 %v6064_v25, %s8973_s19  ;;  %1865 = vmatpush1.bf16.msra.mxu0 %v964_v20 }
 0x1b4   : > { %v6279_v0 = vpop.permute.xlu1 %1324 }
 0x1b5   : > { %v993_v41 = vpop.permute.xlu0 %992  ;;  %v1484_v56 = vsel %vm1436_vm14, %v1323_v23, %v6279_v0 }
 0x1b6   : > { %532 = vrot.lane.b32.xlu1 %v6252_v40, %s8962_s24  ;;  %1807 = vmatprep.subr.bf16.mxu1 %v1484_v56  ;;  %v1011_v47 = vsel %vm1006_vm12, %v6079_v51, %v993_v41 }
 0x1b7   : > { %487 = vrot.lane.b32.xlu0 %v6277_v29, %s8974_s30  ;;  %1808 = vmatpush1.bf16.msra.mxu1 %v1483_v36 }
 0x1b8   : > { %v6289_v14 = vpop.permute.xlu1 %994 }
 0x1b9   : > { %v1347_v38 = vpop.permute.xlu0 %1346  ;;  %v1012_v63 = vsel %vm1006_vm12, %v993_v41, %v6289_v14 }
 0x1ba   : > { %949 = vrot.lane.b32.xlu1 %v5766_v46, %s8969_s14  ;;  %1866 = vmatprep.subr.bf16.mxu0 %v1012_v63  ;;  %v1494_v61 = vsel %vm1436_vm14, %v5907_v27, %v1347_v38 }
 0x1bb   : > { %951 = vrot.lane.b32.xlu0 %v6064_v25, %s8969_s14  ;;  %1867 = vmatpush1.bf16.msra.mxu0 %v1011_v47 }
 0x1bc   : > { %v6299_v28 = vpop.permute.xlu1 %1348 }
 0x1bd   : > { %v1040_v11 = vpop.permute.xlu0 %1039  ;;  %v1495_v54 = vsel %vm1436_vm14, %v1347_v38, %v6299_v28 }
 0x1be   : > { %579 = vrot.lane.b32.xlu1 %v6252_v40, %s5344_s25  ;;  %1809 = vmatprep.subr.bf16.mxu1 %v1495_v54  ;;  %v1058_v18 = vsel %vm1053_vm13, %v6114_v43, %v1040_v11 }
 0x1bf   : > { %534 = vrot.lane.b32.xlu0 %v6277_v29, %s8962_s24  ;;  %1810 = vmatpush1.bf16.msra.mxu1 %v1494_v61  ;;  %s8985_s24 = smov 32  }
 0x1c0   : > { %v6309_v51 = vpop.permute.xlu1 %1041 }
 0x1c1   : > { %v1371_v4 = vpop.permute.xlu0 %1370  ;;  %v1059_v5 = vsel %vm1053_vm13, %v1040_v11, %v6309_v51 }
 0x1c2   : > { %996 = vrot.lane.b32.xlu1 %v5766_v46, %s8970_s23  ;;  %1868 = vmatprep.subr.bf16.mxu0 %v1059_v5  ;;  %v1505_v45 = vsel %vm1436_vm14, %v5931_v13, %v1371_v4 }
 0x1c3   : > { %998 = vrot.lane.b32.xlu0 %v6064_v25, %s8970_s23  ;;  %1869 = vmatpush1.bf16.msra.mxu0 %v1058_v18 }
 0x1c4   : > { %v6319_v27 = vpop.permute.xlu1 %1372 }
 0x1c5   : > { %v1087_v39 = vpop.permute.xlu0 %1086  ;;  %v1506_v7 = vsel %vm1436_vm14, %v1371_v4, %v6319_v27  ;;  %v6392_v4 = vld [vmem:[%s8929_s1 + $0x4] ss:$16 sps:$4 sm:$0xff]  }
 0x1c6   : > { %624 = vrot.lane.b32.xlu1 %v6093_v15, %s5345_s26  ;;  %1811 = vmatprep.subr.bf16.mxu1 %v1506_v7  ;;  %v1105_v6 = vsel %vm8982_vm3, %v6135_v8, %v1087_v39 }
 0x1c7   : > { %626 = vrot.lane.b32.xlu0 %v6252_v40, %s5345_s26  ;;  %1812 = vmatpush1.bf16.msra.mxu1 %v1505_v45 }
 0x1c8   : > { %v6329_v43 = vpop.permute.xlu1 %1088 }
 0x1c9   : > { %v1395_v21 = vpop.permute.xlu0 %1394  ;;  %v1106_v22 = vsel %vm8981_vm2, %v1087_v39, %v6329_v43  ;;  %vm8983_vm2 = vcmask 261120  }
 0x1ca   : > { %581 = vrot.lane.b32.xlu1 %v6277_v29, %s5344_s25  ;;  %1870 = vmatprep.subr.bf16.mxu0 %v1106_v22  ;;  %v1516_v20 = vsel %vm1436_vm14, %v5954_v32, %v1395_v21  ;;  %vm8984_vm3 = vmmov %vm8983_vm2  ;;  %s5362_s25 = smov 56  }
 0x1cb   : > { %1043 = vrot.lane.b32.xlu0 %v5766_v46, %s8971_s13  ;;  %1871 = vmatpush1.bf16.msra.mxu0 %v1105_v6 }
 0x1cc   : > { %v6339_v13 = vpop.permute.xlu1 %1396 }
 0x1cd   : > { %v1134_v23 = vpop.permute.xlu0 %1133  ;;  %v1517_v48 = vsel %vm1436_vm14, %v1395_v21, %v6339_v13 }
 0x1ce   : > { %1045 = vrot.lane.b32.xlu1 %v6064_v25, %s8971_s13  ;;  %1813 = vmatprep.subr.bf16.mxu1 %v1517_v48  ;;  %v1152_v36 = vsel %vm8984_vm3, %v6153_v10, %v1134_v23  ;;  %vm8987_vm3 = vcmask 1014784  }
 0x1cf   : > { %673 = vrot.lane.b32.xlu0 %v6252_v40, %s5346_s27  ;;  %1814 = vmatpush1.bf16.msra.mxu1 %v1516_v20 }
 0x1d0   : > { %v6349_v8 = vpop.permute.xlu1 %1135 }
 0x1d1   : > { %v1419_v41 = vpop.permute.xlu0 %1418  ;;  %v1153_v56 = vsel %vm8983_vm2, %v1134_v23, %v6349_v8  ;;  %vm8986_vm2 = vcmask 1022976  }
 0x1d2   : > { %1188 = vrot.lane.b32.xlu1 %v6252_v40, %s5347_s28  ;;  %1872 = vmatprep.subr.bf16.mxu0 %v1153_v56  ;;  %v1527_v47 = vsel %vm1436_vm14, %v5980_v30, %v1419_v41 }
 0x1d3   : > { %1190 = vrot.lane.b32.xlu0 %v6277_v29, %s5347_s28  ;;  %1873 = vmatpush1.bf16.msra.mxu0 %v1152_v36  ;;  %s5363_s28 = smov 58  }
 0x1d4   : > { %v6359_v32 = vpop.permute.xlu1 %1420 }
 0x1d5   : > { %v1231_v38 = vpop.permute.xlu0 %1230  ;;  %v1528_v63 = vsel %vm1436_vm14, %v1419_v41, %v6359_v32 }
 0x1d6   : > { %1090 = vrot.lane.b32.xlu1 %v5766_v46, %s8965_s20  ;;  %1815 = vmatprep.subr.bf16.mxu1 %v1528_v63  ;;  %v1441_v30 = vsel %vm1436_vm14, %v6177_v17, %v1231_v38 }
 0x1d7   : > { %1092 = vrot.lane.b32.xlu0 %v6064_v25, %s8965_s20  ;;  %1816 = vmatpush1.bf16.msra.mxu1 %v1527_v47 }
 0x1d8   : > { %v6369_v10 = vpop.permute.xlu1 %1232  ;;  %1928 = vmatprep.subr.bf16.mxu1 %v5766_v46  ;;  %1875 = vmatmul.mubr.bf16.vlgmr.msra.gmra.mrb[4].mxu0 %v5780_v55 }
 0x1d9   : > { %v1255_v11 = vpop.permute.xlu0 %1254  ;;  %v1442_v54 = vsel %vm1436_vm14, %v1231_v38, %v6369_v10  ;;  %4679 = vmatprep.mubr.msk.bf16.mxu0 %vm1666_vm15, %v5791_v57 }
 0x1da   : > { %720 = vrot.lane.b32.xlu1 %v6252_v40, %s5348_s29  ;;  %1885 = vmatprep.subr.bf16.mxu0 %v1442_v54  ;;  %v1452_v17 = vsel %vm1436_vm14, %v6201_v26, %v1255_v11 }
 0x1db   : > { %675 = vrot.lane.b32.xlu0 %v6277_v29, %s5346_s27  ;;  %1832 = vmatmul.mubr.bf16.vlgmr.msra.gmra.mrb[0].mxu1 %v5992_v44 }
 0x1dc   : > { %1886 = vmatpush1.bf16.msra.mxu0 %v1441_v30  ;;  %1929 = vmatpush1.bf16.msra.mxu1 %v5745_v35  ;;  %v6385_v55 = vpop.permute.xlu1 %1256 }
 0x1dd   : > { %v482_v61 = vpop.permute.xlu0 %481  ;;  %v1453_v57 = vsel %vm1436_vm14, %v1255_v11, %v6385_v55  ;;  %1960 = vmatprep.mubr.bf16.mxu1 %v6392_v4 }
 0x1de   : > { %1137 = vrot.lane.b32.xlu1 %v5766_v46, %s8985_s24  ;;  %1887 = vmatprep.subr.bf16.mxu0 %v1453_v57  ;;  %v497_v35 = vsel %vm489_vm0, %v6041_v12, %v482_v61 }
 0x1df   : > { %1139 = vrot.lane.b32.xlu0 %v6064_v25, %s8985_s24  ;;  %1930 = vmatprep.subr.bf16.mxu1 %v497_v35 }
 0x1e0   : > { %1888 = vmatpush1.bf16.msra.mxu0 %v1452_v17  ;;  %1931 = vmatpush1.bf16.msra.mxu1 %v6070_v31  ;;  %v1279_v5 = vpop.permute.xlu1 %1278 }
 0x1e1   : > { %v6404_v18 = vpop.permute.xlu0 %1280  ;;  %v1463_v39 = vsel %vm1436_vm14, %v6233_v60, %v1279_v5 }
 0x1e2   : > { %767 = vrot.lane.b32.xlu1 %v6252_v40, %s8979_s12  ;;  %v1464_v12 = vsel %vm1436_vm14, %v1279_v5, %v6404_v18 }
 0x1e3   : > { %722 = vrot.lane.b32.xlu0 %v6277_v29, %s5348_s29  ;;  %1889 = vmatprep.subr.bf16.mxu0 %v1464_v12 }
 0x1e4   : > { %1890 = vmatpush1.bf16.msra.mxu0 %v1463_v39  ;;  %v529_v26 = vpop.permute.xlu1 %528 }
 0x1e5   : > { %v6414_v7 = vpop.permute.xlu0 %483  ;;  %v544_v31 = vsel %vm8964_vm1, %v6066_v2, %v529_v26 }
 0x1e6   : > { %1234 = vrot.lane.b32.xlu1 %v5766_v46, %s5358_s15  ;;  %1932 = vmatprep.subr.bf16.mxu1 %v544_v31 }
 0x1e7   : > { %1236 = vrot.lane.b32.xlu0 %v6064_v25, %s5358_s15  ;;  %1933 = vmatpush1.bf16.msra.mxu1 %v6085_v33 }
 0x1e8   : > { %v1303_v60 = vpop.permute.xlu1 %1302 }
 0x1e9   : > { %v6423_v45 = vpop.permute.xlu0 %1304  ;;  %v1474_v21 = vsel %vm1436_vm14, %v6256_v16, %v1303_v60  ;;  %v6440_v16 = vsel %vm489_vm0, %v482_v61, %v6414_v7 }
 0x1ea   : > { %814 = vrot.lane.b32.xlu1 %v6252_v40, %s8980_s21  ;;  %v1475_v2 = vsel %vm1436_vm14, %v1303_v60, %v6423_v45 }
 0x1eb   : > { %769 = vrot.lane.b32.xlu0 %v6277_v29, %s8979_s12  ;;  %1891 = vmatprep.subr.bf16.mxu0 %v1475_v2 }
 0x1ec   : > { %1892 = vmatpush1.bf16.msra.mxu0 %v1474_v21  ;;  %v576_v46 = vpop.permute.xlu1 %575 }
 0x1ed   : > { %v6433_v22 = vpop.permute.xlu0 %530  ;;  %v591_v33 = vsel %vm8986_vm2, %v6105_v58, %v576_v46  ;;  %vm8988_vm2 = vmmov %vm8987_vm3 }
 0x1ee   : > { %1258 = vrot.lane.b32.xlu1 %v497_v35, %s5358_s15  ;;  %1934 = vmatprep.subr.bf16.mxu1 %v591_v33  ;;  %v6468_v38 = vsel %vm8964_vm1, %v529_v26, %v6433_v22 }
 0x1ef   : > { %1260 = vrot.lane.b32.xlu0 %v6440_v16, %s5358_s15  ;;  %1935 = vmatpush1.bf16.msra.mxu1 %v6109_v9 }
 0x1f0   : > { %v1327_v6 = vpop.permute.xlu1 %1326 }
 0x1f1   : > { %v6445_v23 = vpop.permute.xlu0 %1328  ;;  %v1485_v48 = vsel %vm1436_vm14, %v6279_v0, %v1327_v6 }
 0x1f2   : > { %859 = vrot.lane.b32.xlu1 %v6093_v15, %s8972_s16  ;;  %v1486_v58 = vsel %vm1436_vm14, %v1327_v6, %v6445_v23 }
 0x1f3   : > { %861 = vrot.lane.b32.xlu0 %v6252_v40, %s8972_s16  ;;  %1893 = vmatprep.subr.bf16.mxu0 %v1486_v58 }
 0x1f4   : > { %1894 = vmatpush1.bf16.msra.mxu0 %v1485_v48  ;;  %v621_v20 = vpop.permute.xlu1 %620 }
 0x1f5   : > { %v6455_v41 = vpop.permute.xlu0 %622  ;;  %v637_v9 = vsel %vm8987_vm3, %v6095_v62, %v621_v20  ;;  %vm8989_vm3 = vcmask 1022976  }
 0x1f6   : > { %816 = vrot.lane.b32.xlu1 %v6277_v29, %s8980_s21  ;;  %v638_v0 = vsel %vm8988_vm2, %v621_v20, %v6455_v41  ;;  %vm8990_vm2 = vmmov %vm8989_vm3 }
 0x1f7   : > { %1282 = vrot.lane.b32.xlu0 %v544_v31, %s5358_s15  ;;  %1936 = vmatprep.subr.bf16.mxu1 %v638_v0 }
 0x1f8   : > { %1937 = vmatpush1.bf16.msra.mxu1 %v637_v9  ;;  %v6464_v56 = vpop.permute.xlu1 %577 }
 0x1f9   : > { %v1351_v36 = vpop.permute.xlu0 %1350  ;;  %v6490_v57 = vsel %vm8989_vm3, %v576_v46, %v6464_v56  ;;  %vm8991_vm3 = vcmask 1014784  }
 0x1fa   : > { %1284 = vrot.lane.b32.xlu1 %v6468_v38, %s5358_s15  ;;  %v1496_v54 = vsel %vm1436_vm14, %v6299_v28, %v1351_v36 }
 0x1fb   : > { %906 = vrot.lane.b32.xlu0 %v6093_v15, %s8973_s19 }
 0x1fc   : > { %v6474_v62 = vpop.permute.xlu1 %1352 }
 0x1fd   : > { %v670_v63 = vpop.permute.xlu0 %669  ;;  %v1497_v47 = vsel %vm1436_vm14, %v1351_v36, %v6474_v62 }
 0x1fe   : > { %908 = vrot.lane.b32.xlu1 %v6252_v40, %s8973_s19  ;;  %1895 = vmatprep.subr.bf16.mxu0 %v1497_v47  ;;  %v685_v11 = vsel %vm677_vm4, %v6145_v19, %v670_v63 }
 0x1ff   : > { %1306 = vrot.lane.b32.xlu0 %v591_v33, %s5358_s15  ;;  %1938 = vmatprep.subr.bf16.mxu1 %v685_v11 }
 0x200   : > { %1896 = vmatpush1.bf16.msra.mxu0 %v1496_v54  ;;  %1939 = vmatpush1.bf16.msra.mxu1 %v6157_v52  ;;  %v1185_v30 = vpop.permute.xlu1 %1184 }
 0x201   : > { %v6486_v61 = vpop.permute.xlu0 %1186  ;;  %v1199_v52 = vsel %vm1192_vm5, %v6127_v24, %v1185_v30 }
 0x202   : > { %1308 = vrot.lane.b32.xlu1 %v6490_v57, %s5358_s15  ;;  %v1200_v12 = vsel %vm1192_vm5, %v1185_v30, %v6486_v61 }
 0x203   : > { %953 = vrot.lane.b32.xlu0 %v6093_v15, %s8969_s14 }
 0x204   : > { %v1375_v19 = vpop.permute.xlu1 %1374 }
 0x205   : > { %v6496_v35 = vpop.permute.xlu0 %1376  ;;  %v1507_v28 = vsel %vm1436_vm14, %v6319_v27, %v1375_v19 }
 0x206   : > { %955 = vrot.lane.b32.xlu1 %v6252_v40, %s8969_s14  ;;  %v1508_v17 = vsel %vm1436_vm14, %v1375_v19, %v6496_v35 }
 0x207   : > { %1330 = vrot.lane.b32.xlu0 %v1199_v52, %s5358_s15  ;;  %1897 = vmatprep.subr.bf16.mxu0 %v1508_v17 }
 0x208   : > { %1898 = vmatpush1.bf16.msra.mxu0 %v1507_v28  ;;  %v717_v5 = vpop.permute.xlu1 %716 }
 0x209   : > { %v6507_v39 = vpop.permute.xlu0 %671  ;;  %v732_v27 = vsel %vm724_vm6, %v6167_v37, %v717_v5 }
 0x20a   : > { %1332 = vrot.lane.b32.xlu1 %v1200_v12, %s5358_s15  ;;  %1940 = vmatprep.subr.bf16.mxu1 %v732_v27 }
 0x20b   : > { %1000 = vrot.lane.b32.xlu0 %v6093_v15, %s8970_s23  ;;  %1941 = vmatpush1.bf16.msra.mxu1 %v6185_v49  ;;  %v6530_v49 = vsel %vm677_vm4, %v670_v63, %v6507_v39 }
 0x20c   : > { %v1399_v24 = vpop.permute.xlu1 %1398 }
 0x20d   : > { %v6517_v26 = vpop.permute.xlu0 %1400  ;;  %v1518_v31 = vsel %vm1436_vm14, %v6339_v13, %v1399_v24 }
 0x20e   : > { %1002 = vrot.lane.b32.xlu1 %v6252_v40, %s8970_s23  ;;  %v1519_v37 = vsel %vm1436_vm14, %v1399_v24, %v6517_v26 }
 0x20f   : > { %1354 = vrot.lane.b32.xlu0 %v685_v11, %s5358_s15  ;;  %1899 = vmatprep.subr.bf16.mxu0 %v1519_v37 }
 0x210   : > { %1900 = vmatpush1.bf16.msra.mxu0 %v1518_v31  ;;  %v764_v60 = vpop.permute.xlu1 %763 }
 0x211   : > { %v6526_v21 = vpop.permute.xlu0 %718  ;;  %v779_v13 = vsel %vm771_vm7, %v6192_v50, %v764_v60 }
 0x212   : > { %1356 = vrot.lane.b32.xlu1 %v6530_v49, %s5358_s15  ;;  %1942 = vmatprep.subr.bf16.mxu1 %v779_v13 }
 0x213   : > { %1047 = vrot.lane.b32.xlu0 %v6093_v15, %s8971_s13  ;;  %1943 = vmatpush1.bf16.msra.mxu1 %v6207_v42  ;;  %v6552_v42 = vsel %vm724_vm6, %v717_v5, %v6526_v21 }
 0x214   : > { %v1423_v2 = vpop.permute.xlu1 %1422 }
 0x215   : > { %v6539_v46 = vpop.permute.xlu0 %1424  ;;  %v1529_v33 = vsel %vm1436_vm14, %v6359_v32, %v1423_v2 }
 0x216   : > { %1049 = vrot.lane.b32.xlu1 %v6252_v40, %s8971_s13  ;;  %v1530_v50 = vsel %vm1436_vm14, %v1423_v2, %v6539_v46 }
 0x217   : > { %1378 = vrot.lane.b32.xlu0 %v732_v27, %s5358_s15  ;;  %1901 = vmatprep.subr.bf16.mxu0 %v1530_v50 }
 0x218   : > { %1902 = vmatpush1.bf16.msra.mxu0 %v1529_v33  ;;  %v811_v6 = vpop.permute.xlu1 %810 }
 0x219   : > { %v6548_v48 = vpop.permute.xlu0 %765  ;;  %v826_v32 = vsel %vm818_vm8, %v6224_v59, %v811_v6  ;;  %2014 = vmatprep.subr.bf16.mxu0 %v6093_v15 }
 0x21a   : > { %1380 = vrot.lane.b32.xlu1 %v6552_v42, %s5358_s15  ;;  %1944 = vmatprep.subr.bf16.mxu1 %v826_v32 }
 0x21b   : > { %1094 = vrot.lane.b32.xlu0 %v6093_v15, %s8965_s20  ;;  %1945 = vmatpush1.bf16.msra.mxu1 %v6228_v1 }
 0x21c   : > { %v856_v58 = vpop.permute.xlu1 %855  ;;  %1918 = vmatmul.mubr.bf16.vlgmr.msra.gmra.mrb[4].mxu0 %v5992_v44 }
 0x21d   : > { %v6563_v20 = vpop.permute.xlu0 %857  ;;  %v872_v9 = vsel %vm865_vm9, %v6214_v3, %v856_v58  ;;  %2015 = vmatpush1.bf16.msra.mxu0 %v6064_v25  ;;  %2046 = vmatprep.mubr.bf16.mxu0 %v6392_v4  ;;  %v6578_v3 = vsel %vm771_vm7, %v764_v60, %v6548_v48 }
 0x21e   : > { %1096 = vrot.lane.b32.xlu1 %v6252_v40, %s8965_s20  ;;  %v873_v59 = vsel %vm865_vm9, %v856_v58, %v6563_v20 }
 0x21f   : > { %1402 = vrot.lane.b32.xlu0 %v779_v13, %s5358_s15  ;;  %1946 = vmatprep.subr.bf16.mxu1 %v873_v59 }
 0x220   : > { %1947 = vmatpush1.bf16.msra.mxu1 %v872_v9  ;;  %v486_v44 = vpop.permute.xlu1 %485 }
 0x221   : > { %v6574_v1 = vpop.permute.xlu0 %812  ;;  %v499_v25 = vsel %vm489_vm0, %v6414_v7, %v486_v44 }
 0x222   : > { %1404 = vrot.lane.b32.xlu1 %v6578_v3, %s5358_s15  ;;  %2016 = vmatprep.subr.bf16.mxu0 %v499_v25 }
 0x223   : > { %1141 = vrot.lane.b32.xlu0 %v6093_v15, %s8985_s24  ;;  %2017 = vmatpush1.bf16.msra.mxu0 %v6440_v16  ;;  %v6600_v16 = vsel %vm818_vm8, %v811_v6, %v6574_v1 }
 0x224   : > { %v903_v0 = vpop.permute.xlu1 %902 }
 0x225   : > { %v6587_v36 = vpop.permute.xlu0 %904  ;;  %v919_v63 = vsel %vm912_vm10, %v6243_v34, %v903_v0 }
 0x226   : > { %1143 = vrot.lane.b32.xlu1 %v6252_v40, %s8985_s24  ;;  %v920_v7 = vsel %vm912_vm10, %v903_v0, %v6587_v36 }
 0x227   : > { %1426 = vrot.lane.b32.xlu0 %v826_v32, %s5358_s15  ;;  %1948 = vmatprep.subr.bf16.mxu1 %v920_v7 }
 0x228   : > { %1949 = vmatpush1.bf16.msra.mxu1 %v919_v63  ;;  %v533_v47 = vpop.permute.xlu1 %532 }
 0x229   : > { %v6596_v11 = vpop.permute.xlu0 %487  ;;  %v546_v34 = vsel %vm8964_vm1, %v6433_v22, %v533_v47 }
 0x22a   : > { %1428 = vrot.lane.b32.xlu1 %v6600_v16, %s5358_s15  ;;  %2018 = vmatprep.subr.bf16.mxu0 %v546_v34 }
 0x22b   : > { %1238 = vrot.lane.b32.xlu0 %v6093_v15, %s5358_s15  ;;  %2019 = vmatpush1.bf16.msra.mxu0 %v6468_v38  ;;  %v6622_v38 = vsel %vm489_vm0, %v486_v44, %v6596_v11 }
 0x22c   : > { %v950_v54 = vpop.permute.xlu1 %949 }
 0x22d   : > { %v6609_v30 = vpop.permute.xlu0 %951  ;;  %v966_v19 = vsel %vm959_vm11, %v6266_v53, %v950_v54 }
 0x22e   : > { %1240 = vrot.lane.b32.xlu1 %v6252_v40, %s5358_s15  ;;  %v967_v22 = vsel %vm959_vm11, %v950_v54, %v6609_v30 }
 0x22f   : > { %1262 = vrot.lane.b32.xlu0 %v499_v25, %s5358_s15  ;;  %1950 = vmatprep.subr.bf16.mxu1 %v967_v22  ;;  %v6715_v22 = vld [vmem:[%s8929_s1] ss:$16 sps:$4 sm:$0xff]  }
 0x230   : > { %1951 = vmatpush1.bf16.msra.mxu1 %v966_v19  ;;  %v580_v28 = vpop.permute.xlu1 %579  ;;  %v5259_v19 = vld [vmem:[%s5442_s22 + $0x30] ss:$52 sps:$4 sm:$0xff]   ;;  %s5364_s22 = smov 66  }
 0x231   : > { %v6618_v15 = vpop.permute.xlu0 %534  ;;  %v593_v53 = vsel %vm8990_vm2, %v6464_v56, %v580_v28  ;;  %vm8992_vm2 = vmmov %vm8991_vm3 }
 0x232   : > { %1264 = vrot.lane.b32.xlu1 %v6622_v38, %s5358_s15  ;;  %2020 = vmatprep.subr.bf16.mxu0 %v593_v53  ;;  %v6634_v5 = vsel %vm8964_vm1, %v533_v47, %v6618_v15  ;;  %vm8993_vm1 = vcmask 1022976  }
 0x233   : > { %1286 = vrot.lane.b32.xlu0 %v546_v34, %s5358_s15  ;;  %2021 = vmatpush1.bf16.msra.mxu0 %v6490_v57 }
 0x234   : > { %v997_v52 = vpop.permute.xlu1 %996 }
 0x235   : > { %v6630_v17 = vpop.permute.xlu0 %998  ;;  %v1013_v12 = vsel %vm1006_vm12, %v6289_v14, %v997_v52 }
 0x236   : > { %1288 = vrot.lane.b32.xlu1 %v6634_v5, %s5358_s15  ;;  %v1014_v56 = vsel %vm1006_vm12, %v997_v52, %v6630_v17 }
 0x237   : > { %1310 = vrot.lane.b32.xlu0 %v593_v53, %s5358_s15  ;;  %1952 = vmatprep.subr.bf16.mxu1 %v1014_v56  ;;  %v6725_v53 = vld [vmem:[%s8929_s1 + $0xc] ss:$16 sps:$4 sm:$0xff]  }
 0x238   : > { %1953 = vmatpush1.bf16.msra.mxu1 %v1013_v12  ;;  %v625_v57 = vpop.permute.xlu1 %624 }
 0x239   : > { %v6643_v27 = vpop.permute.xlu0 %626  ;;  %v639_v24 = vsel %vm8991_vm3, %v6455_v41, %v625_v57 }
 0x23a   : > { %v640_v31 = vsel %vm8992_vm2, %v625_v57, %v6643_v27 }
 0x23b   : > { %2022 = vmatprep.subr.bf16.mxu0 %v640_v31 }
 0x23c   : > { %2023 = vmatpush1.bf16.msra.mxu0 %v639_v24  ;;  %v6649_v14 = vpop.permute.xlu1 %581 }
 0x23d   : > { %v1044_v37 = vpop.permute.xlu0 %1043  ;;  %v6653_v60 = vsel %vm8993_vm1, %v580_v28, %v6649_v14  ;;  %vm8994_vm1 = vcmask 490496  }
 0x23e   : > { %1312 = vrot.lane.b32.xlu1 %v6653_v60, %s5358_s15  ;;  %v1060_v50 = vsel %vm1053_vm13, %v6309_v51, %v1044_v37  ;;  %vm8995_vm3 = vmmov %vm8994_vm1 }
 0x240   : > { %v6657_v13 = vpop.permute.xlu1 %1045 }
 0x241   : > { %v674_v2 = vpop.permute.xlu0 %673  ;;  %v1061_v41 = vsel %vm1053_vm13, %v1044_v37, %v6657_v13 }
 0x242   : > { %1954 = vmatprep.subr.bf16.mxu1 %v1061_v41  ;;  %v687_v33 = vsel %vm677_vm4, %v6507_v39, %v674_v2 }
 0x243   : > { %2024 = vmatprep.subr.bf16.mxu0 %v687_v33  ;;  %1955 = vmatpush1.bf16.msra.mxu1 %v1060_v50 }
 0x244   : > { %2025 = vmatpush1.bf16.msra.mxu0 %v6530_v49  ;;  %v1189_v6 = vpop.permute.xlu1 %1188 }
 0x245   : > { %v6666_v32 = vpop.permute.xlu0 %1190  ;;  %v1201_v58 = vsel %vm1192_vm5, %v6486_v61, %v1189_v6 }
 0x246   : > { %v1202_v9 = vsel %vm1192_vm5, %v1189_v6, %v6666_v32  ;;  %1334 = vrot.lane.b32.xlu0 %v1201_v58, %s5358_s15  ;;  %vm8996_vm5 = vcmask 261120  }
 0x247   : > { %1336 = vrot.lane.b32.xlu1 %v1202_v9, %s5358_s15  ;;  %vm8997_vm2 = vmmov %vm8996_vm5 }
 0x248   : > { %v1091_v39 = vpop.permute.xlu1 %1090 }
 0x249   : > { %v6674_v59 = vpop.permute.xlu0 %1092  ;;  %v1107_v51 = vsel %vm8994_vm1, %v6329_v43, %v1091_v39 }
 0x24a   : > { %1358 = vrot.lane.b32.xlu0 %v687_v33, %s5358_s15  ;;  %v1108_v49 = vsel %vm8995_vm3, %v1091_v39, %v6674_v59  ;;  %v8967_v33 = vmov 0   ;;  %vm8999_vm3 = vmmov %vm8994_vm1 }
 0x24b   : > { %1956 = vmatprep.subr.bf16.mxu1 %v1108_v49  ;;  %5053 = vset.pattern.permute.xlu1 %v8967_v33 }
 0x24c   : > { %1957 = vmatpush1.bf16.msra.mxu1 %v1107_v51  ;;  %v721_v61 = vpop.permute.xlu1 %720  ;;  %5054 = vset.pattern.permute.xlu0 %v8967_v33 }
 0x24d   : > { %v6681_v44 = vpop.permute.xlu0 %675  ;;  %v734_v25 = vsel %vm724_vm6, %v6526_v21, %v721_v61 }
 0x24e   : > { %v6687_v0 = vsel %vm677_vm4, %v674_v2, %v6681_v44  ;;  %1382 = vrot.lane.b32.xlu0 %v734_v25, %s5358_s15  ;;  %2026 = vmatprep.subr.bf16.mxu0 %v734_v25 }
 0x24f   : > { %1360 = vrot.lane.b32.xlu1 %v6687_v0, %s5358_s15  ;;  %2027 = vmatpush1.bf16.msra.mxu0 %v6552_v42 }
 0x250   : > { %v1138_v43 = vpop.permute.xlu1 %1137 }
 0x251   : > { %v6693_v63 = vpop.permute.xlu0 %1139  ;;  %v1154_v7 = vsel %vm8996_vm5, %v6349_v8, %v1138_v43  ;;  %vm9000_vm5 = vmmov %vm8997_vm2 }
 0x252   : > { %v1155_v21 = vsel %vm8997_vm2, %v1138_v43, %v6693_v63 }
 0x253   : > { %1958 = vmatprep.subr.bf16.mxu1 %v1155_v21 }
 0x254   : > { %1959 = vmatpush1.bf16.msra.mxu1 %v1154_v7  ;;  %v768_v47 = vpop.permute.xlu1 %767 }
 0x255   : > { %v6699_v34 = vpop.permute.xlu0 %722  ;;  %v781_v54 = vsel %vm771_vm7, %v6548_v48, %v768_v47 }
 0x256   : > { %v6705_v42 = vsel %vm724_vm6, %v721_v61, %v6699_v34  ;;  %1406 = vrot.lane.b32.xlu0 %v781_v54, %s5358_s15  ;;  %2028 = vmatprep.subr.bf16.mxu0 %v781_v54 }
 0x257   : > { %1384 = vrot.lane.b32.xlu1 %v6705_v42, %s5358_s15  ;;  %2029 = vmatpush1.bf16.msra.mxu0 %v6578_v3 }
 0x258   : > { %v1235_v8 = vpop.permute.xlu1 %1234  ;;  %1961 = vmatmul.mubr.bf16.vlgmr.msra.gmra.mrb[4].mxu1 %v6715_v22 }
 0x259   : > { %v6718_v48 = vpop.permute.xlu0 %1236  ;;  %v1443_v28 = vsel %vm1436_vm14, %v6369_v10, %v1235_v8  ;;  %4680 = vmatprep.mubr.msk.bf16.mxu1 %vm1666_vm15, %v6725_v53 }
 0x25a   : > { %1208 = vrot.lane.b32.xlu0 %v5259_v19, %s5346_s27  ;;  %v1444_v3 = vsel %vm1436_vm14, %v1235_v8, %v6718_v48 }
 0x25b   : > { %1971 = vmatprep.subr.bf16.mxu1 %v1444_v3 }
 0x25c   : > { %1972 = vmatpush1.bf16.msra.mxu1 %v1443_v28  ;;  %v815_v52 = vpop.permute.xlu1 %814 }
 0x25d   : > { %v6732_v12 = vpop.permute.xlu0 %769  ;;  %v828_v10 = vsel %vm818_vm8, %v6574_v1, %v815_v52 }
 0x25e   : > { %v6738_v56 = vsel %vm771_vm7, %v768_v47, %v6732_v12  ;;  %2030 = vmatprep.subr.bf16.mxu0 %v828_v10 }
 0x25f   : > { %1408 = vrot.lane.b32.xlu1 %v6738_v56, %s5358_s15  ;;  %2031 = vmatpush1.bf16.msra.mxu0 %v6600_v16 }
 0x260   : > { %v1259_v57 = vpop.permute.xlu1 %1258 }
 0x261   : > { %v6743_v24 = vpop.permute.xlu0 %1260  ;;  %v1454_v31 = vsel %vm1436_vm14, %v6385_v55, %v1259_v57 }
 0x262   : > { %v1455_v37 = vsel %vm1436_vm14, %v1259_v57, %v6743_v24 }
 0x263   : > { %1430 = vrot.lane.b32.xlu1 %v828_v10, %s5358_s15  ;;  %1973 = vmatprep.subr.bf16.mxu1 %v1455_v37 }
 0x264   : > { %1974 = vmatpush1.bf16.msra.mxu1 %v1454_v31  ;;  %v860_v1 = vpop.permute.xlu1 %859 }
 0x265   : > { %v6750_v2 = vpop.permute.xlu0 %861  ;;  %v874_v41 = vsel %vm865_vm9, %v6563_v20, %v860_v1 }
 0x266   : > { %v875_v16 = vsel %vm865_vm9, %v860_v1, %v6750_v2 }
 0x267   : > { %1211 = vrot.lane.b32.xlu1 %v5259_v19, %s5348_s29  ;;  %2032 = vmatprep.subr.bf16.mxu0 %v875_v16  ;;  %s8998_s29 = smov 60  }
 0x268   : > { %2033 = vmatpush1.bf16.msra.mxu0 %v874_v41  ;;  %v6759_v55 = vpop.permute.xlu1 %816 }
 0x269   : > { %v1283_v50 = vpop.permute.xlu0 %1282  ;;  %v6763_v6 = vsel %vm818_vm8, %v815_v52, %v6759_v55 }
 0x26a   : > { %1432 = vrot.lane.b32.xlu0 %v6763_v6, %s5358_s15  ;;  %v1465_v39 = vsel %vm1436_vm14, %v6404_v18, %v1283_v50 }
 0x26b   : > { %863 = vrot.lane.b32.xlu1 %v6277_v29, %s8972_s16 }
 0x26c   : > { %v6769_v20 = vpop.permute.xlu1 %1284 }
 0x26d   : > { %v907_v58 = vpop.permute.xlu0 %906  ;;  %v1466_v9 = vsel %vm1436_vm14, %v1283_v50, %v6769_v20  ;;  %v6849_v50 = vpop.f32.mrb[0].mxu0 }
 0x26e   : > { %1214 = vrot.lane.b32.xlu0 %v5259_v19, %s8979_s12  ;;  %1975 = vmatprep.subr.bf16.mxu1 %v1466_v9  ;;  %v921_v25 = vsel %vm912_vm10, %v6587_v36, %v907_v58  ;;  %s5361_s12 = smov 122  }
 0x26f   : > { %910 = vrot.lane.b32.xlu1 %v6277_v29, %s8973_s19  ;;  %1976 = vmatpush1.bf16.msra.mxu1 %v1465_v39 }
 0x270   : > { %v6778_v51 = vpop.permute.xlu1 %908 }
 0x271   : > { %v1307_v49 = vpop.permute.xlu0 %1306  ;;  %v922_v61 = vsel %vm912_vm10, %v907_v58, %v6778_v51 }
 0x272   : > { %1217 = vrot.lane.b32.xlu0 %v5259_v19, %s8980_s21  ;;  %2034 = vmatprep.subr.bf16.mxu0 %v922_v61  ;;  %v1476_v21 = vsel %vm1436_vm14, %v6423_v45, %v1307_v49 }
 0x273   : > { %1004 = vrot.lane.b32.xlu1 %v6277_v29, %s8970_s23  ;;  %2035 = vmatpush1.bf16.msra.mxu0 %v921_v25 }
 0x274   : > { %v6787_v18 = vpop.permute.xlu1 %1308 }
 0x275   : > { %v954_v43 = vpop.permute.xlu0 %953  ;;  %v1477_v7 = vsel %vm1436_vm14, %v1307_v49, %v6787_v18 }
 0x276   : > { %957 = vrot.lane.b32.xlu0 %v6277_v29, %s8969_s14  ;;  %1977 = vmatprep.subr.bf16.mxu1 %v1477_v7  ;;  %v968_v19 = vsel %vm959_vm11, %v6609_v30, %v954_v43 }
 0x277   : > { %1051 = vrot.lane.b32.xlu1 %v6277_v29, %s8971_s13  ;;  %1978 = vmatpush1.bf16.msra.mxu1 %v1476_v21  ;;  %s4749_s13 = sshll.u32 %s9049_s18, 7 }
 0x278   : > { %v6797_v36 = vpop.permute.xlu1 %955 }
 0x279   : > { %v1331_v47 = vpop.permute.xlu0 %1330  ;;  %v969_v54 = vsel %vm959_vm11, %v954_v43, %v6797_v36 }
 0x27a   : > { %628 = vrot.lane.b32.xlu0 %v6277_v29, %s5345_s26  ;;  %2036 = vmatprep.subr.bf16.mxu0 %v969_v54  ;;  %v1487_v3 = vsel %vm1436_vm14, %v6445_v23, %v1331_v47 }
 0x27b   : > { %1145 = vrot.lane.b32.xlu1 %v6277_v29, %s8985_s24  ;;  %2037 = vmatpush1.bf16.msra.mxu0 %v968_v19 }
 0x27c   : > { %v6807_v45 = vpop.permute.xlu1 %1332 }
 0x27d   : > { %v1001_v8 = vpop.permute.xlu0 %1000  ;;  %v1488_v28 = vsel %vm1436_vm14, %v1331_v47, %v6807_v45 }
 0x27e   : > { %1098 = vrot.lane.b32.xlu0 %v6277_v29, %s8998_s29  ;;  %1979 = vmatprep.subr.bf16.mxu1 %v1488_v28  ;;  %v1015_v57 = vsel %vm1006_vm12, %v6630_v17, %v1001_v8 }
 0x27f   : > { %1266 = vrot.lane.b32.xlu1 %v6596_v11, %s5358_s15  ;;  %1980 = vmatpush1.bf16.msra.mxu1 %v1487_v3 }
 0x280   : > { %v6817_v30 = vpop.permute.xlu1 %1002 }
 0x281   : > { %v1355_v52 = vpop.permute.xlu0 %1354  ;;  %v1016_v10 = vsel %vm1006_vm12, %v1001_v8, %v6817_v30 }
 0x282   : > { %1242 = vrot.lane.b32.xlu0 %v6277_v29, %s5358_s15  ;;  %2038 = vmatprep.subr.bf16.mxu0 %v1016_v10  ;;  %v1498_v29 = vsel %vm1436_vm14, %v6474_v62, %v1355_v52  ;;  %v6892_v10 = vld [vmem:[%s8929_s1 + $0x8] ss:$16 sps:$4 sm:$0xff]  }
 0x283   : > { %1314 = vrot.lane.b32.xlu1 %v6649_v14, %s5358_s15  ;;  %2039 = vmatpush1.bf16.msra.mxu0 %v1015_v57 }
 0x284   : > { %v6827_v23 = vpop.permute.xlu1 %1356 }
 0x285   : > { %v1048_v11 = vpop.permute.xlu0 %1047  ;;  %v1499_v31 = vsel %vm1436_vm14, %v1355_v52, %v6827_v23 }
 0x286   : > { %1290 = vrot.lane.b32.xlu0 %v6618_v15, %s5358_s15  ;;  %1981 = vmatprep.subr.bf16.mxu1 %v1499_v31  ;;  %v1062_v1 = vsel %vm1053_vm13, %v6657_v13, %v1048_v11 }
 0x287   : > { %1982 = vmatpush1.bf16.msra.mxu1 %v1498_v29 }
 0x288   : > { %v6835_v37 = vpop.permute.xlu1 %1049 }
 0x289   : > { %v1379_v17 = vpop.permute.xlu0 %1378  ;;  %v1063_v14 = vsel %vm1053_vm13, %v1048_v11, %v6835_v37 }
 0x28a   : > { %1338 = vrot.lane.b32.xlu0 %v6666_v32, %s5358_s15  ;;  %2040 = vmatprep.subr.bf16.mxu0 %v1063_v14  ;;  %v1509_v16 = vsel %vm1436_vm14, %v6496_v35, %v1379_v17  ;;  %v6853_v32 = vpop.f32.mrb[1].mxu0 }
 0x28b   : > { %2041 = vmatpush1.bf16.msra.mxu0 %v1062_v1  ;;  %v6857_v39 = vpop.f32.mrb[2].mxu0 }
 0x28c   : > { %v6843_v15 = vpop.permute.xlu1 %1380  ;;  %v6861_v61 = vpop.f32.mrb[3].mxu0 }
 0x28d   : > { %v1095_v41 = vpop.permute.xlu0 %1094  ;;  %v1510_v62 = vsel %vm1436_vm14, %v1379_v17, %v6843_v15 }
 0x28e   : > { %1983 = vmatprep.subr.bf16.mxu1 %v1510_v62  ;;  %v1109_v49 = vsel %vm8999_vm3, %v6674_v59, %v1095_v41 }
 0x28f   : > { %1984 = vmatpush1.bf16.msra.mxu1 %v1509_v16 }
 0x290   : > { %v6851_v58 = vpop.permute.xlu1 %1096 }
 0x291   : > { %v1403_v9 = vpop.permute.xlu0 %1402  ;;  %v1110_v13 = vsel %vm8994_vm1, %v1095_v41, %v6851_v58 }
 0x292   : > { %2042 = vmatprep.subr.bf16.mxu0 %v1110_v13  ;;  %v1520_v7 = vsel %vm1436_vm14, %v6517_v26, %v1403_v9 }
 0x293   : > { %2043 = vmatpush1.bf16.msra.mxu0 %v1109_v49 }
 0x294   : > { %v6863_v35 = vpop.permute.xlu1 %1404 }
 0x295   : > { %v1142_v25 = vpop.permute.xlu0 %1141  ;;  %v1521_v43 = vsel %vm1436_vm14, %v1403_v9, %v6863_v35 }
 0x296   : > { %1985 = vmatprep.subr.bf16.mxu1 %v1521_v43  ;;  %v1156_v54 = vsel %vm8997_vm2, %v6693_v63, %v1142_v25 }
 0x297   : > { %1986 = vmatpush1.bf16.msra.mxu1 %v1520_v7 }
 0x298   : > { %v6869_v21 = vpop.permute.xlu1 %1143 }
 0x299   : > { %v1427_v47 = vpop.permute.xlu0 %1426  ;;  %v1157_v59 = vsel %vm9000_vm5, %v1142_v25, %v6869_v21 }
 0x29a   : > { %2044 = vmatprep.subr.bf16.mxu0 %v1157_v59  ;;  %v1531_v26 = vsel %vm1436_vm14, %v6539_v46, %v1427_v47 }
 0x29b   : > { %2045 = vmatpush1.bf16.msra.mxu0 %v1156_v54 }
 0x29c   : > { %v6875_v19 = vpop.permute.xlu1 %1428 }
 0x29d   : > { %v1239_v8 = vpop.permute.xlu0 %1238  ;;  %v1532_v28 = vsel %vm1436_vm14, %v1427_v47, %v6875_v19 }
 0x29e   : > { %1987 = vmatprep.subr.bf16.mxu1 %v1532_v28  ;;  %2047 = vmatmul.mubr.bf16.vlgmr.msra.gmra.mrb[8].mxu0 %v6715_v22  ;;  %v1445_v46 = vsel %vm1436_vm14, %v6718_v48, %v1239_v8 }
 0x29f   : > { %1988 = vmatpush1.bf16.msra.mxu1 %v1531_v26  ;;  %4681 = vmatprep.mubr.msk.bf16.mxu0 %vm1666_vm15, %v6725_v53 }
 0x2a0   : > { %4750 = vmatprep.subr.bf16.mxu1 %v6763_v6  ;;  %v6885_v63 = vpop.permute.xlu1 %1240 }
 0x2a1   : > { %v1263_v3 = vpop.permute.xlu0 %1262  ;;  %v1446_v52 = vsel %vm1436_vm14, %v1239_v8, %v6885_v63 }
 0x2a2   : > { %2004 = vmatmul.mubr.bf16.vlgmr.msra.gmra.mrb[4].mxu1 %v6892_v10  ;;  %2057 = vmatprep.subr.bf16.mxu0 %v1446_v52  ;;  %v1456_v11 = vsel %vm1436_vm14, %v6743_v24, %v1263_v3 }
 0x2a3   : > { %2058 = vmatpush1.bf16.msra.mxu0 %v1445_v46  ;;  %4751 = vmatpush3.bf16.msra.mxu1 %v6252_v40 }
 0x2a4   : > { %v6898_v6 = vpop.permute.xlu1 %1264  ;;  %2132 = vmatprep.mubr.bf16.mxu1 %v6392_v4 }
 0x2a5   : > { %v1457_v57 = vsel %vm1436_vm14, %v1263_v3, %v6898_v6  ;;  %v1287_v31 = vpop.permute.xlu0 %1286 }
 0x2a6   : > { %2059 = vmatprep.subr.bf16.mxu0 %v1457_v57  ;;  %v1467_v40 = vsel %vm1436_vm14, %v6769_v20, %v1287_v31 }
 0x2a7   : > { %2060 = vmatpush1.bf16.msra.mxu0 %v1456_v11 }
 0x2a8   : > { %v6905_v29 = vpop.permute.xlu1 %1288 }
 0x2a9   : > { %v1468_v48 = vsel %vm1436_vm14, %v1287_v31, %v6905_v29  ;;  %v1311_v17 = vpop.permute.xlu0 %1310 }
 0x2aa   : > { %2061 = vmatprep.subr.bf16.mxu0 %v1468_v48  ;;  %v1478_v16 = vsel %vm1436_vm14, %v6787_v18, %v1311_v17 }
 0x2ab   : > { %2062 = vmatpush1.bf16.msra.mxu0 %v1467_v40 }
 0x2ae   : > { %v6911_v4 = vpop.f32.mrb[0].mxu1 }
 0x2af   : > { %v6913_v14 = vpop.f32.mrb[1].mxu1 }
 0x2b0   : > { %v6915_v1 = vpop.permute.xlu1 %1312  ;;  %v6917_v24 = vpop.f32.mrb[2].mxu1 }
 0x2b1   : > { %v1479_v41 = vsel %vm1436_vm14, %v1311_v17, %v6915_v1  ;;  %v6921_v62 = vpop.f32.mrb[3].mxu1 }
 0x2b2   : > { %2063 = vmatprep.subr.bf16.mxu0 %v1479_v41 }
 0x2b3   : > { %2064 = vmatpush1.bf16.msra.mxu0 %v1478_v16  ;;  %v1636_v16 = vld [vmem:[%s8930_s2 + $0x8] sm:$0xff] }
 0x2b8   : > { %v1335_v20 = vpop.permute.xlu0 %1334 }
 0x2b9   : > { %v6925_v9 = vpop.permute.xlu1 %1336  ;;  %v1489_v13 = vsel %vm1436_vm14, %v6807_v45, %v1335_v20 }
 0x2ba   : > { %v1490_v49 = vsel %vm1436_vm14, %v1335_v20, %v6925_v9 }
 0x2bb   : > { %2065 = vmatprep.subr.bf16.mxu0 %v1490_v49 }
 0x2bc   : > { %2066 = vmatpush1.bf16.msra.mxu0 %v1489_v13  ;;  %v1359_v25 = vpop.permute.xlu0 %1358 }
 0x2bd   : > { %v1500_v18 = vsel %vm1436_vm14, %v6827_v23, %v1359_v25 }
 0x2c0   : > { %v1383_v47 = vpop.permute.xlu0 %1382 }
 0x2c1   : > { %v6931_v43 = vpop.permute.xlu1 %1360  ;;  %v1511_v8 = vsel %vm1436_vm14, %v6843_v15, %v1383_v47 }
 0x2c2   : > { %v1501_v7 = vsel %vm1436_vm14, %v1359_v25, %v6931_v43 }
 0x2c3   : > { %2067 = vmatprep.subr.bf16.mxu0 %v1501_v7 }
 0x2c4   : > { %2068 = vmatpush1.bf16.msra.mxu0 %v1500_v18 }
 0x2c8   : > { %v1407_v59 = vpop.permute.xlu0 %1406 }
 0x2c9   : > { %v6937_v54 = vpop.permute.xlu1 %1384  ;;  %v1522_v52 = vsel %vm1436_vm14, %v6863_v35, %v1407_v59 }
 0x2ca   : > { %v1512_v45 = vsel %vm1436_vm14, %v1383_v47, %v6937_v54 }
 0x2cb   : > { %2069 = vmatprep.subr.bf16.mxu0 %v1512_v45 }
 0x2cc   : > { %2070 = vmatpush1.bf16.msra.mxu0 %v1511_v8  ;;  %v1209_v28 = vpop.permute.xlu0 %1208 }
 0x2cd   : > { %v1210_v26 = vsel %vm677_vm4, %v6681_v44, %v1209_v28 }
 0x2ce   : > { %1362 = vrot.lane.b32.xlu1 %v1210_v26, %s5358_s15 }
 0x2d1   : > { %v6946_v23 = vpop.permute.xlu1 %1408 }
 0x2d2   : > { %v1523_v3 = vsel %vm1436_vm14, %v1407_v59, %v6946_v23 }
 0x2d3   : > { %2071 = vmatprep.subr.bf16.mxu0 %v1523_v3 }
 0x2d4   : > { %2072 = vmatpush1.bf16.msra.mxu0 %v1522_v52 }
 0x2d5   : > { %v1431_v46 = vpop.permute.xlu1 %1430 }
 0x2d6   : > { %v1533_v35 = vsel %vm1436_vm14, %v6875_v19, %v1431_v46 }
 0x2d9   : > { %v1212_v57 = vpop.permute.xlu1 %1211 }
 0x2da   : > { %v1213_v15 = vsel %vm724_vm6, %v6699_v34, %v1212_v57  ;;  %vm9001_vm6 = vcmask 1014784  }
 0x2db   : > { %1386 = vrot.lane.b32.xlu0 %v1213_v15, %s5358_s15 }
 0x2dc   : > { %v6955_v44 = vpop.permute.xlu0 %1432 }
 0x2dd   : > { %v864_v11 = vpop.permute.xlu1 %863  ;;  %v1534_v31 = vsel %vm1436_vm14, %v1431_v46, %v6955_v44 }
 0x2de   : > { %2073 = vmatprep.subr.bf16.mxu0 %v1534_v31  ;;  %v876_v48 = vsel %vm865_vm9, %v6750_v2, %v864_v11  ;;  %v1635_v2 = vld [vmem:[%s8930_s2] sm:$0xff] }
 0x2df   : > { %4752 = vmatprep.subr.bf16.mxu1 %v876_v48  ;;  %2074 = vmatpush1.bf16.msra.mxu0 %v1533_v35 }
 0x2e0   : > { %4753 = vmatpush3.bf16.msra.mxu1 %v6622_v38  ;;  %v1215_v34 = vpop.permute.xlu0 %1214 }
 0x2e1   : > { %v1216_v40 = vsel %vm771_vm7, %v6732_v12, %v1215_v34  ;;  %v911_v17 = vpop.permute.xlu1 %910  ;;  %vm9002_vm7 = vmmov %vm8994_vm1  ;;  %vm2591_vm1 = vcmask 982016  }
 0x2e2   : > { %1410 = vrot.lane.b32.xlu1 %v1216_v40, %s5358_s15  ;;  %2090 = vmatmul.mubr.bf16.vlgmr.msra.gmra.mrb[8].mxu0 %v6892_v10  ;;  %v923_v41 = vsel %vm912_vm10, %v6778_v51, %v911_v17 }
 0x2e3   : > { %4754 = vmatprep.subr.bf16.mxu1 %v923_v41 }
 0x2e4   : > { %4755 = vmatpush3.bf16.msra.mxu1 %v6634_v5  ;;  %v1218_v38 = vpop.permute.xlu0 %1217 }
 0x2e5   : > { %v1219_v19 = vsel %vm818_vm8, %v6759_v55, %v1218_v38  ;;  %v1005_v12 = vpop.permute.xlu1 %1004  ;;  %vm9003_vm8 = vmmov %vm8997_vm2 }
 0x2e6   : > { %1639 = vperm.xlu1 %5053, %v1635_v2   ;;  %1434 = vrot.lane.b32.xlu0 %v1219_v19, %s5358_s15  ;;  %v1017_v5 = vsel %vm1006_vm12, %v6817_v30, %v1005_v12  ;;  %s9004_s15 = smov 126   ;;  %vm9011_vm2 = vmmov %vm9002_vm7 }
 0x2e8   : > { %v958_v51 = vpop.permute.xlu0 %957 }
 0x2e9   : > { %v970_v20 = vsel %vm959_vm11, %v6797_v36, %v958_v51  ;;  %v1052_v55 = vpop.permute.xlu1 %1051  ;;  %vm9007_vm11 = vmmov %vm9001_vm6 }
 0x2ea   : > { %1644 = vperm.xlu0 %5054, %v1636_v16   ;;  %4756 = vmatprep.subr.bf16.mxu1 %v970_v20  ;;  %v1064_v25 = vsel %vm1053_vm13, %v6835_v37, %v1052_v55  ;;  %vm9008_vm13 = vmmov %vm9001_vm6 }
 0x2eb   : > { %4757 = vmatpush3.bf16.msra.mxu1 %v6653_v60 }
 0x2ec   : > { %v629_v13 = vpop.permute.xlu0 %628  ;;  %4758 = vmatprep.subr.bf16.mxu1 %v1017_v5 }
 0x2ed   : > { %v641_v49 = vsel %vm9001_vm6, %v6643_v27, %v629_v13  ;;  %v1146_v30 = vpop.permute.xlu1 %1145 }
 0x2ee   : > { %v1158_v27 = vsel %vm9003_vm8, %v6869_v21, %v1146_v30  ;;  %vm9013_vm8 = vmmov %vm9011_vm2 }
 0x2ef   : > { %4759 = vmatpush3.bf16.msra.mxu1 %v641_v49  ;;  %v1919_v7 = vpop.f32.mrb[4].mxu0 }
 0x2f0   : > { %v1099_v18 = vpop.permute.xlu0 %1098  ;;  %4760 = vmatprep.subr.bf16.mxu1 %v1064_v25  ;;  %v6989_v36 = vpop.f32.mrb[5].mxu0 }
 0x2f1   : > { %v1923_v47 = vpop.f32.mrb[6].mxu0  ;;  %v1111_v60 = vsel %vm9002_vm7, %v6851_v58, %v1099_v18  ;;  %v1267_v58 = vpop.permute.xlu1 %1266  ;;  %vm9012_vm7 = vmmov %vm9001_vm6 }
 0x2f2   : > { %v6997_v37 = vpop.f32.mrb[7].mxu0 }
 0x2f3   : > { %4761 = vmatpush3.bf16.msra.mxu1 %v6687_v0 }
 0x2f4   : > { %4762 = vmatprep.subr.bf16.mxu1 %v1111_v60  ;;  %v1243_v59 = vpop.permute.xlu0 %1242 }
 0x2f5   : > { %v1447_v0 = vsel %vm1436_vm14, %v6885_v63, %v1243_v59  ;;  %v1315_v63 = vpop.permute.xlu1 %1314 }
 0x2f7   : > { %4763 = vmatpush3.bf16.msra.mxu1 %v6705_v42  ;;  %v1458_v42 = vsel %vm1436_vm14, %v6898_v6, %v1267_v58 }
 0x2f8   : > { %4764 = vmatprep.subr.bf16.mxu1 %v1158_v27  ;;  %v1291_v21 = vpop.permute.xlu0 %1290 }
 0x2fb   : > { %4765 = vmatpush3.bf16.msra.mxu1 %v6738_v56  ;;  %v1469_v56 = vsel %vm1436_vm14, %v6905_v29, %v1291_v21 }
 0x2fc   : > { %2141 = vmatprep.subr.bf16.mxu1 %v8967_v33 }
 0x2fe   : > { %2133 = vmatmul.mubr.bf16.vlgmr.msra.gmra.mrb[8].mxu1 %v6715_v22  ;;  %v1480_v22 = vsel %vm1436_vm14, %v6915_v1, %v1315_v63 }
 0x2ff   : > { %2142 = vmatpush1.bf16.msra.mxu1 %v1447_v0  ;;  %4682 = vmatprep.mubr.msk.bf16.mxu1 %vm1666_vm15, %v6725_v53  ;;  %v1339_v53 = vpop.permute.xlu0 %1338 }
 0x300   : > { %2143 = vmatprep.subr.bf16.mxu1 %v8967_v33  ;;  %v1491_v6 = vsel %vm1436_vm14, %v6925_v9, %v1339_v53 }
 0x303   : > { %2144 = vmatpush1.bf16.msra.mxu1 %v1458_v42 }
 0x304   : > { %2145 = vmatprep.subr.bf16.mxu1 %v8967_v33 }
 0x307   : > { %2146 = vmatpush1.bf16.msra.mxu1 %v1469_v56 }
 0x308   : > { %2147 = vmatprep.subr.bf16.mxu1 %v8967_v33 }
 0x30b   : > { %2148 = vmatpush1.bf16.msra.mxu1 %v1480_v22 }
 0x30c   : > { %2149 = vmatprep.subr.bf16.mxu1 %v8967_v33 }
 0x30f   : > { %2150 = vmatpush1.bf16.msra.mxu1 %v1491_v6 }
 0x310   : > { %2151 = vmatprep.subr.bf16.mxu1 %v8967_v33 }
 0x340   : > { %v1363_v45 = vpop.permute.xlu1 %1362 }
 0x341   : > { %v1502_v29 = vsel %vm1436_vm14, %v6931_v43, %v1363_v45 }
 0x342   : > { %2152 = vmatpush1.bf16.msra.mxu1 %v1502_v29 }
 0x343   : > { %2153 = vmatprep.subr.bf16.mxu1 %v8967_v33 }
 0x34d   : > { %v1387_v8 = vpop.permute.xlu0 %1386 }
 0x34e   : > { %v1513_v1 = vsel %vm1436_vm14, %v6937_v54, %v1387_v8 }
 0x34f   : > { %2154 = vmatpush1.bf16.msra.mxu1 %v1513_v1 }
 0x350   : > { %2155 = vmatprep.subr.bf16.mxu1 %v8967_v33 }
 0x354   : > { %v1411_v28 = vpop.permute.xlu1 %1410 }
 0x355   : > { %v1524_v9 = vsel %vm1436_vm14, %v6946_v23, %v1411_v28 }
 0x356   : > { %2156 = vmatpush1.bf16.msra.mxu1 %v1524_v9 }
 0x357   : > { %2157 = vmatprep.subr.bf16.mxu1 %v8967_v33 }
 0x358   : > { %v1435_v26 = vpop.permute.xlu0 %1434 }
 0x359   : > { %v1535_v43 = vsel %vm1436_vm14, %v6955_v44, %v1435_v26  ;;  %vm2560_vm14 = vcmask 998400  }
 0x35a   : > { %2158 = vmatpush1.bf16.msra.mxu1 %v1535_v43 }
 0x35d   : > { %2174 = vmatmul.mubr.bf16.vlgmr.msra.gmra.mrb[12].mxu1 %v6892_v10 }
 0x365   : > { %v7031_v3 = vpop.permute.xlu1 %1639 }
 0x366   : > { %v7035_v54 = vadd.f32 %v6913_v14, %v7031_v3  ;;  %v7038_v52 = vadd.f32 %v1919_v7, %v7031_v3  ;;  %v7042_v23 = vadd.f32 %v6853_v32, %v7031_v3  ;;  %v7046_v46 = vadd.f32 %v6911_v4, %v7031_v3 }
 0x367   : > { %v7080_v34 = vadd.f32 %v6849_v50, %v7031_v3  ;;  %v7098_v2 = vadd.f32 %v6989_v36, %v7031_v3 }
 0x368   : > { %v2183_v57 = vmax.f32 %v7042_v23, 0.0  ;;  %v2184_v15 = vmax.f32 %v7046_v46, 0.0  ;;  %v2185_v14 = vmax.f32 %v7035_v54, 0.0  ;;  %v2186_v44 = vmax.f32 %v7038_v52, 0.0 }
 0x369   : > { %v7049_v10 = vpop.permute.xlu0 %1644  ;;  %v2182_v50 = vmax.f32 %v7080_v34, 0.0  ;;  %v2187_v51 = vmax.f32 %v7098_v2, 0.0 }
 0x36a   : > { %v7056_v11 = vadd.f32 %v6921_v62, %v7049_v10  ;;  %v7060_v32 = vadd.f32 %v6861_v61, %v7049_v10  ;;  %v7063_v4 = vadd.f32 %v1923_v47, %v7049_v10  ;;  %v5055_v31 = vpack.i.bf16 %v2184_v15, %v2183_v57 }
 0x36b   : > { %v7069_v48 = vadd.f32 %v6917_v24, %v7049_v10  ;;  %v7073_v35 = vadd.f32 %v6857_v39, %v7049_v10  ;;  %v5060_v24 = vpack.i.bf16 %v2186_v44, %v2185_v14  ;;  %v7106_v12 = vadd.f32 %v6997_v37, %v7049_v10 }
 0x36c   : > { %v2194_v62 = vmax.f32 %v7060_v32, 0.0  ;;  %5056 = vrot.lane.b32.xlu1 %v5055_v31, %s8974_s30  ;;  %v2196_v40 = vmax.f32 %v7056_v11, 0.0  ;;  %v2197_v39 = vmax.f32 %v7063_v4, 0.0 }
 0x36d   : > { %v2195_v61 = vmax.f32 %v7069_v48, 0.0  ;;  %v2193_v41 = vmax.f32 %v7073_v35, 0.0  ;;  %v2198_v49 = vmax.f32 %v7106_v12, 0.0 }
 0x36e   : > { %v5070_v38 = vpack.i.bf16 %v2197_v39, %v2196_v40 }
 0x36f   : > { %v5065_v17 = vpack.i.bf16 %v2195_v61, %v2194_v62  ;;  %v5075_v19 = vpack.i.bf16 %v2193_v41, %v2182_v50 }
 0x370   : > { %5061 = vrot.lane.b32.xlu1 %v5060_v24, %s8974_s30 }
 0x371   : > { %5066 = vrot.lane.b32.xlu0 %v5065_v17, %s8974_s30 }
 0x374   : > { %5071 = vrot.lane.b32.xlu1 %v5070_v38, %s8974_s30 }
 0x375   : > { %5076 = vrot.lane.b32.xlu0 %v5075_v19, %s8974_s30  ;;  %v2005_v16 = vpop.f32.mrb[4].mxu1 }
 0x376   : > { %v7112_v20 = vadd.f32 %v2005_v16, %v7031_v3  ;;  %v2007_v5 = vpop.f32.mrb[5].mxu1 }
 0x377   : > { %v2009_v55 = vpop.f32.mrb[6].mxu1  ;;  %v7138_v9 = vadd.f32 %v2007_v5, %v7031_v3 }
 0x378   : > { %v2188_v13 = vmax.f32 %v7112_v20, 0.0  ;;  %v7117_v25 = vadd.f32 %v2009_v55, %v7049_v10  ;;  %v2011_v7 = vpop.f32.mrb[7].mxu1 }
 0x37a   : > { %v5080_v18 = vpack.i.bf16 %v2188_v13, %v2187_v51  ;;  %v2199_v36 = vmax.f32 %v7117_v25, 0.0 }
 0x37c   : > { %v5085_v47 = vpack.i.bf16 %v2199_v36, %v2198_v49  ;;  %5081 = vrot.lane.b32.xlu1 %v5080_v18, %s8974_s30 }
 0x37e   : > { %5086 = vrot.lane.b32.xlu0 %v5085_v47, %s8974_s30 }
 0x3b5   : > { %v2091_v60 = vpop.f32.mrb[8].mxu0 }
 0x3b6   : > { %v2093_v30 = vpop.f32.mrb[9].mxu0  ;;  %v7134_v1 = vadd.f32 %v2091_v60, %v7031_v3 }
 0x3b7   : > { %v2095_v27 = vpop.f32.mrb[10].mxu0 }
 0x3b8   : > { %v2097_v37 = vpop.f32.mrb[11].mxu0  ;;  %v2190_v24 = vmax.f32 %v7134_v1, 0.0  ;;  %v7149_v17 = vadd.f32 %v2095_v27, %v7049_v10 }
 0x3ba   : > { %v2201_v18 = vmax.f32 %v7149_v17, 0.0 }
 0x3d1   : > { %v4766_v59 = vpop.f32.mrb[8].mxu1 }
 0x3d2   : > { %v4767_v0 = vpop.f32.mrb[9].mxu1 }
 0x3d3   : > { %v4768_v58 = vadd.f32 %v4767_v0, %v4766_v59  ;;  %v4769_v42 = vpop.f32.mrb[10].mxu1  ;;  %v7184_v0 = vadd.f32 %v2093_v30, %v7031_v3 }
 0x3d4   : > { %v4770_v21 = vpop.f32.mrb[11].mxu1 }
 0x3d5   : > { %v4771_v56 = vadd.f32 %v4770_v21, %v4769_v42  ;;  %v7187_v42 = vadd.f32 %v2097_v37, %v7049_v10  ;;  %v2135_v21 = vadd.f32 %v4768_v58, %v7031_v3  ;;  %v2191_v58 = vmax.f32 %v7184_v0, 0.0 }
 0x3de   : > { %v5057_v63 = vpop.permute.xlu1 %5056 }
 0x3df   : > { %v5059_v22 = vunpack.i.h.bf16 %v5057_v63  ;;  %v5058_v53 = vunpack.i.l.bf16 %v5057_v63 }
 0x3e1   : > { %v2272_v29 = vsel %vm489_vm0, %v5058_v53, %v5059_v22 }
 0x3e2   : > { %v5062_v45 = vpop.permute.xlu1 %5061  ;;  %v7142_v26 = vmax.f32 %v2183_v57, %v2272_v29  ;;  %v2189_v57 = vmax.f32 %v7138_v9, 0.0 }
 0x3e3   : > { %v7130_v6 = vpop.permute.xlu0 %5066  ;;  %v5063_v8 = vunpack.i.l.bf16 %v5062_v45 }
 0x3e4   : > { %v5068_v31 = vunpack.i.l.bf16 %v7130_v6  ;;  %v5100_v55 = vpack.i.bf16 %v2190_v24, %v2189_v57  ;;  %v5069_v63 = vunpack.i.h.bf16 %v7130_v6  ;;  %v2202_v6 = vmax.f32 %v7187_v42, 0.0 }
 0x3e5   : > { %v2273_v28 = vsel %vm489_vm0, %v5059_v22, %v5063_v8  ;;  %v5064_v22 = vunpack.i.h.bf16 %v5062_v45 }
 0x3e6   : > { %v7144_v43 = vmax.f32 %v2184_v15, %v2273_v28  ;;  %v7157_v15 = vadd.f32 %v2011_v7, %v7049_v10 }
 0x3e7   : > { %v5077_v46 = vpop.permute.xlu0 %5076 }
 0x3e8   : > { %v5079_v35 = vunpack.i.h.bf16 %v5077_v46  ;;  %v5078_v34 = vunpack.i.l.bf16 %v5077_v46  ;;  %v5090_v38 = vpack.i.bf16 %v7144_v43, %v7142_v26  ;;  %v2200_v60 = vmax.f32 %v7157_v15, 0.0 }
 0x3ea   : > { %v2281_v19 = vsel %vm489_vm0, %v5079_v35, %v5068_v31  ;;  %v2271_v23 = vsel %vm489_vm0, %v5078_v34, %v5058_v53  ;;  %5091 = vrot.lane.b32.xlu1 %v5090_v38, %s5346_s27  ;;  %v2138_v35 = vadd.f32 %v4771_v56, %v7049_v10  ;;  %v2282_v10 = vsel %vm489_vm0, %v5068_v31, %v5069_v63 }
 0x3eb   : > { %v7159_v16 = vmax.f32 %v2193_v41, %v2281_v19  ;;  %v7161_v5 = vmax.f32 %v2182_v50, %v2271_v23  ;;  %v5110_v41 = vpack.i.bf16 %v2201_v18, %v2200_v60  ;;  %v5072_v50 = vpop.permute.xlu1 %5071  ;;  %v2274_v56 = vsel %vm489_vm0, %v5063_v8, %v5064_v22 }
 0x3ec   : > { %v5074_v34 = vunpack.i.h.bf16 %v5072_v50  ;;  %v5073_v38 = vunpack.i.l.bf16 %v5072_v50  ;;  %v2322_v52 = vmax.f32 %v2194_v62, %v2282_v10 }
 0x3ed   : > { %v5095_v47 = vpack.i.bf16 %v7159_v16, %v7161_v5 }
 0x3ee   : > { %5101 = vrot.lane.b32.xlu1 %v5100_v55, %s8974_s30  ;;  %v2283_v8 = vsel %vm489_vm0, %v5069_v63, %v5073_v38 }
 0x3ef   : > { %5096 = vrot.lane.b32.xlu0 %v5095_v47, %s5346_s27  ;;  %v7179_v7 = vpop.permute.xlu1 %5081  ;;  %v7241_v32 = vmax.f32 %v2195_v61, %v2283_v8 }
 0x3f0   : > { %v5084_v27 = vunpack.i.h.bf16 %v7179_v7  ;;  %v5083_v59 = vunpack.i.l.bf16 %v7179_v7  ;;  %v7191_v29 = vpop.permute.xlu0 %5086 }
 0x3f1   : > { %v5089_v55 = vunpack.i.h.bf16 %v7191_v29  ;;  %v5088_v47 = vunpack.i.l.bf16 %v7191_v29 }
 0x3f2   : > { %v2275_v30 = vsel %vm489_vm0, %v5064_v22, %v5083_v59  ;;  %v2276_v37 = vsel %vm489_vm0, %v5083_v59, %v5084_v27 }
 0x3f3   : > { %5111 = vrot.lane.b32.xlu0 %v5110_v41, %s8974_s30  ;;  %v7211_v41 = vmax.f32 %v2186_v44, %v2275_v30  ;;  %v7215_v50 = vmax.f32 %v2187_v51, %v2276_v37  ;;  %v7228_v44 = vmax.f32 %v2185_v14, %v2274_v56  ;;  %v2285_v51 = vsel %vm489_vm0, %v5074_v34, %v5088_v47 }
 0x3f4   : > { %v2286_v63 = vsel %vm489_vm0, %v5088_v47, %v5089_v55  ;;  %v2325_v62 = vmax.f32 %v2197_v39, %v2285_v51 }
 0x3f5   : > { %v5125_v14 = vpack.i.bf16 %v7215_v50, %v7211_v41  ;;  %v7252_v22 = vmax.f32 %v2198_v49, %v2286_v63  ;;  %v5120_v48 = vpack.i.bf16 %v2322_v52, %v7228_v44 }
 0x3f7   : > { %v5135_v61 = vpack.i.bf16 %v7252_v22, %v2325_v62 }
 0x430   : > { %v2175_v53 = vpop.f32.mrb[12].mxu1 }
 0x431   : > { %v7193_v28 = vadd.f32 %v2175_v53, %v2135_v21  ;;  %v2177_v46 = vpop.f32.mrb[13].mxu1  ;;  %v2284_v21 = vsel %vm489_vm0, %v5073_v38, %v5074_v34 }
 0x432   : > { %v2178_v3 = vpop.f32.mrb[14].mxu1  ;;  %v2324_v54 = vmax.f32 %v2196_v40, %v2284_v21 }
 0x433   : > { %v2192_v45 = vmax.f32 %v7193_v28, 0.0  ;;  %v7203_v19 = vadd.f32 %v2178_v3, %v2138_v35  ;;  %v2180_v23 = vpop.f32.mrb[15].mxu1 }
 0x434   : > { %v5130_v11 = vpack.i.bf16 %v2324_v54, %v7241_v32 }
 0x435   : > { %v5105_v59 = vpack.i.bf16 %v2192_v45, %v2191_v58  ;;  %v2203_v31 = vmax.f32 %v7203_v19, 0.0 }
 0x437   : > { %v5115_v2 = vpack.i.bf16 %v2203_v31, %v2202_v6  ;;  %5106 = vrot.lane.b32.xlu1 %v5105_v59, %s8974_s30 }
 0x439   : > { %5116 = vrot.lane.b32.xlu0 %v5115_v2, %s8974_s30  ;;  %s5360_s30 = smov 120  }
 0x43b   : > { %5126 = vrot.lane.b32.xlu1 %v5125_v14, %s5346_s27 }
 0x43d   : > { %5121 = vrot.lane.b32.xlu0 %v5120_v48, %s5346_s27 }
 0x43f   : > { %5131 = vrot.lane.b32.xlu1 %v5130_v11, %s5346_s27 }
 0x441   : > { %5136 = vrot.lane.b32.xlu0 %v5135_v61, %s5346_s27 }
 0x45c   : > { %v5092_v4 = vpop.permute.xlu1 %5091 }
 0x45d   : > { %v5094_v53 = vunpack.i.h.bf16 %v5092_v4  ;;  %v5093_v46 = vunpack.i.l.bf16 %v5092_v4 }
 0x45f   : > { %v2403_v38 = vsel %vm677_vm4, %v5093_v46, %v5094_v53 }
 0x460   : > { %v7261_v39 = vpop.permute.xlu1 %5101  ;;  %v2443_v51 = vmax.f32 %v7142_v26, %v2403_v38 }
 0x461   : > { %v5097_v40 = vpop.permute.xlu0 %5096  ;;  %v5104_v15 = vunpack.i.h.bf16 %v7261_v39 }
 0x462   : > { %v5099_v30 = vunpack.i.h.bf16 %v5097_v40  ;;  %v5098_v3 = vunpack.i.l.bf16 %v5097_v40 }
 0x464   : > { %v2402_v14 = vsel %vm677_vm4, %v5098_v3, %v5093_v46 }
 0x465   : > { %v7263_v12 = vpop.permute.xlu0 %5111  ;;  %v2442_v38 = vmax.f32 %v7161_v5, %v2402_v14 }
 0x4a9   : > { %v7265_v49 = vpop.permute.xlu1 %5106 }
 0x4aa   : > { %v5109_v14 = vunpack.i.h.bf16 %v7265_v49 }
 0x4ab   : > { %v7267_v35 = vpop.permute.xlu0 %5116 }
 0x4ad   : > { %v7269_v34 = vpop.permute.xlu1 %5126 }
 0x4ae   : > { %v5129_v23 = vunpack.i.h.bf16 %v7269_v34  ;;  %v5128_v10 = vunpack.i.l.bf16 %v7269_v34 }
 0x4af   : > { %v5122_v37 = vpop.permute.xlu0 %5121 }
 0x4b0   : > { %v5124_v56 = vunpack.i.h.bf16 %v5122_v37  ;;  %v5123_v47 = vunpack.i.l.bf16 %v5122_v37  ;;  %v2406_v48 = vsel %vm677_vm4, %v5128_v10, %v5129_v23 }
 0x4b1   : > { %v5132_v59 = vpop.permute.xlu1 %5131  ;;  %v2446_v46 = vmax.f32 %v7211_v41, %v2406_v48  ;;  %v2333_v48 = vmax.f32 %v2192_v45, %v5109_v14 }
 0x4b2   : > { %v2412_v8 = vsel %vm677_vm4, %v5099_v30, %v5124_v56  ;;  %v5134_v21 = vunpack.i.h.bf16 %v5132_v59  ;;  %v5133_v2 = vunpack.i.l.bf16 %v5132_v59  ;;  %v2405_v11 = vsel %vm677_vm4, %v5123_v47, %v5128_v10 }
 0x4b3   : > { %v7276_v63 = vpop.permute.xlu0 %5136  ;;  %v2452_v4 = vmax.f32 %v7159_v16, %v2412_v8  ;;  %v2404_v3 = vsel %vm677_vm4, %v5094_v53, %v5123_v47  ;;  %v2445_v10 = vmax.f32 %v7228_v44, %v2405_v11  ;;  %v5119_v47 = vunpack.i.h.bf16 %v7267_v35 }
 0x4b4   : > { %v2413_v61 = vsel %vm677_vm4, %v5124_v56, %v5133_v2  ;;  %v2414_v40 = vsel %vm677_vm4, %v5133_v2, %v5134_v21  ;;  %v5139_v37 = vunpack.i.h.bf16 %v7276_v63  ;;  %v5138_v26 = vunpack.i.l.bf16 %v7276_v63 }
 0x4b5   : > { %v2453_v30 = vmax.f32 %v2322_v52, %v2413_v61  ;;  %v2454_v56 = vmax.f32 %v7241_v32, %v2414_v40  ;;  %v2462_v8 = vpack.c.bf16 %v2452_v4, %v2442_v38  ;;  %v2444_v5 = vmax.f32 %v7144_v43, %v2404_v3 }
 0x4b6   : > { %v2415_v16 = vsel %vm677_vm4, %v5134_v21, %v5138_v26  ;;  %v2416_v52 = vsel %vm677_vm4, %v5138_v26, %v5139_v37  ;;  %v5114_v43 = vunpack.i.h.bf16 %v7263_v12  ;;  %v5118_v21 = vunpack.i.l.bf16 %v7267_v35 }
 0x4b7   : > { %v7291_v59 = vpack.c.bf16 %v2453_v30, %v2443_v51  ;;  %v2455_v2 = vmax.f32 %v2324_v54, %v2415_v16  ;;  %v2456_v61 = vmax.f32 %v2325_v62, %v2416_v52  ;;  %v7309_v32 = vpack.c.bf16 %v2454_v56, %v2444_v5 }
 0x4b8   : > { %v5113_v54 = vunpack.i.l.bf16 %v7263_v12  ;;  %v2290_v51 = vsel %vm489_vm0, %v5118_v21, %v5119_v47 }
 0x4b9   : > { %2516 = vrot.lane.b32.xlu0 %v7291_v59, %s5345_s26  ;;  %2486 = vrot.lane.b32.xlu1 %v7291_v59, %s9004_s15  ;;  %v7305_v41 = vpack.c.bf16 %v2455_v2, %v2445_v10  ;;  %v7307_v44 = vpack.c.bf16 %v2456_v61, %v2446_v46  ;;  %v7357_v25 = vmax.f32 %v2202_v6, %v2290_v51 }
 0x4ba   : > { %3097 = vmatprep.subr.bf16.mxu1 %v7291_v59  ;;  %v2287_v62 = vsel %vm489_vm0, %v5089_v55, %v5113_v54  ;;  %v2288_v53 = vsel %vm489_vm0, %v5113_v54, %v5114_v43  ;;  %v2289_v55 = vsel %vm489_vm0, %v5114_v43, %v5118_v21 }
 0x4bb   : > { %3098 = vmatpush1.bf16.msra.mxu1 %v2462_v8  ;;  %3183 = vmatprep.subr.bf16.mxu0 %v7305_v41  ;;  %v7341_v12 = vmax.f32 %v2199_v36, %v2287_v62  ;;  %v7345_v29 = vmax.f32 %v2200_v60, %v2288_v53  ;;  %v7353_v35 = vmax.f32 %v2201_v18, %v2289_v55  ;;  %v5103_v60 = vunpack.i.l.bf16 %v7261_v39 }
 0x4bc   : > { %3184 = vmatpush1.bf16.msra.mxu0 %v7309_v32  ;;  %v2334_v18 = vmax.f32 %v2203_v31, %v5119_v47  ;;  %v5108_v39 = vunpack.i.l.bf16 %v7265_v49 }
 0x4bd   : > { %2514 = vrot.lane.b32.xlu0 %v2462_v8, %s5345_s26  ;;  %2484 = vrot.lane.b32.xlu1 %v2462_v8, %s9004_s15  ;;  %v5155_v36 = vpack.i.bf16 %v7345_v29, %v7341_v12  ;;  %v5160_v17 = vpack.i.bf16 %v7357_v25, %v7353_v35  ;;  %v2277_v42 = vsel %vm489_vm0, %v5084_v27, %v5103_v60 }
 0x4be   : > { %v2278_v6 = vsel %vm489_vm0, %v5103_v60, %v5104_v15  ;;  %v7382_v11 = vmax.f32 %v2188_v13, %v2277_v42  ;;  %v5140_v27 = vpack.i.bf16 %v2334_v18, %v2333_v48  ;;  %v2279_v19 = vsel %vm489_vm0, %v5104_v15, %v5108_v39 }
 0x4bf   : > { %v7386_v7 = vmax.f32 %v2189_v57, %v2278_v6  ;;  %v2280_v31 = vsel %vm489_vm0, %v5108_v39, %v5109_v14  ;;  %v7395_v28 = vmax.f32 %v2190_v24, %v2279_v19  ;;  %vm9005_vm0 = vcmask 1031168   ;;  %v7540_v39 = vld [vmem:[%s8931_s3 + $0x4] ss:$16 sps:$4 sm:$0xff]  }
 0x4c0   : > { %v7399_v20 = vmax.f32 %v2191_v58, %v2280_v31  ;;  %vm9006_vm9 = vmmov %vm9005_vm0  ;;  %3129 = vmatprep.mubr.bf16.mxu1 %v7540_v39  ;;  %3215 = vmatprep.mubr.bf16.mxu0 %v7540_v39 }
 0x4c1   : > { %2577 = vrot.lane.b32.xlu0 %v7291_v59, %s5360_s30  ;;  %2546 = vrot.lane.b32.xlu1 %v7291_v59, %s5361_s12  ;;  %v5145_v13 = vpack.i.bf16 %v7386_v7, %v7382_v11  ;;  %vm9009_vm3 = vmmov %vm9005_vm0 }
 0x4c2   : > { %v5150_v9 = vpack.i.bf16 %v7399_v20, %v7395_v28  ;;  %vm9010_vm5 = vmmov %vm9005_vm0 }
 0x4c5   : > { %2575 = vrot.lane.b32.xlu0 %v2462_v8, %s5360_s30  ;;  %2544 = vrot.lane.b32.xlu1 %v2462_v8, %s5361_s12 }
 0x4c9   : > { %2668 = vrot.lane.b32.xlu0 %v7291_v59, %s8998_s29  ;;  %2608 = vrot.lane.b32.xlu1 %v7291_v59, %s8973_s19 }
 0x4cd   : > { %2666 = vrot.lane.b32.xlu0 %v2462_v8, %s8998_s29  ;;  %2606 = vrot.lane.b32.xlu1 %v2462_v8, %s8973_s19 }
 0x4d1   : > { %2729 = vrot.lane.b32.xlu0 %v7291_v59, %s5362_s25  ;;  %2638 = vrot.lane.b32.xlu1 %v7291_v59, %s8970_s23 }
 0x4d5   : > { %2727 = vrot.lane.b32.xlu0 %v2462_v8, %s5362_s25  ;;  %2636 = vrot.lane.b32.xlu1 %v2462_v8, %s8970_s23 }
 0x4d9   : > { %5156 = vrot.lane.b32.xlu0 %v5155_v36, %s5346_s27  ;;  %2698 = vrot.lane.b32.xlu1 %v7291_v59, %s5363_s28 }
 0x4dd   : > { %5161 = vrot.lane.b32.xlu0 %v5160_v17, %s5346_s27  ;;  %2696 = vrot.lane.b32.xlu1 %v2462_v8, %s5363_s28 }
 0x4e1   : > { %2488 = vrot.lane.b32.xlu0 %v7309_v32, %s9004_s15  ;;  %5141 = vrot.lane.b32.xlu1 %v5140_v27, %s5346_s27 }
 0x4e5   : > { %2548 = vrot.lane.b32.xlu0 %v7309_v32, %s5361_s12  ;;  %5146 = vrot.lane.b32.xlu1 %v5145_v13, %s5346_s27 }
 0x4e9   : > { %2610 = vrot.lane.b32.xlu0 %v7309_v32, %s8973_s19  ;;  %5151 = vrot.lane.b32.xlu1 %v5150_v9, %s5346_s27 }
 0x4ed   : > { %2779 = vrot.lane.b32.xlu0 %v7309_v32, %s5364_s22  ;;  %2518 = vrot.lane.b32.xlu1 %v7309_v32, %s5345_s26 }
 0x4f1   : > { %2640 = vrot.lane.b32.xlu0 %v7309_v32, %s8970_s23  ;;  %2579 = vrot.lane.b32.xlu1 %v7309_v32, %s5360_s30 }
 0x4f5   : > { %2700 = vrot.lane.b32.xlu0 %v7309_v32, %s5363_s28  ;;  %2670 = vrot.lane.b32.xlu1 %v7309_v32, %s8998_s29 }
 0x4f9   : > { %2490 = vrot.lane.b32.xlu0 %v7305_v41, %s9004_s15  ;;  %2731 = vrot.lane.b32.xlu1 %v7309_v32, %s5362_s25 }
 0x4fd   : > { %2522 = vrot.lane.b32.xlu0 %v7307_v44, %s5345_s26  ;;  %2492 = vrot.lane.b32.xlu1 %v7307_v44, %s9004_s15 }
 0x501   : > { %2550 = vrot.lane.b32.xlu0 %v7305_v41, %s5361_s12  ;;  %2520 = vrot.lane.b32.xlu1 %v7305_v41, %s5345_s26 }
 0x505   : > { %2783 = vrot.lane.b32.xlu0 %v7307_v44, %s5364_s22  ;;  %2552 = vrot.lane.b32.xlu1 %v7307_v44, %s5361_s12 }
 0x509   : > { %2614 = vrot.lane.b32.xlu0 %v7307_v44, %s8973_s19  ;;  %2781 = vrot.lane.b32.xlu1 %v7305_v41, %s5364_s22 }
 0x50d   : > { %2642 = vrot.lane.b32.xlu0 %v7305_v41, %s8970_s23  ;;  %2612 = vrot.lane.b32.xlu1 %v7305_v41, %s8973_s19 }
 0x511   : > { %2674 = vrot.lane.b32.xlu0 %v7307_v44, %s8998_s29  ;;  %2644 = vrot.lane.b32.xlu1 %v7307_v44, %s8970_s23 }
 0x515   : > { %2702 = vrot.lane.b32.xlu0 %v7305_v41, %s5363_s28  ;;  %2672 = vrot.lane.b32.xlu1 %v7305_v41, %s8998_s29 }
 0x519   : > { %2583 = vrot.lane.b32.xlu0 %v7307_v44, %s5360_s30  ;;  %2704 = vrot.lane.b32.xlu1 %v7307_v44, %s5363_s28 }
 0x52b   : > { %v2517_v1 = vpop.permute.xlu0 %2516  ;;  %v2487_v24 = vpop.permute.xlu1 %2486 }
 0x52f   : > { %v2515_v57 = vpop.permute.xlu0 %2514  ;;  %v2485_v0 = vpop.permute.xlu1 %2484 }
 0x530   : > { %v2500_v54 = vsel %vm9006_vm9, %v2485_v0, %v2487_v24  ;;  %vm2743_vm9 = vcmask 457728  }
 0x533   : > { %v7459_v58 = vpop.permute.xlu0 %2577  ;;  %v2547_v45 = vpop.permute.xlu1 %2546 }
 0x537   : > { %v7461_v49 = vpop.permute.xlu0 %2575  ;;  %v2545_v4 = vpop.permute.xlu1 %2544 }
 0x538   : > { %v2561_v31 = vsel %vm2560_vm14, %v2545_v4, %v2547_v45 }
 0x53b   : > { %v7463_v40 = vpop.permute.xlu0 %2668  ;;  %v7465_v30 = vpop.permute.xlu1 %2608 }
 0x53f   : > { %v7467_v26 = vpop.permute.xlu0 %2666  ;;  %v7469_v38 = vpop.permute.xlu1 %2606 }
 0x543   : > { %v7471_v46 = vpop.permute.xlu0 %2729  ;;  %v7473_v3 = vpop.permute.xlu1 %2638 }
 0x547   : > { %v7475_v10 = vpop.permute.xlu0 %2727  ;;  %v7477_v56 = vpop.permute.xlu1 %2636 }
 0x54b   : > { %v7479_v16 = vpop.permute.xlu0 %5156  ;;  %v7481_v52 = vpop.permute.xlu1 %2698 }
 0x54c   : > { %v5158_v62 = vunpack.i.l.bf16 %v7479_v16  ;;  %v5159_v63 = vunpack.i.h.bf16 %v7479_v16 }
 0x54e   : > { %v2417_v21 = vsel %vm677_vm4, %v5139_v37, %v5158_v62 }
 0x54f   : > { %v7483_v8 = vpop.permute.xlu0 %5161  ;;  %v7485_v2 = vpop.permute.xlu1 %2696  ;;  %v2457_v60 = vmax.f32 %v7252_v22, %v2417_v21 }
 0x553   : > { %v7487_v61 = vpop.permute.xlu0 %2488  ;;  %v7489_v5 = vpop.permute.xlu1 %5141 }
 0x554   : > { %v7493_v43 = vsel %vm9005_vm0, %v2487_v24, %v7487_v61  ;;  %v2592_v24 = vsel %vm2591_vm1, %v7461_v49, %v7459_v58  ;;  %vm2712_vm0 = vcmask 474112  }
 0x555   : > { %3099 = vmatprep.subr.bf16.mxu1 %v7493_v43 }
 0x556   : > { %3100 = vmatpush1.bf16.msra.mxu1 %v2500_v54 }
 0x557   : > { %v7498_v53 = vpop.permute.xlu0 %2548  ;;  %v7500_v47 = vpop.permute.xlu1 %5146 }
 0x558   : > { %v5148_v55 = vunpack.i.l.bf16 %v7500_v47  ;;  %v5149_v51 = vunpack.i.h.bf16 %v7500_v47 }
 0x55a   : > { %v2407_v36 = vsel %vm677_vm4, %v5129_v23, %v5148_v55  ;;  %v2408_v37 = vsel %vm677_vm4, %v5148_v55, %v5149_v51  ;;  %v2530_v23 = vsel %vm9008_vm13, %v2515_v57, %v2517_v1  ;;  %v2682_v55 = vsel %vm9013_vm8, %v7467_v26, %v7463_v40  ;;  %vm9015_vm13 = vmmov %vm9011_vm2 }
 0x55b   : > { %v7510_v15 = vpop.permute.xlu0 %2610  ;;  %v2447_v14 = vmax.f32 %v7215_v50, %v2407_v36  ;;  %v7514_v17 = vpop.permute.xlu1 %5151  ;;  %v2418_v50 = vsel %vm677_vm4, %v5158_v62, %v5159_v63  ;;  %v2448_v6 = vmax.f32 %v7382_v11, %v2408_v37  ;;  %v7553_v11 = vsel %vm2560_vm14, %v2547_v45, %v7498_v53  ;;  %vm9019_vm8 = vmmov %vm9011_vm2 }
 0x55c   : > { %v2458_v27 = vmax.f32 %v7341_v12, %v2418_v50  ;;  %v7587_v45 = vsel %vm912_vm10, %v7465_v30, %v7510_v15  ;;  %v5154_v36 = vunpack.i.h.bf16 %v7514_v17  ;;  %v5164_v26 = vunpack.i.h.bf16 %v7483_v8 }
 0x55d   : > { %v7517_v18 = vpack.c.bf16 %v2457_v60, %v2447_v14  ;;  %v5153_v60 = vunpack.i.l.bf16 %v7514_v17  ;;  %v5163_v17 = vunpack.i.l.bf16 %v7483_v8  ;;  %v2713_v50 = vsel %vm2712_vm0, %v7485_v2, %v7481_v52 }
 0x55e   : > { %v7558_v13 = vpack.c.bf16 %v2458_v27, %v2448_v6  ;;  %v2744_v2 = vsel %vm2743_vm9, %v7475_v10, %v7471_v46 }
 0x55f   : > { %v7522_v42 = vpop.permute.xlu0 %2779  ;;  %v2519_v34 = vpop.permute.xlu1 %2518  ;;  %2676 = vrot.lane.b32.xlu0 %v7517_v18, %s8998_s29  ;;  %2494 = vrot.lane.b32.xlu1 %v7517_v18, %s9004_s15  ;;  %v2410_v6 = vsel %vm677_vm4, %v5153_v60, %v5154_v36  ;;  %v2420_v8 = vsel %vm677_vm4, %v5163_v17, %v5164_v26 }
 0x560   : > { %v7532_v22 = vsel %vm9007_vm11, %v2517_v1, %v2519_v34  ;;  %v2460_v27 = vmax.f32 %v7353_v35, %v2420_v8  ;;  %v2419_v35 = vsel %vm677_vm4, %v5159_v63, %v5163_v17  ;;  %vm9014_vm11 = vmmov %vm9011_vm2 }
 0x561   : > { %3101 = vmatprep.subr.bf16.mxu1 %v7532_v22 }
 0x562   : > { %3102 = vmatpush1.bf16.msra.mxu1 %v2530_v23 }
 0x563   : > { %v7542_v48 = vpop.permute.xlu0 %2640  ;;  %v7545_v19 = vpop.permute.xlu1 %2579  ;;  %2733 = vrot.lane.b32.xlu0 %v7305_v41, %s5362_s25  ;;  %2524 = vrot.lane.b32.xlu1 %v7517_v18, %s5345_s26 }
 0x564   : > { %3103 = vmatprep.subr.bf16.mxu1 %v7553_v11  ;;  %v7572_v1 = vsel %vm2591_vm1, %v7459_v58, %v7545_v19  ;;  %v2622_v58 = vsel %vm912_vm10, %v7469_v38, %v7465_v30  ;;  %v7602_v4 = vsel %vm1006_vm12, %v7473_v3, %v7542_v48  ;;  %v2652_v38 = vsel %vm1006_vm12, %v7477_v56, %v7473_v3 }
 0x566   : > { %3104 = vmatpush1.bf16.msra.mxu1 %v2561_v31 }
 0x567   : > { %v7561_v12 = vpop.permute.xlu0 %2700  ;;  %v7563_v9 = vpop.permute.xlu1 %2670  ;;  %2496 = vrot.lane.b32.xlu0 %v7558_v13, %s9004_s15  ;;  %2581 = vrot.lane.b32.xlu1 %v7305_v41, %s5360_s30 }
 0x568   : > { %3105 = vmatprep.subr.bf16.mxu1 %v7572_v1  ;;  %v2683_v3 = vsel %vm9011_vm2, %v7463_v40, %v7563_v9  ;;  %v2714_v40 = vsel %vm2712_vm0, %v7481_v52, %v7561_v12 }
 0x56a   : > { %3106 = vmatpush1.bf16.msra.mxu1 %v2592_v24  ;;  %v2409_v24 = vsel %vm677_vm4, %v5149_v51, %v5153_v60 }
 0x56b   : > { %v2491_v57 = vpop.permute.xlu0 %2490  ;;  %v7578_v0 = vpop.permute.xlu1 %2731  ;;  %2526 = vrot.lane.b32.xlu0 %v7558_v13, %s5345_s26  ;;  %2554 = vrot.lane.b32.xlu1 %v7517_v18, %s5361_s12 }
 0x56c   : > { %3107 = vmatprep.subr.bf16.mxu1 %v7587_v45  ;;  %v7617_v62 = vsel %vm9010_vm5, %v7487_v61, %v2491_v57  ;;  %v2745_v52 = vsel %vm2743_vm9, %v7471_v46, %v7578_v0  ;;  %vm9016_vm5 = vmmov %vm9001_vm6 }
 0x56e   : > { %3108 = vmatpush1.bf16.msra.mxu1 %v2622_v58 }
 0x56f   : > { %v7593_v49 = vpop.permute.xlu1 %2492  ;;  %2556 = vrot.lane.b32.xlu0 %v7558_v13, %s5361_s12  ;;  %2785 = vrot.lane.b32.xlu1 %v7517_v18, %s5364_s22  ;;  %v7604_v54 = vpop.permute.xlu0 %2522 }
 0x570   : > { %3109 = vmatprep.subr.bf16.mxu1 %v7602_v4  ;;  %v7609_v30 = vsel %vm9009_vm3, %v2491_v57, %v7593_v49 }
 0x571   : > { %3185 = vmatprep.subr.bf16.mxu0 %v7609_v30 }
 0x572   : > { %3110 = vmatpush1.bf16.msra.mxu1 %v2652_v38  ;;  %3186 = vmatpush1.bf16.msra.mxu0 %v7617_v62 }
 0x573   : > { %v2521_v21 = vpop.permute.xlu1 %2520  ;;  %2787 = vrot.lane.b32.xlu0 %v7558_v13, %s5364_s22  ;;  %2616 = vrot.lane.b32.xlu1 %v7517_v18, %s8973_s19  ;;  %v2551_v14 = vpop.permute.xlu0 %2550 }
 0x574   : > { %3111 = vmatprep.subr.bf16.mxu1 %v2683_v3  ;;  %v7629_v56 = vsel %vm9001_vm6, %v2521_v21, %v7604_v54  ;;  %v7632_v61 = vsel %vm9012_vm7, %v2519_v34, %v2521_v21  ;;  %v7662_v23 = vsel %vm2560_vm14, %v7498_v53, %v2551_v14  ;;  %v2450_v53 = vmax.f32 %v7395_v28, %v2410_v6  ;;  %vm9017_vm6 = vmmov %vm9009_vm3 }
 0x575   : > { %3187 = vmatprep.subr.bf16.mxu0 %v7629_v56  ;;  %v2459_v28 = vmax.f32 %v7345_v29, %v2419_v35  ;;  %v5144_v29 = vunpack.i.h.bf16 %v7489_v5  ;;  %vm9018_vm7 = vmmov %vm9016_vm5 }
 0x576   : > { %3112 = vmatpush1.bf16.msra.mxu1 %v2682_v55  ;;  %3188 = vmatpush1.bf16.msra.mxu0 %v7632_v61  ;;  %v7684_v31 = vpack.c.bf16 %v2460_v27, %v2450_v53 }
 0x577   : > { %v7641_v37 = vpop.permute.xlu1 %2552  ;;  %2618 = vrot.lane.b32.xlu0 %v7558_v13, %s8973_s19  ;;  %2646 = vrot.lane.b32.xlu1 %v7517_v18, %s8970_s23  ;;  %v2421_v10 = vsel %vm677_vm4, %v5164_v26, %v5144_v29 }
 0x578   : > { %3113 = vmatprep.subr.bf16.mxu1 %v2714_v40  ;;  %v7654_v34 = vsel %vm2560_vm14, %v2551_v14, %v7641_v37  ;;  %v2461_v47 = vmax.f32 %v7357_v25, %v2421_v10  ;;  %v7755_v25 = vpop.permute.xlu0 %2783 }
 0x579   : > { %3189 = vmatprep.subr.bf16.mxu0 %v7654_v34 }
 0x57a   : > { %3114 = vmatpush1.bf16.msra.mxu1 %v2713_v50  ;;  %3190 = vmatpush1.bf16.msra.mxu0 %v7662_v23 }
 0x57b   : > { %2648 = vrot.lane.b32.xlu0 %v7558_v13, %s8970_s23  ;;  %2735 = vrot.lane.b32.xlu1 %v7307_v44, %s5362_s25 }
 0x57c   : > { %3115 = vmatprep.subr.bf16.mxu1 %v2745_v52 }
 0x57e   : > { %3116 = vmatpush1.bf16.msra.mxu1 %v2744_v2 }
 0x57f   : > { %2708 = vrot.lane.b32.xlu0 %v7558_v13, %s5363_s28  ;;  %2706 = vrot.lane.b32.xlu1 %v7517_v18, %s5363_s28 }
 0x580   : > { %3117 = vmatprep.subr.bf16.mxu1 %v7309_v32  ;;  %v2449_v32 = vmax.f32 %v7386_v7, %v2409_v24  ;;  %v5143_v7 = vunpack.i.l.bf16 %v7489_v5 }
 0x582   : > { %3118 = vmatpush1.bf16.msra.mxu1 %v7291_v59  ;;  %v7706_v59 = vpack.c.bf16 %v2459_v28, %v2449_v32  ;;  %v2411_v46 = vsel %vm677_vm4, %v5154_v36, %v5143_v7  ;;  %vm2793_vm4 = vcmask 539648  }
 0x583   : > { %2759 = vrot.lane.b32.xlu0 %v7684_v31, %s9004_s15  ;;  %2585 = vrot.lane.b32.xlu1 %v7517_v18, %s5360_s30  ;;  %v2451_v16 = vmax.f32 %v7399_v20, %v2411_v46  ;;  %v2782_v20 = vpop.permute.xlu1 %2781 }
 0x584   : > { %3119 = vmatprep.subr.bf16.mxu1 %v7617_v62  ;;  %v2795_v63 = vsel %vm2793_vm4, %v2782_v20, %v7755_v25  ;;  %v2794_v57 = vsel %vm2793_vm4, %v7522_v42, %v2782_v20 }
 0x585   : > { %v7729_v5 = vpack.c.bf16 %v2461_v47, %v2451_v16 }
 0x586   : > { %3120 = vmatpush1.bf16.msra.mxu1 %v7493_v43 }
 0x587   : > { %2763 = vrot.lane.b32.xlu0 %v7684_v31, %s5345_s26  ;;  %2678 = vrot.lane.b32.xlu1 %v7558_v13, %s8998_s29  ;;  %v2613_v51 = vpop.permute.xlu1 %2612 }
 0x588   : > { %3121 = vmatprep.subr.bf16.mxu1 %v7632_v61  ;;  %v2624_v58 = vsel %vm912_vm10, %v7510_v15, %v2613_v51 }
 0x58a   : > { %3122 = vmatpush1.bf16.msra.mxu1 %v7532_v22 }
 0x58b   : > { %2558 = vrot.lane.b32.xlu0 %v7706_v59, %s5361_s12  ;;  %2587 = vrot.lane.b32.xlu1 %v7558_v13, %s5360_s30 }
 0x58c   : > { %3123 = vmatprep.subr.bf16.mxu1 %v7662_v23 }
 0x58e   : > { %3124 = vmatpush1.bf16.msra.mxu1 %v7553_v11 }
 0x58f   : > { %2789 = vrot.lane.b32.xlu0 %v7706_v59, %s5364_s22  ;;  %2498 = vrot.lane.b32.xlu1 %v7706_v59, %s9004_s15 }
 0x593   : > { %2620 = vrot.lane.b32.xlu0 %v7706_v59, %s8973_s19  ;;  %2528 = vrot.lane.b32.xlu1 %v7706_v59, %s5345_s26 }
 0x597   : > { %2767 = vrot.lane.b32.xlu1 %v7684_v31, %s5361_s12  ;;  %2801 = vrot.lane.b32.xlu0 %v7729_v5, %s8973_s19 }
 0x59b   : > { %2791 = vrot.lane.b32.xlu1 %v7684_v31, %s5364_s22  ;;  %2886 = vrot.lane.b32.xlu0 %v7510_v15, %s8970_s23 }
 0x59f   : > { %2775 = vrot.lane.b32.xlu1 %v7684_v31, %s8973_s19  ;;  %2902 = vrot.lane.b32.xlu0 %v7542_v48, %s8970_s23 }
 0x5a3   : > { %2650 = vrot.lane.b32.xlu1 %v7706_v59, %s8970_s23  ;;  %2934 = vrot.lane.b32.xlu0 %v7561_v12, %s8970_s23 }
 0x5a7   : > { %2870 = vrot.lane.b32.xlu1 %v7522_v42, %s8970_s23  ;;  %2822 = vrot.lane.b32.xlu0 %v7493_v43, %s8970_s23  ;;  %v7765_v43 = vpop.permute.xlu0 %2614 }
 0x5ab   : > { %2918 = vrot.lane.b32.xlu1 %v7563_v9, %s8970_s23  ;;  %2854 = vrot.lane.b32.xlu0 %v7553_v11, %s8970_s23  ;;  %v7776_v11 = vpop.permute.xlu1 %2644 }
 0x5af   : > { %2838 = vrot.lane.b32.xlu1 %v7532_v22, %s8970_s23  ;;  %2824 = vrot.lane.b32.xlu0 %v7617_v62, %s8970_s23  ;;  %v2643_v22 = vpop.permute.xlu0 %2642  ;;  %v7788_v62 = vsel %vm912_vm10, %v2613_v51, %v7765_v43  ;;  %v2673_v3 = vpop.permute.xlu1 %2672 }
 0x5b0   : > { %v7792_v21 = vsel %vm1006_vm12, %v2643_v22, %v7776_v11  ;;  %v2654_v15 = vsel %vm1006_vm12, %v7542_v48, %v2643_v22  ;;  %v2684_v55 = vsel %vm9015_vm13, %v7563_v9, %v2673_v3  ;;  %vm9021_vm13 = vmmov %vm9016_vm5 }
 0x5b3   : > { %2826 = vrot.lane.b32.xlu1 %v7609_v30, %s8970_s23  ;;  %2842 = vrot.lane.b32.xlu0 %v7629_v56, %s8970_s23  ;;  %v7784_v38 = vpop.permute.xlu0 %2674  ;;  %v7808_v60 = vpop.permute.xlu1 %2704 }
 0x5b4   : > { %v2685_v42 = vsel %vm9014_vm11, %v2673_v3, %v7784_v38  ;;  %vm9020_vm11 = vmmov %vm9009_vm3 }
 0x5b7   : > { %2840 = vrot.lane.b32.xlu1 %v7632_v61, %s8970_s23  ;;  %2856 = vrot.lane.b32.xlu0 %v7662_v23, %s8970_s23  ;;  %v2703_v61 = vpop.permute.xlu0 %2702 }
 0x5b8   : > { %v2715_v36 = vsel %vm2712_vm0, %v7561_v12, %v2703_v61  ;;  %v2716_v14 = vsel %vm2712_vm0, %v2703_v61, %v7808_v60 }
 0x5bb   : > { %2858 = vrot.lane.b32.xlu1 %v7654_v34, %s8970_s23  ;;  %2874 = vrot.lane.b32.xlu0 %v2795_v63, %s8970_s23  ;;  %v7812_v48 = vpop.permute.xlu0 %2583 }
 0x5bf   : > { %2872 = vrot.lane.b32.xlu1 %v2794_v57, %s8970_s23  ;;  %2888 = vrot.lane.b32.xlu0 %v2624_v58, %s8970_s23 }
 0x5c3   : > { %2890 = vrot.lane.b32.xlu1 %v7788_v62, %s8970_s23  ;;  %2906 = vrot.lane.b32.xlu0 %v7792_v21, %s8970_s23 }
 0x5c7   : > { %2904 = vrot.lane.b32.xlu1 %v2654_v15, %s8970_s23  ;;  %2922 = vrot.lane.b32.xlu0 %v2685_v42, %s8970_s23 }
 0x5cb   : > { %2920 = vrot.lane.b32.xlu1 %v2684_v55, %s8970_s23  ;;  %2936 = vrot.lane.b32.xlu0 %v2715_v36, %s8970_s23 }
 0x5cf   : > { %2938 = vrot.lane.b32.xlu1 %v2716_v14, %s8970_s23 }
 0x5d1   : > { %v7817_v40 = vpop.permute.xlu0 %2676  ;;  %v2495_v26 = vpop.permute.xlu1 %2494 }
 0x5d2   : > { %v7821_v9 = vsel %vm9009_vm3, %v7593_v49, %v2495_v26  ;;  %v7899_v10 = vsel %vm9011_vm2, %v7784_v38, %v7817_v40 }
 0x5d3   : > { %2828 = vrot.lane.b32.xlu1 %v7821_v9, %s8970_s23 }
 0x5d5   : > { %v2734_v12 = vpop.permute.xlu0 %2733  ;;  %v7825_v17 = vpop.permute.xlu1 %2524 }
 0x5d6   : > { %v7830_v50 = vsel %vm9016_vm5, %v7604_v54, %v7825_v17  ;;  %v2746_v16 = vsel %vm2743_vm9, %v7578_v0, %v2734_v12 }
 0x5d7   : > { %2844 = vrot.lane.b32.xlu1 %v7830_v50, %s8970_s23 }
 0x5d9   : > { %v7834_v23 = vpop.permute.xlu0 %2496  ;;  %v2582_v6 = vpop.permute.xlu1 %2581 }
 0x5da   : > { %v2594_v49 = vsel %vm2591_vm1, %v7545_v19, %v2582_v6  ;;  %v7840_v52 = vsel %vm2591_vm1, %v2582_v6, %v7812_v48  ;;  %v7856_v19 = vld [vmem:[%s8931_s3] ss:$16 sps:$4 sm:$0xff]  }
 0x5db   : > { %3125 = vmatprep.subr.bf16.mxu1 %v2594_v49  ;;  %3191 = vmatprep.subr.bf16.mxu0 %v7840_v52 }
 0x5dc   : > { %3126 = vmatpush1.bf16.msra.mxu1 %v7572_v1  ;;  %3192 = vmatpush1.bf16.msra.mxu0 %v2594_v49 }
 0x5dd   : > { %v7844_v54 = vpop.permute.xlu0 %2526  ;;  %3193 = vmatprep.subr.bf16.mxu0 %v7788_v62  ;;  %v2555_v8 = vpop.permute.xlu1 %2554  ;;  %3127 = vmatprep.subr.bf16.mxu1 %v2624_v58 }
 0x5de   : > { %v7849_v2 = vsel %vm2560_vm14, %v7641_v37, %v2555_v8  ;;  %v7865_v37 = vld [vmem:[%s8931_s3 + $0xc] ss:$16 sps:$4 sm:$0xff]   ;;  %v7929_v63 = vsel %vm9018_vm7, %v7825_v17, %v7844_v54 }
 0x5df   : > { %2860 = vrot.lane.b32.xlu1 %v7849_v2, %s8970_s23 }
 0x5e0   : > { %3128 = vmatpush1.bf16.msra.mxu1 %v7587_v45  ;;  %3194 = vmatpush1.bf16.msra.mxu0 %v2624_v58 }
 0x5e1   : > { %v7859_v1 = vpop.permute.xlu0 %2556  ;;  %3195 = vmatprep.subr.bf16.mxu0 %v7792_v21  ;;  %v2786_v53 = vpop.permute.xlu1 %2785  ;;  %3140 = vmatprep.subr.bf16.mxu1 %v2654_v15 }
 0x5e2   : > { %v2796_v27 = vsel %vm2793_vm4, %v7755_v25, %v2786_v53 }
 0x5e3   : > { %2876 = vrot.lane.b32.xlu1 %v2796_v27, %s8970_s23  ;;  %3130 = vmatmul.mubr.bf16.vlgmr.msra.gmra.mrb[16].mxu1 %v7856_v19 }
 0x5e4   : > { %3141 = vmatpush1.bf16.msra.mxu1 %v7602_v4  ;;  %3196 = vmatpush1.bf16.msra.mxu0 %v2654_v15 }
 0x5e5   : > { %v7872_v45 = vpop.permute.xlu0 %2787  ;;  %3197 = vmatprep.subr.bf16.mxu0 %v2685_v42  ;;  %v2617_v24 = vpop.permute.xlu1 %2616  ;;  %4687 = vmatprep.mubr.msk.bf16.mxu1 %vm1666_vm15, %v7865_v37 }
 0x5e6   : > { %v7878_v35 = vsel %vm912_vm10, %v7765_v43, %v2617_v24  ;;  %v7914_v43 = vsel %vm9017_vm6, %v2495_v26, %v7834_v23  ;;  %v2797_v38 = vsel %vm2793_vm4, %v2786_v53, %v7872_v45 }
 0x5e7   : > { %2892 = vrot.lane.b32.xlu0 %v7878_v35, %s8970_s23 }
 0x5e8   : > { %3198 = vmatpush1.bf16.msra.mxu0 %v2684_v55 }
 0x5e9   : > { %v7882_v32 = vpop.permute.xlu0 %2618  ;;  %3199 = vmatprep.subr.bf16.mxu0 %v2716_v14  ;;  %v2647_v4 = vpop.permute.xlu1 %2646 }
 0x5ea   : > { %v7886_v28 = vsel %vm1006_vm12, %v7776_v11, %v2647_v4  ;;  %v7943_v11 = vsel %vm2560_vm14, %v2555_v8, %v7859_v1  ;;  %v7957_v58 = vsel %vm912_vm10, %v2617_v24, %v7882_v32 }
 0x5eb   : > { %2908 = vrot.lane.b32.xlu0 %v7886_v28, %s8970_s23 }
 0x5ec   : > { %3200 = vmatpush1.bf16.msra.mxu0 %v2715_v36 }
 0x5ed   : > { %v7890_v29 = vpop.permute.xlu0 %2648  ;;  %v7892_v7 = vpop.permute.xlu1 %2735 }
 0x5ee   : > { %v2747_v46 = vsel %vm2743_vm9, %v2734_v12, %v7892_v7  ;;  %v7975_v42 = vsel %vm1006_vm12, %v2647_v4, %v7890_v29 }
 0x5ef   : > { %3201 = vmatprep.subr.bf16.mxu0 %v2747_v46  ;;  %2924 = vrot.lane.b32.xlu0 %v7899_v10, %s8970_s23 }
 0x5f0   : > { %3202 = vmatpush1.bf16.msra.mxu0 %v2746_v16 }
 0x5f1   : > { %v7905_v47 = vpop.permute.xlu0 %2708  ;;  %3203 = vmatprep.subr.bf16.mxu0 %v7307_v44  ;;  %v2707_v25 = vpop.permute.xlu1 %2706 }
 0x5f2   : > { %v7910_v20 = vsel %vm2712_vm0, %v7808_v60, %v2707_v25 }
 0x5f3   : > { %2940 = vrot.lane.b32.xlu1 %v7910_v20, %s8970_s23  ;;  %2830 = vrot.lane.b32.xlu0 %v7914_v43, %s8970_s23 }
 0x5f4   : > { %3204 = vmatpush1.bf16.msra.mxu0 %v7305_v41 }
 0x5f5   : > { %v7921_v0 = vpop.permute.xlu0 %2759  ;;  %3205 = vmatprep.subr.bf16.mxu0 %v7821_v9  ;;  %v7924_v51 = vpop.permute.xlu1 %2585 }
 0x5f7   : > { %2806 = vrot.lane.b32.xlu1 %v7729_v5, %s8970_s23  ;;  %2846 = vrot.lane.b32.xlu0 %v7929_v63, %s8970_s23 }
 0x5f8   : > { %3206 = vmatpush1.bf16.msra.mxu0 %v7609_v30 }
 0x5f9   : > { %v7936_v41 = vpop.permute.xlu0 %2763  ;;  %3207 = vmatprep.subr.bf16.mxu0 %v7830_v50  ;;  %v7939_v22 = vpop.permute.xlu1 %2678 }
 0x5fa   : > { %v7988_v55 = vsel %vm9019_vm8, %v7817_v40, %v7939_v22 }
 0x5fb   : > { %2710 = vrot.lane.b32.xlu1 %v7706_v59, %s5363_s28  ;;  %2862 = vrot.lane.b32.xlu0 %v7943_v11, %s8970_s23 }
 0x5fc   : > { %3208 = vmatpush1.bf16.msra.mxu0 %v7629_v56  ;;  %v7968_v56 = vsel %vm2591_vm1, %v7812_v48, %v7924_v51 }
 0x5fd   : > { %v7950_v57 = vpop.permute.xlu0 %2558  ;;  %3209 = vmatprep.subr.bf16.mxu0 %v7849_v2  ;;  %v7953_v30 = vpop.permute.xlu1 %2587 }
 0x5ff   : > { %2894 = vrot.lane.b32.xlu1 %v7957_v58, %s8970_s23  ;;  %2878 = vrot.lane.b32.xlu0 %v2797_v38, %s8970_s23 }
 0x600   : > { %3210 = vmatpush1.bf16.msra.mxu0 %v7654_v34 }
 0x601   : > { %v7970_v3 = vpop.permute.xlu0 %2789  ;;  %3211 = vmatprep.subr.bf16.mxu0 %v7968_v56  ;;  %v2499_v15 = vpop.permute.xlu1 %2498 }
 0x602   : > { %v8046_v27 = vsel %vm9020_vm11, %v7834_v23, %v2499_v15 }
 0x603   : > { %2910 = vrot.lane.b32.xlu1 %v7975_v42, %s8970_s23  ;;  %2804 = vrot.lane.b32.xlu0 %v7684_v31, %s8970_s23 }
 0x604   : > { %3212 = vmatpush1.bf16.msra.mxu0 %v7840_v52 }
 0x605   : > { %v7982_v34 = vpop.permute.xlu0 %2620  ;;  %3213 = vmatprep.subr.bf16.mxu0 %v7878_v35  ;;  %v2529_v61 = vpop.permute.xlu1 %2528 }
 0x606   : > { %v8058_v4 = vsel %vm9021_vm13, %v2529_v61, %v7936_v41 }
 0x607   : > { %2926 = vrot.lane.b32.xlu1 %v7988_v55, %s8970_s23  ;;  %2680 = vrot.lane.b32.xlu0 %v7706_v59, %s8998_s29 }
 0x608   : > { %3214 = vmatpush1.bf16.msra.mxu0 %v7788_v62  ;;  %v8012_v62 = vsel %vm2712_vm0, %v2707_v25, %v7905_v47  ;;  %v8069_v25 = vsel %vm2560_vm14, %v7859_v1, %v7950_v57 }
 0x609   : > { %3226 = vmatprep.subr.bf16.mxu0 %v7886_v28  ;;  %v7996_v36 = vpop.permute.xlu1 %2767  ;;  %v7998_v60 = vpop.permute.xlu0 %2801 }
 0x60b   : > { %2812 = vrot.lane.b32.xlu1 %v7729_v5, %s8998_s29  ;;  %2810 = vrot.lane.b32.xlu0 %v7684_v31, %s8998_s29 }
 0x60c   : > { %3216 = vmatmul.mubr.bf16.vlgmr.msra.gmra.mrb[12].mxu0 %v7856_v19 }
 0x60d   : > { %3227 = vmatpush1.bf16.msra.mxu0 %v7792_v21  ;;  %v2792_v48 = vpop.permute.xlu1 %2791  ;;  %v8006_v14 = vpop.permute.xlu0 %2886  ;;  %4688 = vmatprep.mubr.msk.bf16.mxu0 %vm1666_vm15, %v7865_v37 }
 0x60f   : > { %2739 = vrot.lane.b32.xlu1 %v7558_v13, %s5362_s25  ;;  %2942 = vrot.lane.b32.xlu0 %v8012_v62, %s8970_s23 }
 0x611   : > { %v8018_v40 = vpop.permute.xlu1 %2775  ;;  %v8020_v26 = vpop.permute.xlu0 %2902 }
 0x613   : > { %2816 = vrot.lane.b32.xlu1 %v7684_v31, %s5363_s28  ;;  %2737 = vrot.lane.b32.xlu0 %v7517_v18, %s5362_s25 }
 0x615   : > { %v8026_v21 = vpop.permute.xlu1 %2650  ;;  %v8028_v12 = vpop.permute.xlu0 %2934 }
 0x617   : > { %2589 = vrot.lane.b32.xlu1 %v7706_v59, %s5360_s30  ;;  %2741 = vrot.lane.b32.xlu0 %v7706_v59, %s5362_s25 }
 0x619   : > { %v2871_v17 = vpop.permute.xlu1 %2870  ;;  %v2823_v6 = vpop.permute.xlu0 %2822 }
 0x61b   : > { %2836 = vrot.lane.b32.xlu1 %v7921_v0, %s8970_s23  ;;  %2818 = vrot.lane.b32.xlu0 %v7729_v5, %s5363_s28 }
 0x61d   : > { %v8038_v49 = vpop.permute.xlu1 %2918  ;;  %v2855_v52 = vpop.permute.xlu0 %2854 }
 0x61f   : > { %2868 = vrot.lane.b32.xlu1 %v7996_v36, %s8970_s23  ;;  %2771 = vrot.lane.b32.xlu0 %v7684_v31, %s5360_s30 }
 0x621   : > { %v2839_v8 = vpop.permute.xlu1 %2838  ;;  %v2825_v53 = vpop.permute.xlu0 %2824 }
 0x622   : > { %v2950_v23 = vsel %vm1006_vm12, %v2823_v6, %v2825_v53 }
 0x623   : > { %2832 = vrot.lane.b32.xlu1 %v8046_v27, %s8970_s23  ;;  %2852 = vrot.lane.b32.xlu0 %v7936_v41, %s8970_s23  ;;  %v8073_v41 = vsel %vm9009_vm3, %v2499_v15, %v7921_v0  ;;  %v2799_v0 = vsel %vm2793_vm4, %v7970_v3, %v2792_v48  ;;  %v8090_v15 = vsel %vm9016_vm5, %v7844_v54, %v2529_v61 }
 0x624   : > { %v8106_v54 = vsel %vm2560_vm14, %v7950_v57, %v7996_v36  ;;  %v2798_v57 = vsel %vm2793_vm4, %v7872_v45, %v7970_v3  ;;  %v2803_v36 = vsel %vm912_vm10, %v8018_v40, %v7998_v60  ;;  %v8134_v45 = vsel %vm912_vm10, %v7982_v34, %v8018_v40  ;;  %vm9022_vm14 = vmmov %vm9011_vm2 }
 0x625   : > { %v8052_v5 = vpop.permute.xlu1 %2826  ;;  %v8054_v24 = vpop.permute.xlu0 %2842  ;;  %vm9023_vm4 = vmmov %vm9011_vm2 }
 0x626   : > { %v2951_v31 = vsel %vm1006_vm12, %v2825_v53, %v8052_v5 }
 0x627   : > { %2850 = vrot.lane.b32.xlu1 %v8058_v4, %s8970_s23  ;;  %2884 = vrot.lane.b32.xlu0 %v2792_v48, %s8970_s23  ;;  %v8101_v48 = vsel %vm912_vm10, %v7882_v32, %v7982_v34 }
 0x628   : > { %3142 = vmatprep.subr.bf16.mxu1 %v2951_v31 }
 0x629   : > { %3143 = vmatpush1.bf16.msra.mxu1 %v2950_v23  ;;  %v2841_v46 = vpop.permute.xlu1 %2840  ;;  %v2857_v16 = vpop.permute.xlu0 %2856 }
 0x62a   : > { %v2958_v38 = vsel %vm1006_vm12, %v2841_v46, %v8054_v24  ;;  %v2957_v33 = vsel %vm1006_vm12, %v2839_v8, %v2841_v46 }
 0x62b   : > { %2864 = vrot.lane.b32.xlu1 %v8069_v25, %s8970_s23  ;;  %2834 = vrot.lane.b32.xlu0 %v8073_v41, %s8970_s23 }
 0x62c   : > { %3144 = vmatprep.subr.bf16.mxu1 %v2958_v38 }
 0x62d   : > { %3145 = vmatpush1.bf16.msra.mxu1 %v2957_v33  ;;  %v8082_v6 = vpop.permute.xlu1 %2858  ;;  %v8084_v1 = vpop.permute.xlu0 %2874  ;;  %v2964_v33 = vsel %vm1006_vm12, %v2855_v52, %v2857_v16 }
 0x62e   : > { %v2965_v8 = vsel %vm1006_vm12, %v2857_v16, %v8082_v6 }
 0x62f   : > { %2882 = vrot.lane.b32.xlu1 %v2799_v0, %s8970_s23  ;;  %2848 = vrot.lane.b32.xlu0 %v8090_v15, %s8970_s23  ;;  %v8147_v0 = vsel %vm1006_vm12, %v7890_v29, %v8026_v21 }
 0x630   : > { %3146 = vmatprep.subr.bf16.mxu1 %v2965_v8 }
 0x631   : > { %3147 = vmatpush1.bf16.msra.mxu1 %v2964_v33  ;;  %v2873_v53 = vpop.permute.xlu1 %2872  ;;  %v2889_v31 = vpop.permute.xlu0 %2888 }
 0x632   : > { %v2972_v61 = vsel %vm1006_vm12, %v2873_v53, %v8084_v1  ;;  %v2971_v23 = vsel %vm1006_vm12, %v2871_v17, %v2873_v53  ;;  %v2978_v46 = vsel %vm1006_vm12, %v8006_v14, %v2889_v31  ;;  %v8164_v53 = vld [vmem:[%s8931_s3 + $0x8] ss:$16 sps:$4 sm:$0xff]  }
 0x633   : > { %2896 = vrot.lane.b32.xlu1 %v8101_v48, %s8970_s23  ;;  %2866 = vrot.lane.b32.xlu0 %v8106_v54, %s8970_s23 }
 0x634   : > { %3148 = vmatprep.subr.bf16.mxu1 %v2972_v61 }
 0x635   : > { %3149 = vmatpush1.bf16.msra.mxu1 %v2971_v23  ;;  %v8115_v32 = vpop.permute.xlu1 %2890  ;;  %v8117_v52 = vpop.permute.xlu0 %2906 }
 0x636   : > { %v2979_v17 = vsel %vm1006_vm12, %v2889_v31, %v8115_v32 }
 0x637   : > { %2880 = vrot.lane.b32.xlu0 %v2798_v57, %s8970_s23  ;;  %2900 = vrot.lane.b32.xlu1 %v2803_v36, %s8970_s23 }
 0x638   : > { %3150 = vmatprep.subr.bf16.mxu1 %v2979_v17 }
 0x639   : > { %3151 = vmatpush1.bf16.msra.mxu1 %v2978_v46  ;;  %v2905_v16 = vpop.permute.xlu1 %2904  ;;  %v8140_v38 = vpop.permute.xlu0 %2922 }
 0x63a   : > { %v2986_v3 = vsel %vm1006_vm12, %v2905_v16, %v8117_v52  ;;  %v2985_v60 = vsel %vm1006_vm12, %v8020_v26, %v2905_v16 }
 0x63b   : > { %2898 = vrot.lane.b32.xlu0 %v8134_v45, %s8970_s23  ;;  %3152 = vmatprep.subr.bf16.mxu1 %v2986_v3 }
 0x63d   : > { %3153 = vmatpush1.bf16.msra.mxu1 %v2985_v60  ;;  %v2921_v14 = vpop.permute.xlu1 %2920  ;;  %v2937_v26 = vpop.permute.xlu0 %2936 }
 0x63e   : > { %v2993_v34 = vsel %vm1006_vm12, %v2921_v14, %v8140_v38  ;;  %v2992_v40 = vsel %vm1006_vm12, %v8038_v49, %v2921_v14  ;;  %v2999_v29 = vsel %vm1006_vm12, %v8028_v12, %v2937_v26  ;;  %v8179_v49 = vsel %vm2591_vm1, %v7924_v51, %v7953_v30 }
 0x63f   : > { %2912 = vrot.lane.b32.xlu0 %v8147_v0, %s8970_s23  ;;  %3154 = vmatprep.subr.bf16.mxu1 %v2993_v34 }
 0x641   : > { %3155 = vmatpush1.bf16.msra.mxu1 %v2992_v40  ;;  %v8155_v8 = vpop.permute.xlu1 %2938 }
 0x642   : > { %v3000_v33 = vsel %vm1006_vm12, %v2937_v26, %v8155_v8 }
 0x643   : > { %3156 = vmatprep.subr.bf16.mxu1 %v3000_v33 }
 0x645   : > { %3157 = vmatpush1.bf16.msra.mxu1 %v2999_v29  ;;  %v2829_v12 = vpop.permute.xlu1 %2828 }
 0x646   : > { %3269 = vmatprep.subr.bf16.mxu1 %v7517_v18 }
 0x648   : > { %3173 = vmatmul.mubr.bf16.vlgmr.msra.gmra.mrb[16].mxu1 %v8164_v53 }
 0x649   : > { %3270 = vmatpush1.bf16.msra.mxu1 %v7307_v44  ;;  %3301 = vmatprep.mubr.bf16.mxu1 %v7540_v39  ;;  %v2845_v44 = vpop.permute.xlu1 %2844 }
 0x64a   : > { %3271 = vmatprep.subr.bf16.mxu1 %v7914_v43 }
 0x64d   : > { %3272 = vmatpush1.bf16.msra.mxu1 %v7821_v9 }
 0x64e   : > { %3273 = vmatprep.subr.bf16.mxu1 %v7929_v63 }
 0x651   : > { %3274 = vmatpush1.bf16.msra.mxu1 %v7830_v50  ;;  %v2861_v31 = vpop.permute.xlu1 %2860 }
 0x652   : > { %3275 = vmatprep.subr.bf16.mxu1 %v7943_v11 }
 0x655   : > { %3276 = vmatpush1.bf16.msra.mxu1 %v7849_v2  ;;  %v2877_v2 = vpop.permute.xlu1 %2876 }
 0x656   : > { %3277 = vmatprep.subr.bf16.mxu1 %v8179_v49 }
 0x659   : > { %3278 = vmatpush1.bf16.msra.mxu1 %v7968_v56  ;;  %v2893_v9 = vpop.permute.xlu0 %2892 }
 0x65a   : > { %3279 = vmatprep.subr.bf16.mxu1 %v7957_v58 }
 0x65d   : > { %3280 = vmatpush1.bf16.msra.mxu1 %v7878_v35  ;;  %v2909_v50 = vpop.permute.xlu0 %2908  ;;  %v2952_v35 = vsel %vm1006_vm12, %v8052_v5, %v2829_v12 }
 0x65e   : > { %3281 = vmatprep.subr.bf16.mxu1 %v7975_v42  ;;  %v2987_v29 = vsel %vm1006_vm12, %v8117_v52, %v2909_v50 }
 0x661   : > { %3282 = vmatpush1.bf16.msra.mxu1 %v7886_v28  ;;  %v2925_v61 = vpop.permute.xlu0 %2924 }
 0x662   : > { %3283 = vmatprep.subr.bf16.mxu1 %v7988_v55  ;;  %v2959_v55 = vsel %vm1006_vm12, %v8054_v24, %v2845_v44  ;;  %v2973_v24 = vsel %vm1006_vm12, %v8084_v1, %v2877_v2  ;;  %v2980_v1 = vsel %vm1006_vm12, %v8115_v32, %v2893_v9 }
 0x665   : > { %3284 = vmatpush1.bf16.msra.mxu1 %v7899_v10  ;;  %v2941_v51 = vpop.permute.xlu1 %2940  ;;  %v8189_v23 = vpop.permute.xlu0 %2830 }
 0x666   : > { %3285 = vmatprep.subr.bf16.mxu1 %v8012_v62  ;;  %v2953_v56 = vsel %vm1006_vm12, %v2829_v12, %v8189_v23 }
 0x667   : > { %3228 = vmatprep.subr.bf16.mxu0 %v2953_v56 }
 0x668   : > { %3229 = vmatpush1.bf16.msra.mxu0 %v2952_v35  ;;  %v3001_v35 = vsel %vm1006_vm12, %v8155_v8, %v2941_v51  ;;  %v3063_v8 = vld [vmem:[%s8932_s4] sm:$0xff] }
 0x669   : > { %3286 = vmatpush1.bf16.msra.mxu1 %v7910_v20  ;;  %v2807_v28 = vpop.permute.xlu1 %2806  ;;  %v8197_v57 = vpop.permute.xlu0 %2846  ;;  %v2966_v20 = vsel %vm1006_vm12, %v8082_v6, %v2861_v31 }
 0x66a   : > { %v2960_v10 = vsel %vm1006_vm12, %v2845_v44, %v8197_v57 }
 0x66b   : > { %3230 = vmatprep.subr.bf16.mxu0 %v2960_v10 }
 0x66c   : > { %3231 = vmatpush1.bf16.msra.mxu0 %v2959_v55 }
 0x66d   : > { %v2711_v62 = vpop.permute.xlu1 %2710  ;;  %v8203_v36 = vpop.permute.xlu0 %2862 }
 0x66e   : > { %v2967_v5 = vsel %vm1006_vm12, %v2861_v31, %v8203_v36 }
 0x66f   : > { %3232 = vmatprep.subr.bf16.mxu0 %v2967_v5 }
 0x670   : > { %3233 = vmatpush1.bf16.msra.mxu0 %v2966_v20 }
 0x671   : > { %v8209_v17 = vpop.permute.xlu1 %2894  ;;  %v8211_v46 = vpop.permute.xlu0 %2878 }
 0x672   : > { %v2974_v16 = vsel %vm1006_vm12, %v2877_v2, %v8211_v46  ;;  %v2981_v3 = vsel %vm1006_vm12, %v2893_v9, %v8209_v17  ;;  %v2719_v2 = vsel %vm2712_vm0, %v7905_v47, %v2711_v62 }
 0x673   : > { %3234 = vmatprep.subr.bf16.mxu0 %v2974_v16 }
 0x674   : > { %3235 = vmatpush1.bf16.msra.mxu0 %v2973_v24 }
 0x675   : > { %v8219_v60 = vpop.permute.xlu1 %2910  ;;  %3236 = vmatprep.subr.bf16.mxu0 %v2981_v3  ;;  %v2805_v6 = vpop.permute.xlu0 %2804 }
 0x676   : > { %v8223_v14 = vsel %vm1006_vm12, %v8026_v21, %v2805_v6  ;;  %v2809_v34 = vsel %vm1006_vm12, %v2805_v6, %v2807_v28  ;;  %v2988_v40 = vsel %vm1006_vm12, %v2909_v50, %v8219_v60 }
 0x677   : > { %2916 = vrot.lane.b32.xlu0 %v2809_v34, %s8970_s23  ;;  %2914 = vrot.lane.b32.xlu1 %v8223_v14, %s8970_s23 }
 0x678   : > { %3237 = vmatpush1.bf16.msra.mxu0 %v2980_v1 }
 0x679   : > { %v8233_v26 = vpop.permute.xlu1 %2926  ;;  %3238 = vmatprep.subr.bf16.mxu0 %v2988_v40  ;;  %v2681_v33 = vpop.permute.xlu0 %2680 }
 0x67a   : > { %v8237_v21 = vsel %vm9022_vm14, %v7939_v22, %v2681_v33  ;;  %v2995_v32 = vsel %vm1006_vm12, %v2925_v61, %v8233_v26  ;;  %v2994_v22 = vsel %vm1006_vm12, %v8140_v38, %v2925_v61 }
 0x67b   : > { %2928 = vrot.lane.b32.xlu1 %v8237_v21, %s8970_s23 }
 0x67c   : > { %3239 = vmatpush1.bf16.msra.mxu0 %v2987_v29 }
 0x67d   : > { %v2813_v12 = vpop.permute.xlu1 %2812  ;;  %3240 = vmatprep.subr.bf16.mxu0 %v2995_v32  ;;  %v2811_v44 = vpop.permute.xlu0 %2810 }
 0x67e   : > { %v2814_v9 = vsel %vm9023_vm4, %v2681_v33, %v2811_v44  ;;  %v2815_v31 = vsel %vm9011_vm2, %v2811_v44, %v2813_v12  ;;  %vm3669_vm2 = vcmask 949248  }
 0x67f   : > { %2932 = vrot.lane.b32.xlu1 %v2815_v31, %s8970_s23  ;;  %2930 = vrot.lane.b32.xlu0 %v2814_v9, %s8970_s23 }
 0x680   : > { %3241 = vmatpush1.bf16.msra.mxu0 %v2994_v22 }
 0x681   : > { %v2740_v52 = vpop.permute.xlu1 %2739  ;;  %v8251_v50 = vpop.permute.xlu0 %2942 }
 0x682   : > { %v3002_v56 = vsel %vm1006_vm12, %v2941_v51, %v8251_v50 }
 0x683   : > { %2944 = vrot.lane.b32.xlu0 %v2719_v2, %s8970_s23  ;;  %3242 = vmatprep.subr.bf16.mxu0 %v3002_v56 }
 0x684   : > { %3243 = vmatpush1.bf16.msra.mxu0 %v3001_v35 }
 0x685   : > { %v2817_v28 = vpop.permute.xlu1 %2816  ;;  %4772 = vmatprep.subr.bf16.mxu0 %v2719_v2  ;;  %v2738_v38 = vpop.permute.xlu0 %2737 }
 0x686   : > { %v2820_v61 = vsel %vm2712_vm0, %v2711_v62, %v2817_v28  ;;  %v2748_v10 = vsel %vm2743_vm9, %v7892_v7, %v2738_v38  ;;  %v2749_v47 = vsel %vm2743_vm9, %v2738_v38, %v2740_v52 }
 0x687   : > { %2946 = vrot.lane.b32.xlu1 %v2820_v61, %s8970_s23  ;;  %3259 = vmatmul.mubr.bf16.vlgmr.msra.gmra.mrb[12].mxu0 %v8164_v53 }
 0x688   : > { %3287 = vmatprep.subr.bf16.mxu1 %v2749_v47  ;;  %4773 = vmatpush3.bf16.msra.mxu0 %v7558_v13 }
 0x689   : > { %3288 = vmatpush1.bf16.msra.mxu1 %v2748_v10  ;;  %v2742_v51 = vpop.permute.xlu0 %2741  ;;  %3387 = vmatprep.mubr.bf16.mxu0 %v7540_v39  ;;  %v2590_v55 = vpop.permute.xlu1 %2589 }
 0x68a   : > { %3289 = vmatprep.subr.bf16.mxu1 %v7558_v13  ;;  %v2750_v7 = vsel %vm2743_vm9, %v2740_v52, %v2742_v51  ;;  %v3064_v13 = vld [vmem:[%s8932_s4 + $0x8] sm:$0xff]  ;;  %v2598_v20 = vsel %vm2591_vm1, %v7953_v30, %v2590_v55 }
 0x68b   : > { %3067 = vperm.xlu1 %5053, %v3063_v8   ;;  %4774 = vmatprep.subr.bf16.mxu0 %v2750_v7 }
 0x68c   : > { %4775 = vmatpush3.bf16.msra.mxu0 %v8046_v27 }
 0x68d   : > { %3290 = vmatpush1.bf16.msra.mxu1 %v7517_v18  ;;  %4776 = vmatprep.subr.bf16.mxu0 %v7706_v59  ;;  %v2819_v62 = vpop.permute.xlu0 %2818  ;;  %v2837_v39 = vpop.permute.xlu1 %2836 }
 0x68e   : > { %v2821_v5 = vsel %vm2712_vm0, %v2817_v28, %v2819_v62  ;;  %3291 = vmatprep.subr.bf16.mxu1 %v8046_v27  ;;  %vm9026_vm0 = vmmov %vm9009_vm3 }
 0x68f   : > { %2948 = vrot.lane.b32.xlu0 %v2821_v5, %s8970_s23  ;;  %vm9027_vm9 = vmmov %vm9026_vm0  ;;  %s5365_s23 = smov 116  }
 0x690   : > { %4777 = vmatpush3.bf16.msra.mxu0 %v8090_v15  ;;  %vm9028_vm6 = vmmov %vm9026_vm0 }
 0x691   : > { %3292 = vmatpush1.bf16.msra.mxu1 %v7914_v43  ;;  %4778 = vmatprep.subr.bf16.mxu0 %v8073_v41  ;;  %v2772_v18 = vpop.permute.xlu0 %2771  ;;  %v2869_v27 = vpop.permute.xlu1 %2868  ;;  %vm9029_vm7 = vmmov %vm9026_vm0 }
 0x692   : > { %3293 = vmatprep.subr.bf16.mxu1 %v8090_v15  ;;  %v9024_v15 = vmov 0   ;;  %vm9030_vm8 = vmmov %vm9026_vm0 }
 0x693   : > { %3072 = vperm.xlu0 %5054, %v3064_v13   ;;  %vm9031_vm11 = vmmov %vm9026_vm0 }
 0x694   : > { %4779 = vmatpush3.bf16.msra.mxu0 %v8069_v25  ;;  %vm9032_vm13 = vmmov %vm9026_vm0 }
 0x695   : > { %3294 = vmatpush1.bf16.msra.mxu1 %v7929_v63  ;;  %4780 = vmatprep.subr.bf16.mxu0 %v8058_v4  ;;  %v2853_v59 = vpop.permute.xlu0 %2852  ;;  %v2833_v41 = vpop.permute.xlu1 %2832  ;;  %v2773_v63 = vsel %vm2591_vm1, %v2590_v55, %v2772_v18  ;;  %vm9034_vm5 = vmmov %vm9026_vm0 }
 0x696   : > { %3295 = vmatprep.subr.bf16.mxu1 %v8069_v25  ;;  %vm9035_vm14 = vmmov %vm9026_vm0 }
 0x697   : > { %vm9036_vm4 = vmmov %vm9026_vm0 }
 0x698   : > { %4781 = vmatpush3.bf16.msra.mxu0 %v2598_v20 }
 0x699   : > { %3296 = vmatpush1.bf16.msra.mxu1 %v7943_v11  ;;  %4782 = vmatprep.subr.bf16.mxu0 %v8106_v54  ;;  %v2885_v43 = vpop.permute.xlu0 %2884  ;;  %v2851_v30 = vpop.permute.xlu1 %2850 }
 0x69a   : > { %3297 = vmatprep.subr.bf16.mxu1 %v2598_v20 }
 0x69c   : > { %4783 = vmatpush3.bf16.msra.mxu0 %v8101_v48 }
 0x69d   : > { %3298 = vmatpush1.bf16.msra.mxu1 %v8179_v49  ;;  %4784 = vmatprep.subr.bf16.mxu0 %v2773_v63  ;;  %v2835_v4 = vpop.permute.xlu0 %2834  ;;  %v2865_v54 = vpop.permute.xlu1 %2864 }
 0x69e   : > { %3299 = vmatprep.subr.bf16.mxu1 %v8101_v48  ;;  %v2955_v25 = vsel %vm1006_vm12, %v2833_v41, %v2835_v4  ;;  %v2968_v16 = vsel %vm1006_vm12, %v8203_v36, %v2865_v54 }
 0x6a0   : > { %4785 = vmatpush3.bf16.msra.mxu0 %v8147_v0 }
 0x6a1   : > { %3300 = vmatpush1.bf16.msra.mxu1 %v7957_v58  ;;  %4786 = vmatprep.subr.bf16.mxu0 %v8134_v45  ;;  %v2849_v11 = vpop.permute.xlu0 %2848  ;;  %v2954_v58 = vsel %vm1006_vm12, %v8189_v23, %v2833_v41  ;;  %v2956_v45 = vsel %vm1006_vm12, %v2835_v4, %v2837_v39  ;;  %v2883_v23 = vpop.permute.xlu1 %2882 }
 0x6a2   : > { %3312 = vmatprep.subr.bf16.mxu1 %v8147_v0  ;;  %v2977_v36 = vsel %vm1006_vm12, %v2883_v23, %v2885_v43 }
 0x6a4   : > { %3302 = vmatmul.mubr.bf16.vlgmr.msra.gmra.mrb[20].mxu1 %v7856_v19  ;;  %4787 = vmatpush3.bf16.msra.mxu0 %v8237_v21 }
 0x6a5   : > { %3313 = vmatpush1.bf16.msra.mxu1 %v7975_v42  ;;  %3396 = vmatprep.subr.bf16.mxu0 %v9024_v15  ;;  %v2867_v48 = vpop.permute.xlu0 %2866  ;;  %v2962_v42 = vsel %vm1006_vm12, %v2849_v11, %v2851_v30  ;;  %v2897_v6 = vpop.permute.xlu1 %2896 }
 0x6a6   : > { %3314 = vmatprep.subr.bf16.mxu1 %v2955_v25  ;;  %4689 = vmatprep.mubr.msk.bf16.mxu1 %vm1666_vm15, %v7865_v37  ;;  %v2969_v49 = vsel %vm1006_vm12, %v2865_v54, %v2867_v48  ;;  %v2970_v3 = vsel %vm1006_vm12, %v2867_v48, %v2869_v27  ;;  %v2982_v1 = vsel %vm1006_vm12, %v8209_v17, %v2897_v6 }
 0x6a7   : > { %3388 = vmatmul.mubr.bf16.vlgmr.msra.gmra.mrb[16].mxu0 %v7856_v19  ;;  %v2961_v19 = vsel %vm1006_vm12, %v8197_v57, %v2849_v11 }
 0x6a8   : > { %3397 = vmatpush1.bf16.msra.mxu0 %v8223_v14  ;;  %4690 = vmatprep.mubr.msk.bf16.mxu0 %vm1666_vm15, %v7865_v37  ;;  %v2963_v37 = vsel %vm1006_vm12, %v2851_v30, %v2853_v59 }
 0x6a9   : > { %3315 = vmatpush1.bf16.msra.mxu1 %v2954_v58  ;;  %3398 = vmatprep.subr.bf16.mxu0 %v9024_v15  ;;  %v2881_v0 = vpop.permute.xlu0 %2880  ;;  %v2901_v40 = vpop.permute.xlu1 %2900 }
 0x6aa   : > { %3316 = vmatprep.subr.bf16.mxu1 %v2962_v42  ;;  %v2976_v24 = vsel %vm1006_vm12, %v2881_v0, %v2883_v23  ;;  %v2975_v14 = vsel %vm1006_vm12, %v8211_v46, %v2881_v0 }
 0x6ac   : > { %3399 = vmatpush1.bf16.msra.mxu0 %v2956_v45 }
 0x6ad   : > { %3317 = vmatpush1.bf16.msra.mxu1 %v2961_v19  ;;  %3400 = vmatprep.subr.bf16.mxu0 %v9024_v15  ;;  %v2899_v57 = vpop.permute.xlu0 %2898 }
 0x6ae   : > { %3318 = vmatprep.subr.bf16.mxu1 %v2969_v49  ;;  %v2983_v34 = vsel %vm1006_vm12, %v2897_v6, %v2899_v57  ;;  %v2984_v33 = vsel %vm1006_vm12, %v2899_v57, %v2901_v40 }
 0x6b0   : > { %3401 = vmatpush1.bf16.msra.mxu0 %v2963_v37 }
 0x6b1   : > { %3319 = vmatpush1.bf16.msra.mxu1 %v2968_v16  ;;  %3402 = vmatprep.subr.bf16.mxu0 %v9024_v15  ;;  %v2913_v46 = vpop.permute.xlu0 %2912 }
 0x6b2   : > { %3320 = vmatprep.subr.bf16.mxu1 %v2976_v24  ;;  %v2989_v17 = vsel %vm1006_vm12, %v8219_v60, %v2913_v46 }
 0x6b4   : > { %3403 = vmatpush1.bf16.msra.mxu0 %v2970_v3 }
 0x6b5   : > { %3321 = vmatpush1.bf16.msra.mxu1 %v2975_v14  ;;  %3404 = vmatprep.subr.bf16.mxu0 %v9024_v15 }
 0x6b6   : > { %3322 = vmatprep.subr.bf16.mxu1 %v2983_v34 }
 0x6b8   : > { %3405 = vmatpush1.bf16.msra.mxu0 %v2977_v36 }
 0x6b9   : > { %3323 = vmatpush1.bf16.msra.mxu1 %v2982_v1  ;;  %3406 = vmatprep.subr.bf16.mxu0 %v9024_v15 }
 0x6bc   : > { %3407 = vmatpush1.bf16.msra.mxu0 %v2984_v33 }
 0x6bd   : > { %3408 = vmatprep.subr.bf16.mxu0 %v9024_v15 }
 0x6e9   : > { %v2915_v21 = vpop.permute.xlu1 %2914  ;;  %v2917_v29 = vpop.permute.xlu0 %2916 }
 0x6ea   : > { %v2991_v32 = vsel %vm1006_vm12, %v2915_v21, %v2917_v29  ;;  %v2990_v12 = vsel %vm1006_vm12, %v2913_v46, %v2915_v21 }
 0x6eb   : > { %3324 = vmatprep.subr.bf16.mxu1 %v2990_v12  ;;  %3409 = vmatpush1.bf16.msra.mxu0 %v2991_v32 }
 0x6ec   : > { %3325 = vmatpush1.bf16.msra.mxu1 %v2989_v17  ;;  %3410 = vmatprep.subr.bf16.mxu0 %v9024_v15 }
 0x6ed   : > { %v2929_v44 = vpop.permute.xlu1 %2928 }
 0x6ee   : > { %v2996_v2 = vsel %vm1006_vm12, %v8233_v26, %v2929_v44 }
 0x6f1   : > { %v2933_v9 = vpop.permute.xlu1 %2932  ;;  %v2931_v31 = vpop.permute.xlu0 %2930 }
 0x6f2   : > { %v2998_v22 = vsel %vm1006_vm12, %v2931_v31, %v2933_v9  ;;  %v2997_v52 = vsel %vm1006_vm12, %v2929_v44, %v2931_v31 }
 0x6f3   : > { %3326 = vmatprep.subr.bf16.mxu1 %v2997_v52  ;;  %3411 = vmatpush1.bf16.msra.mxu0 %v2998_v22 }
 0x6f4   : > { %3327 = vmatpush1.bf16.msra.mxu1 %v2996_v2  ;;  %3412 = vmatprep.subr.bf16.mxu0 %v9024_v15 }
 0x6f5   : > { %v2945_v60 = vpop.permute.xlu0 %2944 }
 0x6f6   : > { %v3003_v28 = vsel %vm1006_vm12, %v8251_v50, %v2945_v60 }
 0x6f9   : > { %v2947_v56 = vpop.permute.xlu1 %2946 }
 0x6fa   : > { %v3004_v35 = vsel %vm1006_vm12, %v2945_v60, %v2947_v56 }
 0x6fb   : > { %3328 = vmatprep.subr.bf16.mxu1 %v3004_v35 }
 0x6fc   : > { %3329 = vmatpush1.bf16.msra.mxu1 %v3003_v28 }
 0x6fd   : > { %4049 = vmatprep.subr.bf16.mxu1 %v9024_v15 }
 0x6ff   : > { %3345 = vmatmul.mubr.bf16.vlgmr.msra.gmra.mrb[20].mxu1 %v8164_v53 }
 0x701   : > { %v2949_v38 = vpop.permute.xlu0 %2948 }
 0x702   : > { %v3005_v26 = vsel %vm1006_vm12, %v2947_v56, %v2949_v38  ;;  %vm9025_vm12 = vmmov %vm9009_vm3 }
 0x703   : > { %3413 = vmatpush1.bf16.msra.mxu0 %v3005_v26  ;;  %vm9033_vm3 = vmmov %vm9026_vm0 }
 0x706   : > { %3429 = vmatmul.mubr.bf16.vlgmr.msra.gmra.mrb[20].mxu0 %v8164_v53 }
 0x70a   : > { %v3068_v27 = vpop.permute.xlu1 %3067 }
 0x712   : > { %v3073_v63 = vpop.permute.xlu0 %3072 }
 0x71b   : > { %v3174_v61 = vpop.f32.mrb[16].mxu1 }
 0x71c   : > { %v3176_v10 = vpop.f32.mrb[17].mxu1  ;;  %v8381_v21 = vadd.f32 %v3174_v61, %v3068_v27 }
 0x71d   : > { %v3178_v47 = vpop.f32.mrb[18].mxu1  ;;  %v8372_v49 = vadd.f32 %v3176_v10, %v3068_v27 }
 0x71e   : > { %v3180_v8 = vpop.f32.mrb[19].mxu1  ;;  %v8376_v3 = vadd.f32 %v3178_v47, %v3073_v63  ;;  %v3437_v52 = vmax.f32 %v8381_v21, 0.0 }
 0x71f   : > { %v3438_v29 = vmax.f32 %v8372_v49, 0.0  ;;  %v8392_v31 = vadd.f32 %v3180_v8, %v3073_v63 }
 0x720   : > { %v3444_v44 = vmax.f32 %v8376_v3, 0.0 }
 0x721   : > { %v3445_v35 = vmax.f32 %v8392_v31, 0.0 }
 0x722   : > { %v5195_v56 = vpack.i.bf16 %v3444_v44, %v3437_v52 }
 0x75a   : > { %v3260_v51 = vpop.f32.mrb[12].mxu0 }
 0x75b   : > { %v3262_v55 = vpop.f32.mrb[13].mxu0  ;;  %v8365_v54 = vadd.f32 %v3260_v51, %v3068_v27 }
 0x75c   : > { %v3264_v7 = vpop.f32.mrb[14].mxu0  ;;  %v8355_v20 = vadd.f32 %v3262_v55, %v3068_v27 }
 0x75d   : > { %v3266_v50 = vpop.f32.mrb[15].mxu0  ;;  %v3439_v6 = vmax.f32 %v8365_v54, 0.0  ;;  %v8385_v32 = vadd.f32 %v3264_v7, %v3073_v63 }
 0x75e   : > { %v3440_v11 = vmax.f32 %v8355_v20, 0.0  ;;  %v8360_v30 = vadd.f32 %v3266_v50, %v3073_v63 }
 0x75f   : > { %v5185_v9 = vpack.i.bf16 %v3439_v6, %v3438_v29  ;;  %v3446_v2 = vmax.f32 %v8385_v32, 0.0 }
 0x760   : > { %v3447_v23 = vmax.f32 %v8360_v30, 0.0 }
 0x761   : > { %v5190_v28 = vpack.i.bf16 %v3446_v2, %v3445_v35 }
 0x77a   : > { %v4788_v62 = vpop.f32.mrb[16].mxu0 }
 0x77b   : > { %v4789_v5 = vpop.f32.mrb[17].mxu0 }
 0x77c   : > { %v4790_v39 = vadd.f32 %v4789_v5, %v4788_v62  ;;  %v4791_v13 = vpop.f32.mrb[18].mxu0 }
 0x77d   : > { %v4792_v18 = vpop.f32.mrb[19].mxu0 }
 0x77e   : > { %v4793_v59 = vadd.f32 %v4792_v18, %v4791_v13  ;;  %v3390_v0 = vadd.f32 %v4790_v39, %v3068_v27 }
 0x780   : > { %v3393_v57 = vadd.f32 %v4793_v59, %v3073_v63 }
 0x7d2   : > { %v3346_v43 = vpop.f32.mrb[20].mxu1 }
 0x7d3   : > { %v8357_v41 = vadd.f32 %v3346_v43, %v3068_v27  ;;  %v3348_v53 = vpop.f32.mrb[21].mxu1 }
 0x7d4   : > { %v3350_v4 = vpop.f32.mrb[22].mxu1  ;;  %v4983_v19 = vadd.f32 %v3348_v53, %v3068_v27 }
 0x7d5   : > { %v3441_v25 = vmax.f32 %v8357_v41, 0.0  ;;  %v8363_v48 = vadd.f32 %v3350_v4, %v3073_v63  ;;  %v3352_v58 = vpop.f32.mrb[23].mxu1 }
 0x7d6   : > { %v3442_v36 = vmax.f32 %v4983_v19, 0.0  ;;  %v4985_v1 = vadd.f32 %v3352_v58, %v3073_v63 }
 0x7d7   : > { %v5165_v42 = vpack.i.bf16 %v3441_v25, %v3440_v11  ;;  %v3448_v45 = vmax.f32 %v8363_v48, 0.0 }
 0x7d8   : > { %v3449_v22 = vmax.f32 %v4985_v1, 0.0 }
 0x7d9   : > { %v3430_v37 = vpop.f32.mrb[20].mxu0  ;;  %5166 = vrot.lane.b32.xlu1 %v5165_v42, %s9004_s15  ;;  %v5170_v14 = vpack.i.bf16 %v3448_v45, %v3447_v23 }
 0x7da   : > { %v3431_v16 = vadd.f32 %v3430_v37, %v3390_v0  ;;  %v3432_v24 = vpop.f32.mrb[21].mxu0 }
 0x7db   : > { %v3433_v34 = vpop.f32.mrb[22].mxu0 }
 0x7dc   : > { %v3443_v40 = vmax.f32 %v3431_v16, 0.0  ;;  %v3434_v33 = vadd.f32 %v3433_v34, %v3393_v57  ;;  %v3435_v46 = vpop.f32.mrb[23].mxu0 }
 0x7dd   : > { %5171 = vrot.lane.b32.xlu1 %v5170_v14, %s9004_s15 }
 0x7de   : > { %v5175_v12 = vpack.i.bf16 %v3443_v40, %v3442_v36  ;;  %v3450_v17 = vmax.f32 %v3434_v33, 0.0 }
 0x7e0   : > { %5176 = vrot.lane.b32.xlu0 %v5175_v12, %s9004_s15  ;;  %v5180_v60 = vpack.i.bf16 %v3450_v17, %v3449_v22 }
 0x7e1   : > { %5186 = vrot.lane.b32.xlu1 %v5185_v9, %s9004_s15 }
 0x7e4   : > { %5181 = vrot.lane.b32.xlu0 %v5180_v60, %s9004_s15 }
 0x7e5   : > { %5196 = vrot.lane.b32.xlu1 %v5195_v56, %s9004_s15 }
 0x7e8   : > { %5191 = vrot.lane.b32.xlu0 %v5190_v28, %s9004_s15  ;;  %s5367_s15 = smov 112  }
 0x84b   : > { %v5167_v38 = vpop.permute.xlu1 %5166 }
 0x84c   : > { %v5169_v26 = vunpack.i.h.bf16 %v5167_v38  ;;  %v5168_v61 = vunpack.i.l.bf16 %v5167_v38 }
 0x84e   : > { %v3497_v55 = vsel %vm9025_vm12, %v5168_v61, %v5169_v26 }
 0x84f   : > { %v5172_v10 = vpop.permute.xlu1 %5171  ;;  %v8412_v27 = vmax.f32 %v3440_v11, %v3497_v55 }
 0x850   : > { %v5174_v47 = vunpack.i.h.bf16 %v5172_v10  ;;  %v5173_v8 = vunpack.i.l.bf16 %v5172_v10 }
 0x852   : > { %v5177_v51 = vpop.permute.xlu0 %5176  ;;  %v3503_v7 = vsel %vm9026_vm0, %v5173_v8, %v5174_v47  ;;  %vm3676_vm0 = vcmask 916480  }
 0x853   : > { %v5179_v50 = vunpack.i.h.bf16 %v5177_v51  ;;  %v5178_v62 = vunpack.i.l.bf16 %v5177_v51  ;;  %v5187_v5 = vpop.permute.xlu1 %5186  ;;  %v8414_v43 = vmax.f32 %v3447_v23, %v3503_v7 }
 0x854   : > { %v5189_v39 = vunpack.i.h.bf16 %v5187_v5  ;;  %v5188_v59 = vunpack.i.l.bf16 %v5187_v5 }
 0x855   : > { %v3498_v13 = vsel %vm9027_vm9, %v5169_v26, %v5178_v62  ;;  %v3499_v18 = vsel %vm9028_vm6, %v5178_v62, %v5179_v50  ;;  %v3532_v19 = vmax.f32 %v3443_v40, %v5179_v50 }
 0x856   : > { %v8418_v53 = vmax.f32 %v3441_v25, %v3498_v13  ;;  %v8420_v63 = vmax.f32 %v3442_v36, %v3499_v18  ;;  %v5182_v4 = vpop.permute.xlu0 %5181  ;;  %v3496_v0 = vsel %vm9029_vm7, %v5189_v39, %v5168_v61  ;;  %v3495_v23 = vsel %vm9030_vm8, %v5188_v59, %v5189_v39 }
 0x857   : > { %v5184_v30 = vunpack.i.h.bf16 %v5182_v4  ;;  %v5183_v58 = vunpack.i.l.bf16 %v5182_v4  ;;  %v5197_v42 = vpop.permute.xlu1 %5196  ;;  %v8438_v33 = vmax.f32 %v3439_v6, %v3496_v0  ;;  %v8442_v46 = vmax.f32 %v3438_v29, %v3495_v23 }
 0x858   : > { %v5200_v20 = vpack.i.bf16 %v8418_v53, %v8412_v27  ;;  %v5205_v11 = vpack.i.bf16 %v8414_v43, %v8420_v63  ;;  %v5199_v57 = vunpack.i.h.bf16 %v5197_v42  ;;  %v5198_v36 = vunpack.i.l.bf16 %v5197_v42 }
 0x859   : > { %v3533_v41 = vmax.f32 %v3450_v17, %v5184_v30  ;;  %v3505_v25 = vsel %vm9031_vm11, %v5183_v58, %v5184_v30  ;;  %v3504_v37 = vsel %vm9032_vm13, %v5174_v47, %v5183_v58  ;;  %v5220_v6 = vpack.i.bf16 %v8438_v33, %v8442_v46 }
 0x85a   : > { %v8430_v16 = vmax.f32 %v3449_v22, %v3505_v25  ;;  %v3528_v24 = vmax.f32 %v3448_v45, %v3504_v37  ;;  %5201 = vrot.lane.b32.xlu0 %v5200_v20, %s8973_s19  ;;  %v5192_v14 = vpop.permute.xlu0 %5191  ;;  %5206 = vrot.lane.b32.xlu1 %v5205_v11, %s8973_s19  ;;  %v3494_v54 = vsel %vm9036_vm4, %v5198_v36, %v5188_v59 }
 0x85b   : > { %v5215_v34 = vpack.i.bf16 %v3533_v41, %v3532_v19  ;;  %v5194_v1 = vunpack.i.h.bf16 %v5192_v14  ;;  %v5193_v40 = vunpack.i.l.bf16 %v5192_v14  ;;  %v8465_v31 = vmax.f32 %v3437_v52, %v3494_v54 }
 0x85c   : > { %v5210_v48 = vpack.i.bf16 %v8430_v16, %v3528_v24 }
 0x85d   : > { %v3502_v45 = vsel %vm9033_vm3, %v5194_v1, %v5173_v8  ;;  %v3500_v32 = vsel %vm9034_vm5, %v5199_v57, %v5193_v40  ;;  %v3501_v12 = vsel %vm9035_vm14, %v5193_v40, %v5194_v1 }
 0x85e   : > { %v8448_v17 = vmax.f32 %v3446_v2, %v3502_v45  ;;  %v8450_v9 = vmax.f32 %v3445_v35, %v3501_v12  ;;  %5211 = vrot.lane.b32.xlu0 %v5210_v48, %s8973_s19  ;;  %5216 = vrot.lane.b32.xlu1 %v5215_v34, %s8973_s19  ;;  %v8457_v49 = vmax.f32 %v3444_v44, %v3500_v32 }
 0x860   : > { %v5225_v29 = vpack.i.bf16 %v8448_v17, %v8450_v9  ;;  %v5230_v22 = vpack.i.bf16 %v8457_v49, %v8465_v31 }
 0x862   : > { %5221 = vrot.lane.b32.xlu0 %v5220_v6, %s8973_s19  ;;  %5226 = vrot.lane.b32.xlu1 %v5225_v29, %s8973_s19 }
 0x866   : > { %5231 = vrot.lane.b32.xlu0 %v5230_v22, %s8973_s19  ;;  %s5366_s19 = smov 4  }
 0x8cc   : > { %v5202_v3 = vpop.permute.xlu0 %5201  ;;  %v5207_v44 = vpop.permute.xlu1 %5206 }
 0x8cd   : > { %v5204_v2 = vunpack.i.h.bf16 %v5202_v3  ;;  %v5203_v60 = vunpack.i.l.bf16 %v5202_v3  ;;  %v5208_v56 = vunpack.i.l.bf16 %v5207_v44  ;;  %v5209_v35 = vunpack.i.h.bf16 %v5207_v44  ;;  %v5268_v44 = vld [vmem:[%s8933_s5 + $0x4] ss:$16 sps:$4 sm:$0xff]  }
 0x8ce   : > { %3984 = vmatprep.mubr.bf16.mxu0 %v5268_v44  ;;  %v5293_v44 = vld [vmem:[%s8933_s5 + $0x8c] ss:$16 sps:$4 sm:$0xff]  }
 0x8cf   : > { %v3580_v21 = vsel %vm912_vm10, %v5203_v60, %v5204_v2  ;;  %v3581_v52 = vsel %vm912_vm10, %v5204_v2, %v5208_v56 }
 0x8d0   : > { %v5212_v28 = vpop.permute.xlu0 %5211  ;;  %v3604_v47 = vmax.f32 %v8412_v27, %v3580_v21  ;;  %v3605_v8 = vmax.f32 %v8418_v53, %v3581_v52  ;;  %v5217_v7 = vpop.permute.xlu1 %5216  ;;  %v5269_v21 = vld [vmem:[%s8933_s5 + $0xc] ss:$16 sps:$4 sm:$0xff]  }
 0x8d1   : > { %v5214_v38 = vunpack.i.h.bf16 %v5212_v28  ;;  %v5213_v26 = vunpack.i.l.bf16 %v5212_v28  ;;  %v5219_v5 = vunpack.i.h.bf16 %v5217_v7  ;;  %v5218_v39 = vunpack.i.l.bf16 %v5217_v7  ;;  %4723 = vmatprep.mubr.msk.bf16.mxu1 %vm1666_vm15, %v5269_v21  ;;  %v5302_v21 = vld [vmem:[%s8933_s5 + $0xc4] ss:$16 sps:$4 sm:$0xff]  }
 0x8d3   : > { %v3586_v61 = vsel %vm912_vm10, %v5209_v35, %v5213_v26  ;;  %v3587_v10 = vsel %vm912_vm10, %v5213_v26, %v5214_v38  ;;  %v3588_v13 = vsel %vm912_vm10, %v5214_v38, %v5219_v5  ;;  %v3582_v18 = vsel %vm912_vm10, %v5208_v56, %v5218_v39 }
 0x8d4   : > { %v3610_v51 = vmax.f32 %v8414_v43, %v3586_v61  ;;  %v3611_v55 = vmax.f32 %v3528_v24, %v3587_v10  ;;  %v5222_v59 = vpop.permute.xlu0 %5221  ;;  %v5227_v27 = vpop.permute.xlu1 %5226  ;;  %v3612_v43 = vmax.f32 %v8430_v16, %v3588_v13  ;;  %v3606_v53 = vmax.f32 %v8420_v63, %v3582_v18 }
 0x8d5   : > { %v5224_v4 = vunpack.i.h.bf16 %v5222_v59  ;;  %v5223_v30 = vunpack.i.l.bf16 %v5222_v59  ;;  %v5229_v58 = vunpack.i.h.bf16 %v5227_v27  ;;  %v5228_v42 = vunpack.i.l.bf16 %v5227_v27 }
 0x8d6   : > { %v8479_v50 = vpack.c.bf16 %v3610_v51, %v3604_v47  ;;  %v3617_v62 = vpack.c.bf16 %v3611_v55, %v3605_v8  ;;  %v3618_v20 = vpack.c.bf16 %v3612_v43, %v3606_v53 }
 0x8d7   : > { %v3578_v19 = vsel %vm912_vm10, %v5223_v30, %v5224_v4  ;;  %v3584_v0 = vsel %vm912_vm10, %v5228_v42, %v5229_v58  ;;  %v3579_v11 = vsel %vm912_vm10, %v5224_v4, %v5203_v60  ;;  %v3585_v23 = vsel %vm912_vm10, %v5229_v58, %v5209_v35 }
 0x8d8   : > { %3697 = vrot.lane.b32.xlu1 %v8479_v50, %s5345_s26  ;;  %3714 = vrot.lane.b32.xlu0 %v3617_v62, %s5345_s26  ;;  %v5232_v63 = vpop.permute.xlu0 %5231  ;;  %v3602_v41 = vmax.f32 %v8442_v46, %v3578_v19  ;;  %v3608_v25 = vmax.f32 %v8450_v9, %v3584_v0  ;;  %v3603_v37 = vmax.f32 %v8438_v33, %v3579_v11 }
 0x8d9   : > { %v3609_v16 = vmax.f32 %v8448_v17, %v3585_v23  ;;  %v5234_v24 = vunpack.i.h.bf16 %v5232_v63  ;;  %v5233_v57 = vunpack.i.l.bf16 %v5232_v63 }
 0x8da   : > { %v8505_v14 = vpack.c.bf16 %v3608_v25, %v3602_v41 }
 0x8db   : > { %v8507_v34 = vpack.c.bf16 %v3609_v16, %v3603_v37  ;;  %v3583_v36 = vsel %vm912_vm10, %v5234_v24, %v5228_v42  ;;  %v3577_v1 = vsel %vm912_vm10, %v5233_v57, %v5223_v30  ;;  %vm9037_vm10 = vcmask 1014784  }
 0x8dc   : > { %3701 = vrot.lane.b32.xlu1 %v8479_v50, %s5360_s30  ;;  %3717 = vrot.lane.b32.xlu0 %v3617_v62, %s5360_s30  ;;  %v3607_v40 = vmax.f32 %v8457_v49, %v3583_v36  ;;  %v3601_v33 = vmax.f32 %v8465_v31, %v3577_v1  ;;  %vm9038_vm12 = vmmov %vm9037_vm10 }
 0x8dd   : > { %vm9039_vm9 = vmmov %vm9037_vm10 }
 0x8de   : > { %v3613_v46 = vpack.c.bf16 %v3607_v40, %v3601_v33  ;;  %vm9040_vm6 = vmmov %vm9039_vm9  ;;  %v5266_v40 = vld [vmem:[%s8933_s5] ss:$16 sps:$4 sm:$0xff]   ;;  %v5272_v33 = vld [vmem:[%s8933_s5 + $0x24] ss:$16 sps:$4 sm:$0xff]  }
 0x8df   : > { %vm9041_vm7 = vmmov %vm9040_vm6 }
 0x8e0   : > { %3705 = vrot.lane.b32.xlu1 %v8479_v50, %s5365_s23  ;;  %3720 = vrot.lane.b32.xlu0 %v3617_v62, %s5365_s23  ;;  %vm9042_vm8 = vmmov %vm9040_vm6 }
 0x8e1   : > { %vm9043_vm11 = vmmov %vm9040_vm6 }
 0x8e2   : > { %vm9044_vm13 = vmmov %vm9040_vm6 }
 0x8e3   : > { %vm9045_vm3 = vmmov %vm9040_vm6 }
 0x8e4   : > { %3723 = vrot.lane.b32.xlu1 %v3617_v62, %s5366_s19  ;;  %3726 = vrot.lane.b32.xlu0 %v3618_v20, %s5345_s26  ;;  %vm9046_vm5 = vmmov %vm9045_vm3 }
 0x8e5   : > { %vm9047_vm14 = vmmov %vm9045_vm3 }
 0x8e8   : > { %3729 = vrot.lane.b32.xlu1 %v3618_v20, %s5360_s30  ;;  %3732 = vrot.lane.b32.xlu0 %v3618_v20, %s5365_s23 }
 0x8ec   : > { %3667 = vrot.lane.b32.xlu1 %v8505_v14, %s5365_s23  ;;  %3688 = vrot.lane.b32.xlu0 %v8507_v34, %s5365_s23 }
 0x8f0   : > { %3674 = vrot.lane.b32.xlu1 %v8505_v14, %s5367_s15  ;;  %3692 = vrot.lane.b32.xlu0 %v8507_v34, %s5367_s15 }
 0x8f4   : > { %3653 = vrot.lane.b32.xlu1 %v3613_v46, %s5345_s26  ;;  %3655 = vrot.lane.b32.xlu0 %v8505_v14, %s5345_s26 }
 0x8f8   : > { %3659 = vrot.lane.b32.xlu1 %v3613_v46, %s5360_s30  ;;  %3661 = vrot.lane.b32.xlu0 %v8505_v14, %s5360_s30 }
 0x8fc   : > { %3680 = vrot.lane.b32.xlu1 %v8507_v34, %s5345_s26 }
 0x94a   : > { %v3698_v48 = vpop.permute.xlu1 %3697  ;;  %v3715_v45 = vpop.permute.xlu0 %3714 }
 0x94b   : > { %3737 = vrot.lane.b32.xlu0 %v3715_v45, %s5345_s26  ;;  %v3716_v32 = vsel %vm9037_vm10, %v3698_v48, %v3715_v45 }
 0x94c   : > { %4050 = vmatpush1.bf16.msra.mxu1 %v3716_v32  ;;  %3735 = vrot.lane.b32.xlu1 %v3716_v32, %s5345_s26  ;;  %v5275_v32 = vld [vmem:[%s8933_s5 + $0x2c] ss:$16 sps:$4 sm:$0xff]  }
 0x94d   : > { %4051 = vmatprep.subr.bf16.mxu1 %v9024_v15 }
 0x94e   : > { %v8532_v12 = vpop.permute.xlu1 %3701  ;;  %v3718_v17 = vpop.permute.xlu0 %3717 }
 0x94f   : > { %3741 = vrot.lane.b32.xlu0 %v3718_v17, %s5345_s26  ;;  %v3719_v9 = vsel %vm2591_vm1, %v8532_v12, %v3718_v17 }
 0x950   : > { %3739 = vrot.lane.b32.xlu1 %v3719_v9, %s5345_s26  ;;  %v5281_v9 = vld [vmem:[%s8933_s5 + $0x4c] ss:$16 sps:$4 sm:$0xff]  }
 0x952   : > { %v3706_v54 = vpop.permute.xlu1 %3705  ;;  %v3721_v49 = vpop.permute.xlu0 %3720 }
 0x953   : > { %3665 = vrot.lane.b32.xlu0 %v3613_v46, %s5365_s23  ;;  %v3722_v31 = vsel %vm3669_vm2, %v3706_v54, %v3721_v49  ;;  %s8849_s23 = scalar_lea.vmem %s8939_s11, %s4749_s13 }
 0x954   : > { %3745 = vrot.lane.b32.xlu1 %v3721_v49, %s5345_s26 }
 0x956   : > { %v3724_v6 = vpop.permute.xlu1 %3723  ;;  %v3727_v29 = vpop.permute.xlu0 %3726 }
 0x957   : > { %3743 = vrot.lane.b32.xlu0 %v3722_v31, %s5345_s26  ;;  %v8551_v56 = vsel %vm9038_vm12, %v3715_v45, %v3727_v29  ;;  %v5271_v45 = vld [vmem:[%s8933_s5 + $0x8] ss:$16 sps:$4 sm:$0xff]   ;;  %v5286_v31 = vld [vmem:[%s8933_s5 + $0x60] ss:$16 sps:$4 sm:$0xff]  }
 0x958   : > { %3684 = vrot.lane.b32.xlu1 %v8507_v34, %s5360_s30 }
 0x95a   : > { %v3730_v22 = vpop.permute.xlu1 %3729  ;;  %v3733_v3 = vpop.permute.xlu0 %3732 }
 0x95b   : > { %3672 = vrot.lane.b32.xlu0 %v3613_v46, %s5367_s15  ;;  %v3731_v26 = vsel %vm2591_vm1, %v3718_v17, %v3730_v22  ;;  %v3734_v8 = vsel %vm3669_vm2, %v3721_v49, %v3733_v3  ;;  %v5277_v17 = vld [vmem:[%s8933_s5 + $0x28] ss:$16 sps:$4 sm:$0xff]   ;;  %v5284_v49 = vld [vmem:[%s8933_s5 + $0x64] ss:$16 sps:$4 sm:$0xff]  }
 0x95c   : > { %3747 = vrot.lane.b32.xlu1 %v3724_v6, %s5345_s26  ;;  %v5283_v6 = vld [vmem:[%s8933_s5 + $0x48] ss:$16 sps:$4 sm:$0xff]  }
 0x95e   : > { %v3668_v2 = vpop.permute.xlu1 %3667  ;;  %v3689_v60 = vpop.permute.xlu0 %3688 }
 0x95f   : > { %3709 = vrot.lane.b32.xlu0 %v8479_v50, %s5367_s15  ;;  %v3690_v35 = vsel %vm3669_vm2, %v3668_v2, %v3689_v60  ;;  %v3707_v28 = vsel %vm3669_vm2, %v3689_v60, %v3706_v54  ;;  %v5280_v54 = vld [vmem:[%s8933_s5 + $0x40] ss:$16 sps:$4 sm:$0xff]   ;;  %v5296_v60 = vld [vmem:[%s8933_s5 + $0xa4] ss:$16 sps:$4 sm:$0xff]  }
 0x960   : > { %4794 = vmatprep.subr.bf16.mxu0 %v3690_v35  ;;  %3749 = vrot.lane.b32.xlu1 %v8551_v56, %s5345_s26  ;;  %v5299_v35 = vld [vmem:[%s8933_s5 + $0xac] ss:$16 sps:$4 sm:$0xff]  }
 0x961   : > { %4795 = vmatpush3.bf16.msra.mxu0 %v3613_v46 }
 0x962   : > { %v3675_v52 = vpop.permute.xlu1 %3674  ;;  %v3693_v38 = vpop.permute.xlu0 %3692 }
 0x963   : > { %3751 = vrot.lane.b32.xlu0 %v3727_v29, %s5345_s26  ;;  %v3694_v61 = vsel %vm3676_vm0, %v3675_v52, %v3693_v38  ;;  %v5287_v29 = vld [vmem:[%s8933_s5 + $0x6c] ss:$16 sps:$4 sm:$0xff]  }
 0x964   : > { %3753 = vrot.lane.b32.xlu1 %v3731_v26, %s5345_s26  ;;  %4796 = vmatprep.subr.bf16.mxu0 %v3694_v61  ;;  %v5304_v26 = vld [vmem:[%s8933_s5 + $0xc0] ss:$16 sps:$4 sm:$0xff]   ;;  %v5308_v61 = vld [vmem:[%s8933_s5 + $0xe4] ss:$16 sps:$4 sm:$0xff]  }
 0x966   : > { %v3654_v10 = vpop.permute.xlu1 %3653  ;;  %v3656_v47 = vpop.permute.xlu0 %3655 }
 0x967   : > { %v3657_v51 = vsel %vm9039_vm9, %v3654_v10, %v3656_v47  ;;  %3755 = vrot.lane.b32.xlu0 %v3730_v22, %s5345_s26  ;;  %v5290_v22 = vld [vmem:[%s8933_s5 + $0x84] ss:$16 sps:$4 sm:$0xff]   ;;  %v5307_v10 = vld [vmem:[%s8933_s5 + $0xc8] ss:$16 sps:$4 sm:$0xff]  }
 0x968   : > { %3757 = vrot.lane.b32.xlu1 %v3734_v8, %s5345_s26  ;;  %4797 = vmatpush3.bf16.msra.mxu0 %v3657_v51  ;;  %v5310_v8 = vld [vmem:[%s8933_s5 + $0xe0] ss:$16 sps:$4 sm:$0xff]   ;;  %v5313_v51 = vld [vmem:[%s8933_s5 + $0xe8] ss:$16 sps:$4 sm:$0xff]  }
 0x969   : > { %4798 = vmatprep.subr.bf16.mxu0 %v8507_v34 }
 0x96a   : > { %v3660_v55 = vpop.permute.xlu1 %3659  ;;  %v3662_v7 = vpop.permute.xlu0 %3661 }
 0x96b   : > { %v3663_v62 = vsel %vm2591_vm1, %v3660_v55, %v3662_v7  ;;  %3759 = vrot.lane.b32.xlu0 %v3733_v3, %s5345_s26  ;;  %v5289_v3 = vld [vmem:[%s8933_s5 + $0x68] ss:$16 sps:$4 sm:$0xff]   ;;  %v5314_v55 = vld [vmem:[%s8935_s7] sm:$0xff]  }
 0x96c   : > { %4799 = vmatpush3.bf16.msra.mxu0 %v3663_v62 }
 0x96e   : > { %v3681_v5 = vpop.permute.xlu1 %3680 }
 0x96f   : > { %v3699_v39 = vsel %vm9040_vm6, %v3681_v5, %v3698_v48  ;;  %v3682_v24 = vsel %vm9044_vm13, %v3656_v47, %v3681_v5  ;;  %v5311_v47 = vld [vmem:[%s8933_s5 + $0xec] ss:$16 sps:$4 sm:$0xff]  }
 0x970   : > { %4800 = vmatprep.subr.bf16.mxu0 %v3699_v39 }
 0x9bd   : > { %v3738_v13 = vpop.permute.xlu0 %3737 }
 0x9be   : > { %v3736_v18 = vpop.permute.xlu1 %3735 }
 0x9bf   : > { %v3761_v59 = vsel %vm9041_vm7, %v3736_v18, %v3738_v13 }
 0x9c0   : > { %4052 = vmatpush1.bf16.msra.mxu1 %v3761_v59 }
 0x9c1   : > { %v3742_v27 = vpop.permute.xlu0 %3741  ;;  %4053 = vmatprep.subr.bf16.mxu1 %v9024_v15 }
 0x9c2   : > { %v3740_v43 = vpop.permute.xlu1 %3739 }
 0x9c3   : > { %v3762_v53 = vsel %vm9042_vm8, %v3740_v43, %v3742_v27  ;;  %v4146_v27 = vld [vmem:[%s8934_s6] sm:$0xff] }
 0x9c4   : > { %4054 = vmatpush1.bf16.msra.mxu1 %v3762_v53 }
 0x9c5   : > { %v3666_v4 = vpop.permute.xlu0 %3665  ;;  %4055 = vmatprep.subr.bf16.mxu1 %v9024_v15 }
 0x9c6   : > { %v3670_v30 = vsel %vm3669_vm2, %v3666_v4, %v3668_v2  ;;  %v3746_v58 = vpop.permute.xlu1 %3745  ;;  %v5292_v2 = vld [vmem:[%s8933_s5 + $0x80] ss:$16 sps:$4 sm:$0xff]  }
 0x9c7   : > { %4801 = vmatpush3.bf16.msra.mxu0 %v3670_v30  ;;  %v4147_v30 = vld [vmem:[%s8934_s6 + $0x8] sm:$0xff] }
 0x9c9   : > { %v3744_v42 = vpop.permute.xlu0 %3743 }
 0x9ca   : > { %v3763_v19 = vsel %vm9043_vm11, %v3744_v42, %v3746_v58  ;;  %v3685_v0 = vpop.permute.xlu1 %3684 }
 0x9cb   : > { %4056 = vmatpush1.bf16.msra.mxu1 %v3763_v19  ;;  %v3703_v20 = vsel %vm2591_vm1, %v3685_v0, %v8532_v12  ;;  %v5278_v12 = vld [vmem:[%s8933_s5 + $0x44] ss:$16 sps:$4 sm:$0xff]  }
 0x9cc   : > { %4802 = vmatprep.subr.bf16.mxu0 %v3703_v20  ;;  %4057 = vmatprep.subr.bf16.mxu1 %v9024_v15 }
 0x9cd   : > { %v3673_v11 = vpop.permute.xlu0 %3672 }
 0x9ce   : > { %v3677_v23 = vsel %vm3676_vm0, %v3673_v11, %v3675_v52  ;;  %v3748_v63 = vpop.permute.xlu1 %3747  ;;  %v5301_v52 = vld [vmem:[%s8933_s5 + $0xa8] ss:$16 sps:$4 sm:$0xff]  }
 0x9cf   : > { %4803 = vmatpush3.bf16.msra.mxu0 %v3677_v23  ;;  %4058 = vmatpush1.bf16.msra.mxu1 %v3748_v63 }
 0x9d0   : > { %4804 = vmatprep.subr.bf16.mxu0 %v3707_v28  ;;  %4059 = vmatprep.subr.bf16.mxu1 %v9024_v15  ;;  %v5298_v28 = vld [vmem:[%s8933_s5 + $0xa0] ss:$16 sps:$4 sm:$0xff]  }
 0x9d1   : > { %v3710_v41 = vpop.permute.xlu0 %3709 }
 0x9d2   : > { %v3750_v25 = vpop.permute.xlu1 %3749  ;;  %v3711_v37 = vsel %vm3676_vm0, %v3693_v38, %v3710_v41  ;;  %v5305_v38 = vld [vmem:[%s8933_s5 + $0xcc] ss:$16 sps:$4 sm:$0xff]  }
 0x9d3   : > { %4805 = vmatpush3.bf16.msra.mxu0 %v8505_v14  ;;  %4060 = vmatpush1.bf16.msra.mxu1 %v8551_v56  ;;  %v3686_v14 = vsel %vm2591_vm1, %v3662_v7, %v3685_v0  ;;  %v5295_v56 = vld [vmem:[%s8933_s5 + $0x88] ss:$16 sps:$4 sm:$0xff]  }
 0x9d4   : > { %4806 = vmatprep.subr.bf16.mxu0 %v3711_v37  ;;  %4061 = vmatprep.subr.bf16.mxu1 %v9024_v15 }
 0x9d5   : > { %v3752_v16 = vpop.permute.xlu0 %3751 }
 0x9d6   : > { %v3764_v57 = vsel %vm9045_vm3, %v3750_v25, %v3752_v16  ;;  %v3754_v34 = vpop.permute.xlu1 %3753 }
 0x9d7   : > { %4807 = vmatpush3.bf16.msra.mxu0 %v3682_v24  ;;  %4062 = vmatpush1.bf16.msra.mxu1 %v3764_v57  ;;  %v4148_v57 = vld [vmem:[%s8934_s6 + $0x10] sm:$0xff] }
 0x9d8   : > { %4808 = vmatprep.subr.bf16.mxu0 %v8479_v50  ;;  %4063 = vmatprep.subr.bf16.mxu1 %v9024_v15 }
 0x9d9   : > { %v3756_v36 = vpop.permute.xlu0 %3755 }
 0x9da   : > { %v3765_v1 = vsel %vm9046_vm5, %v3754_v34, %v3756_v36  ;;  %v3758_v50 = vpop.permute.xlu1 %3757 }
 0x9db   : > { %4809 = vmatpush3.bf16.msra.mxu0 %v3686_v14  ;;  %4064 = vmatpush1.bf16.msra.mxu1 %v3765_v1 }
 0x9dc   : > { %4065 = vmatprep.subr.bf16.mxu1 %v9024_v15  ;;  %v5274_v15 = vld [vmem:[%s8933_s5 + $0x20] ss:$16 sps:$4 sm:$0xff]  }
 0x9dd   : > { %v3760_v46 = vpop.permute.xlu0 %3759 }
 0x9de   : > { %v3766_v48 = vsel %vm9047_vm14, %v3758_v50, %v3760_v46  ;;  %3985 = vmatmul.mubr.bf16.vlgmr.msra.gmra.mrb[24].mxu0 %v5266_v40  ;;  %v4149_v40 = vld [vmem:[%s8934_s6 + $0x18] sm:$0xff] }
 0x9df   : > { %4066 = vmatpush1.bf16.msra.mxu1 %v3766_v48  ;;  %3992 = vmatprep.mubr.bf16.mxu0 %v5272_v33 }
 0x9e2   : > { %4082 = vmatmul.mubr.bf16.vlgmr.msra.gmra.mrb[24].mxu1 %v5271_v45 }
 0x9e3   : > { %4724 = vmatprep.mubr.msk.bf16.mxu1 %vm1666_vm15, %v5275_v32 }
 0x9e6   : > { %3993 = vmatmul.mubr.bf16.gmra.mrb[28].mxu0 %v5274_v15 }
 0x9e7   : > { %4000 = vmatprep.mubr.bf16.mxu0 %v5278_v12 }
 0x9ea   : > { %4090 = vmatmul.mubr.bf16.gmra.mrb[28].mxu1 %v5277_v17 }
 0x9eb   : > { %4725 = vmatprep.mubr.msk.bf16.mxu1 %vm1666_vm15, %v5281_v9 }
 0x9ee   : > { %4001 = vmatmul.mubr.bf16.gmra.mrb[32].mxu0 %v5280_v54 }
 0x9ef   : > { %4008 = vmatprep.mubr.bf16.mxu0 %v5284_v49 }
 0x9f2   : > { %4098 = vmatmul.mubr.bf16.gmra.mrb[32].mxu1 %v5283_v6 }
 0x9f3   : > { %4726 = vmatprep.mubr.msk.bf16.mxu1 %vm1666_vm15, %v5287_v29  ;;  %v4150_v29 = vld [vmem:[%s8934_s6 + $0x20] sm:$0xff] }
 0x9f6   : > { %4009 = vmatmul.mubr.bf16.gmra.mrb[36].mxu0 %v5286_v31 }
 0x9f7   : > { %4016 = vmatprep.mubr.bf16.mxu0 %v5290_v22 }
 0x9fa   : > { %4106 = vmatmul.mubr.bf16.gmra.mrb[36].mxu1 %v5289_v3 }
 0x9fb   : > { %4727 = vmatprep.mubr.msk.bf16.mxu1 %vm1666_vm15, %v5293_v44 }
 0x9fe   : > { %4017 = vmatmul.mubr.bf16.gmra.mrb[40].mxu0 %v5292_v2  ;;  %v4151_v2 = vld [vmem:[%s8934_s6 + $0x28] sm:$0xff] }
 0x9ff   : > { %4024 = vmatprep.mubr.bf16.mxu0 %v5296_v60 }
 0xa02   : > { %4114 = vmatmul.mubr.bf16.gmra.mrb[40].mxu1 %v5295_v56 }
 0xa03   : > { %4728 = vmatprep.mubr.msk.bf16.mxu1 %vm1666_vm15, %v5299_v35 }
 0xa06   : > { %4025 = vmatmul.mubr.bf16.gmra.mrb[44].mxu0 %v5298_v28 }
 0xa07   : > { %4032 = vmatprep.mubr.bf16.mxu0 %v5302_v21 }
 0xa0a   : > { %4122 = vmatmul.mubr.bf16.gmra.mrb[44].mxu1 %v5301_v52 }
 0xa0b   : > { %4729 = vmatprep.mubr.msk.bf16.mxu1 %vm1666_vm15, %v5305_v38 }
 0xa0e   : > { %4033 = vmatmul.mubr.bf16.gmra.mrb[48].mxu0 %v5304_v26 }
 0xa0f   : > { %4040 = vmatprep.mubr.bf16.mxu0 %v5308_v61 }
 0xa12   : > { %4130 = vmatmul.mubr.bf16.gmra.mrb[48].mxu1 %v5307_v10 }
 0xa13   : > { %4730 = vmatprep.mubr.msk.bf16.mxu1 %vm1666_vm15, %v5311_v47  ;;  %vm4580_vm15 = vcmask 7168  }
 0xa16   : > { %4041 = vmatmul.mubr.bf16.gmra.mrb[52].mxu0 %v5310_v8 }
 0xa17   : > { %4906 = vmatprep.mubr.bf16.mxu0 %v5314_v55  ;;  %v4152_v55 = vld [vmem:[%s8934_s6 + $0x30] sm:$0xff] }
 0xa1a   : > { %4138 = vmatmul.mubr.bf16.gmra.mrb[52].mxu1 %v5313_v51 }
 0xab1   : > { %v4810_v7 = vpop.f32.mrb[24].mxu0 }
 0xab2   : > { %v4811_v62 = vpop.f32.mrb[25].mxu0 }
 0xab3   : > { %v4812_v5 = vadd.f32 %v4811_v62, %v4810_v7  ;;  %v4813_v39 = vpop.f32.mrb[26].mxu0 }
 0xab4   : > { %v4814_v13 = vpop.f32.mrb[27].mxu0 }
 0xab5   : > { %v4815_v18 = vadd.f32 %v4814_v13, %v4813_v39  ;;  %v4083_v59 = vpop.f32.mrb[24].mxu1  ;;  %v4153_v13 = vld [vmem:[%s8934_s6 + $0x38] sm:$0xff] }
 0xab6   : > { %v4084_v43 = vadd.f32 %v4812_v5, %v4083_v59  ;;  %v4085_v53 = vpop.f32.mrb[25].mxu1 }
 0xab7   : > { %v4086_v4 = vpop.f32.mrb[26].mxu1 }
 0xab8   : > { %v4162_v58 = vadd.f32 %v4146_v27, %v4084_v43  ;;  %v4087_v42 = vadd.f32 %v4815_v18, %v4086_v4  ;;  %v4088_v19 = vpop.f32.mrb[27].mxu1 }
 0xab9   : > { %v4816_v0 = vpop.f32.mrb[28].mxu0 }
 0xaba   : > { %v4163_v20 = vadd.f32 %v4147_v30, %v4087_v42  ;;  %v4817_v11 = vpop.f32.mrb[29].mxu0  ;;  %v4178_v41 = vmax.f32 %v4162_v58, 0.0 }
 0xabb   : > { %v4818_v23 = vadd.f32 %v4817_v11, %v4816_v0  ;;  %v4819_v63 = vpop.f32.mrb[30].mxu0 }
 0xabc   : > { %v4179_v25 = vmax.f32 %v4163_v20, 0.0  ;;  %v4820_v37 = vpop.f32.mrb[31].mxu0 }
 0xabd   : > { %v4821_v16 = vadd.f32 %v4820_v37, %v4819_v63  ;;  %v4091_v24 = vpop.f32.mrb[28].mxu1 }
 0xabe   : > { %v4092_v34 = vadd.f32 %v4818_v23, %v4091_v24  ;;  %v4093_v36 = vpop.f32.mrb[29].mxu1  ;;  %v4194_v14 = vpack.c.bf16 %v4179_v25, %v4178_v41  ;;  %v4154_v23 = vld [vmem:[%s8934_s6 + $0x40] sm:$0xff] }
 0xabf   : > { %v4094_v1 = vpop.f32.mrb[30].mxu1 }
 0xac0   : > { %v4164_v33 = vadd.f32 %v4148_v57, %v4092_v34  ;;  %v4095_v50 = vadd.f32 %v4821_v16, %v4094_v1  ;;  %v4096_v46 = vpop.f32.mrb[31].mxu1  ;;  %4890 = vmatprep.subr.bf16.mxu0 %v4194_v14  ;;  %v4155_v16 = vld [vmem:[%s8934_s6 + $0x48] sm:$0xff] }
 0xac1   : > { %v4822_v48 = vpop.f32.mrb[32].mxu0  ;;  %4891 = vmatpush3.bf16.msra.mxu0 %v4194_v14 }
 0xac2   : > { %v4165_v45 = vadd.f32 %v4149_v40, %v4095_v50  ;;  %v4823_v32 = vpop.f32.mrb[33].mxu0  ;;  %v4180_v17 = vmax.f32 %v4164_v33, 0.0 }
 0xac3   : > { %v4824_v15 = vadd.f32 %v4823_v32, %v4822_v48  ;;  %v4825_v12 = vpop.f32.mrb[34].mxu0 }
 0xac4   : > { %v4181_v9 = vmax.f32 %v4165_v45, 0.0  ;;  %v4826_v54 = vpop.f32.mrb[35].mxu0 }
 0xac5   : > { %v4827_v49 = vadd.f32 %v4826_v54, %v4825_v12  ;;  %v4099_v6 = vpop.f32.mrb[32].mxu1 }
 0xac6   : > { %v4100_v31 = vadd.f32 %v4824_v15, %v4099_v6  ;;  %v4101_v22 = vpop.f32.mrb[33].mxu1  ;;  %v4195_v3 = vpack.c.bf16 %v4181_v9, %v4180_v17  ;;  %v4156_v15 = vld [vmem:[%s8934_s6 + $0x50] sm:$0xff] }
 0xac7   : > { %v4102_v44 = vpop.f32.mrb[34].mxu1 }
 0xac8   : > { %v4166_v60 = vadd.f32 %v4150_v29, %v4100_v31  ;;  %v4103_v56 = vadd.f32 %v4827_v49, %v4102_v44  ;;  %v4104_v35 = vpop.f32.mrb[35].mxu1  ;;  %4892 = vmatprep.subr.bf16.mxu0 %v4195_v3  ;;  %v4157_v49 = vld [vmem:[%s8934_s6 + $0x58] sm:$0xff] }
 0xac9   : > { %v4828_v28 = vpop.f32.mrb[36].mxu0  ;;  %4893 = vmatpush3.bf16.msra.mxu0 %v4195_v3 }
 0xaca   : > { %v4167_v21 = vadd.f32 %v4151_v2, %v4103_v56  ;;  %v4829_v52 = vpop.f32.mrb[37].mxu0  ;;  %v4182_v61 = vmax.f32 %v4166_v60, 0.0 }
 0xacb   : > { %v4830_v38 = vadd.f32 %v4829_v52, %v4828_v28  ;;  %v4831_v26 = vpop.f32.mrb[38].mxu0 }
 0xacc   : > { %v4183_v10 = vmax.f32 %v4167_v21, 0.0  ;;  %v4832_v47 = vpop.f32.mrb[39].mxu0 }
 0xacd   : > { %v4833_v8 = vadd.f32 %v4832_v47, %v4831_v26  ;;  %v4107_v51 = vpop.f32.mrb[36].mxu1 }
 0xace   : > { %v4108_v7 = vadd.f32 %v4830_v38, %v4107_v51  ;;  %v4109_v62 = vpop.f32.mrb[37].mxu1  ;;  %v4196_v5 = vpack.c.bf16 %v4183_v10, %v4182_v61  ;;  %v4158_v38 = vld [vmem:[%s8934_s6 + $0x60] sm:$0xff] }
 0xacf   : > { %v4110_v39 = vpop.f32.mrb[38].mxu1 }
 0xad0   : > { %v4168_v18 = vadd.f32 %v4152_v55, %v4108_v7  ;;  %v4111_v59 = vadd.f32 %v4833_v8, %v4110_v39  ;;  %v4112_v27 = vpop.f32.mrb[39].mxu1  ;;  %4894 = vmatprep.subr.bf16.mxu0 %v4196_v5  ;;  %v4159_v8 = vld [vmem:[%s8934_s6 + $0x68] sm:$0xff] }
 0xad1   : > { %v4834_v43 = vpop.f32.mrb[40].mxu0  ;;  %4895 = vmatpush3.bf16.msra.mxu0 %v4196_v5 }
 0xad2   : > { %v4169_v53 = vadd.f32 %v4153_v13, %v4111_v59  ;;  %v4835_v4 = vpop.f32.mrb[41].mxu0  ;;  %v4184_v42 = vmax.f32 %v4168_v18, 0.0 }
 0xad3   : > { %v4836_v30 = vadd.f32 %v4835_v4, %v4834_v43  ;;  %v4837_v58 = vpop.f32.mrb[42].mxu0 }
 0xad4   : > { %v4185_v19 = vmax.f32 %v4169_v53, 0.0  ;;  %v4838_v0 = vpop.f32.mrb[43].mxu0 }
 0xad5   : > { %v4839_v20 = vadd.f32 %v4838_v0, %v4837_v58  ;;  %v4115_v11 = vpop.f32.mrb[40].mxu1 }
 0xad6   : > { %v4116_v63 = vadd.f32 %v4836_v30, %v4115_v11  ;;  %v4117_v41 = vpop.f32.mrb[41].mxu1  ;;  %v4197_v25 = vpack.c.bf16 %v4185_v19, %v4184_v42  ;;  %v4160_v30 = vld [vmem:[%s8934_s6 + $0x70] sm:$0xff] }
 0xad7   : > { %v4118_v37 = vpop.f32.mrb[42].mxu1 }
 0xad8   : > { %v4170_v24 = vadd.f32 %v4154_v23, %v4116_v63  ;;  %v4119_v57 = vadd.f32 %v4839_v20, %v4118_v37  ;;  %v4120_v34 = vpop.f32.mrb[43].mxu1  ;;  %4896 = vmatprep.subr.bf16.mxu0 %v4197_v25  ;;  %v4161_v20 = vld [vmem:[%s8934_s6 + $0x78] sm:$0xff] }
 0xad9   : > { %v4840_v36 = vpop.f32.mrb[44].mxu0  ;;  %4897 = vmatpush3.bf16.msra.mxu0 %v4197_v25  ;;  %v5317_v34 = vld [vmem:[%s8935_s7 + $0x18] sm:$0xff]  }
 0xada   : > { %v4171_v14 = vadd.f32 %v4155_v16, %v4119_v57  ;;  %v4841_v1 = vpop.f32.mrb[45].mxu0  ;;  %v4186_v50 = vmax.f32 %v4170_v24, 0.0  ;;  %v5315_v24 = vld [vmem:[%s8935_s7 + $0x8] sm:$0xff]   ;;  %v5316_v57 = vld [vmem:[%s8935_s7 + $0x10] sm:$0xff]  }
 0xadb   : > { %v4842_v40 = vadd.f32 %v4841_v1, %v4840_v36  ;;  %v4843_v33 = vpop.f32.mrb[46].mxu0  ;;  %v5318_v36 = vld [vmem:[%s8935_s7 + $0x20] sm:$0xff]   ;;  %v5320_v1 = vld [vmem:[%s8935_s7 + $0x30] sm:$0xff]  }
 0xadc   : > { %v4187_v46 = vmax.f32 %v4171_v14, 0.0  ;;  %v4844_v48 = vpop.f32.mrb[47].mxu0  ;;  %v5319_v14 = vld [vmem:[%s8935_s7 + $0x28] sm:$0xff]  }
 0xadd   : > { %v4845_v45 = vadd.f32 %v4844_v48, %v4843_v33  ;;  %v4123_v32 = vpop.f32.mrb[44].mxu1  ;;  %v5322_v33 = vld [vmem:[%s8937_s9] sm:$0xff]  }
 0xade   : > { %v4124_v12 = vadd.f32 %v4842_v40, %v4123_v32  ;;  %v4125_v17 = vpop.f32.mrb[45].mxu1  ;;  %v4198_v9 = vpack.c.bf16 %v4187_v46, %v4186_v50  ;;  %v5321_v40 = vld [vmem:[%s8935_s7 + $0x38] sm:$0xff]   ;;  %4938 = vmatprep.mubr.bf16.mxu1 %v5322_v33  ;;  %v4220_v50 = vld [vmem:[%s8936_s8 + $0x10] sm:$0xff]  ;;  %v4218_v46 = vld [vmem:[%s8936_s8] sm:$0xff] }
 0xadf   : > { %v4126_v54 = vpop.f32.mrb[46].mxu1 }
 0xae0   : > { %v4172_v6 = vadd.f32 %v4156_v15, %v4124_v12  ;;  %v4127_v29 = vadd.f32 %v4845_v45, %v4126_v54  ;;  %v4128_v31 = vpop.f32.mrb[47].mxu1  ;;  %4898 = vmatprep.subr.bf16.mxu0 %v4198_v9  ;;  %v4221_v45 = vld [vmem:[%s8936_s8 + $0x18] sm:$0xff]  ;;  %v4219_v12 = vld [vmem:[%s8936_s8 + $0x8] sm:$0xff] }
 0xae1   : > { %v4846_v22 = vpop.f32.mrb[48].mxu0  ;;  %4899 = vmatpush3.bf16.msra.mxu0 %v4198_v9 }
 0xae2   : > { %v4173_v3 = vadd.f32 %v4157_v49, %v4127_v29  ;;  %v4847_v44 = vpop.f32.mrb[49].mxu0  ;;  %v4188_v56 = vmax.f32 %v4172_v6, 0.0 }
 0xae3   : > { %v4848_v2 = vadd.f32 %v4847_v44, %v4846_v22  ;;  %v4849_v60 = vpop.f32.mrb[50].mxu0  ;;  %v4224_v44 = vld [vmem:[%s8936_s8 + $0x30] sm:$0xff] }
 0xae4   : > { %v4189_v35 = vmax.f32 %v4173_v3, 0.0  ;;  %v4850_v28 = vpop.f32.mrb[51].mxu0 }
 0xae5   : > { %v4851_v21 = vadd.f32 %v4850_v28, %v4849_v60  ;;  %v4131_v52 = vpop.f32.mrb[48].mxu1  ;;  %v4222_v60 = vld [vmem:[%s8936_s8 + $0x20] sm:$0xff]  ;;  %v4225_v28 = vld [vmem:[%s8936_s8 + $0x38] sm:$0xff] }
 0xae6   : > { %v4132_v26 = vadd.f32 %v4848_v2, %v4131_v52  ;;  %v4133_v61 = vpop.f32.mrb[49].mxu1  ;;  %v4199_v10 = vpack.c.bf16 %v4189_v35, %v4188_v56 }
 0xae7   : > { %v4134_v47 = vpop.f32.mrb[50].mxu1 }
 0xae8   : > { %v4174_v51 = vadd.f32 %v4158_v38, %v4132_v26  ;;  %v4135_v55 = vadd.f32 %v4851_v21, %v4134_v47  ;;  %v4136_v7 = vpop.f32.mrb[51].mxu1  ;;  %4900 = vmatprep.subr.bf16.mxu0 %v4199_v10  ;;  %v4223_v38 = vld [vmem:[%s8936_s8 + $0x28] sm:$0xff] }
 0xae9   : > { %v4852_v62 = vpop.f32.mrb[52].mxu0  ;;  %4901 = vmatpush3.bf16.msra.mxu0 %v4199_v10 }
 0xaea   : > { %v4175_v5 = vadd.f32 %v4159_v8, %v4135_v55  ;;  %v4853_v39 = vpop.f32.mrb[53].mxu0  ;;  %v4190_v59 = vmax.f32 %v4174_v51, 0.0 }
 0xaeb   : > { %v4854_v13 = vadd.f32 %v4853_v39, %v4852_v62  ;;  %v4855_v18 = vpop.f32.mrb[54].mxu0 }
 0xaec   : > { %v4191_v27 = vmax.f32 %v4175_v5, 0.0  ;;  %v4856_v43 = vpop.f32.mrb[55].mxu0  ;;  %v4228_v5 = vld [vmem:[%s8936_s8 + $0x50] sm:$0xff] }
 0xaed   : > { %v4857_v53 = vadd.f32 %v4856_v43, %v4855_v18  ;;  %v4139_v4 = vpop.f32.mrb[52].mxu1 }
 0xaee   : > { %v4140_v58 = vadd.f32 %v4854_v13, %v4139_v4  ;;  %v4141_v42 = vpop.f32.mrb[53].mxu1  ;;  %v4200_v19 = vpack.c.bf16 %v4191_v27, %v4190_v59  ;;  %v4226_v13 = vld [vmem:[%s8936_s8 + $0x40] sm:$0xff]  ;;  %v4229_v27 = vld [vmem:[%s8936_s8 + $0x58] sm:$0xff]  ;;  %v4227_v4 = vld [vmem:[%s8936_s8 + $0x48] sm:$0xff] }
 0xaef   : > { %v4142_v0 = vpop.f32.mrb[54].mxu1 }
 0xaf0   : > { %v4176_v11 = vadd.f32 %v4160_v30, %v4140_v58  ;;  %v4143_v23 = vadd.f32 %v4857_v53, %v4142_v0  ;;  %v4144_v63 = vpop.f32.mrb[55].mxu1  ;;  %4902 = vmatprep.subr.bf16.mxu0 %v4200_v19 }
 0xaf1   : > { %4903 = vmatpush3.bf16.msra.mxu0 %v4200_v19 }
 0xaf2   : > { %v4177_v41 = vadd.f32 %v4161_v20, %v4143_v23  ;;  %v4192_v25 = vmax.f32 %v4176_v11, 0.0 }
 0xaf4   : > { %v4193_v37 = vmax.f32 %v4177_v41, 0.0  ;;  %v4232_v41 = vld [vmem:[%s8936_s8 + $0x70] sm:$0xff] }
 0xaf6   : > { %v4201_v16 = vpack.c.bf16 %v4193_v37, %v4192_v25  ;;  %v4230_v37 = vld [vmem:[%s8936_s8 + $0x60] sm:$0xff] }
 0xaf8   : > { %4904 = vmatprep.subr.bf16.mxu0 %v4201_v16 }
 0xaf9   : > { %4905 = vmatpush3.bf16.msra.mxu0 %v4201_v16 }
 0xafc   : > { %4907 = vmatmul.mubr.bf16.vlgmr.msra.gmra.mrb[56].mxu0 %v5315_v24 }
 0xafd   : > { %4910 = vmatprep.mubr.bf16.mxu0 %v5316_v57  ;;  %v4233_v57 = vld [vmem:[%s8936_s8 + $0x78] sm:$0xff] }
 0xb04   : > { %4911 = vmatmul.mubr.bf16.gmra.mrb[60].mxu0 %v5317_v34 }
 0xb05   : > { %4914 = vmatprep.mubr.bf16.mxu0 %v5318_v36 }
 0xb0c   : > { %4915 = vmatmul.mubr.bf16.gmra.mrb[64].mxu0 %v5319_v14  ;;  %v4231_v14 = vld [vmem:[%s8936_s8 + $0x68] sm:$0xff] }
 0xb0d   : > { %4918 = vmatprep.mubr.bf16.mxu0 %v5320_v1 }
 0xb14   : > { %4919 = vmatmul.mubr.bf16.gmra.mrb[68].mxu0 %v5321_v40 }
 0xbcf   : > { %v4908_v48 = vpop.f32.mrb[56].mxu0 }
 0xbd0   : > { %v4325_v32 = vadd.f32 %v4908_v48, %v4220_v50  ;;  %v4316_v15 = vpop.f32.mrb[57].mxu0 }
 0xbd1   : > { %v4317_v17 = vadd.f32 %v4316_v15, %v4218_v46  ;;  %v4909_v9 = vpop.f32.mrb[58].mxu0 }
 0xbd2   : > { %v4328_v54 = vadd.f32 %v4909_v9, %v4221_v45  ;;  %v4319_v49 = vpop.f32.mrb[59].mxu0  ;;  %v4381_v29 = vmax.f32 %v4325_v32, 0.0  ;;  %v5323_v9 = vld [vmem:[%s8937_s9 + $0x8] sm:$0xff]  }
 0xbd3   : > { %v4320_v6 = vadd.f32 %v4319_v49, %v4219_v12  ;;  %v4379_v22 = vmax.f32 %v4317_v17, 0.0  ;;  %v5325_v49 = vld [vmem:[%s8937_s9 + $0x18] sm:$0xff]  }
 0xbd4   : > { %v4382_v31 = vmax.f32 %v4328_v54, 0.0  ;;  %v5324_v54 = vld [vmem:[%s8937_s9 + $0x10] sm:$0xff]  }
 0xbd5   : > { %v4380_v3 = vmax.f32 %v4320_v6, 0.0  ;;  %v5326_v6 = vld [vmem:[%s8937_s9 + $0x20] sm:$0xff]  }
 0xbd6   : > { %v4396_v2 = vpack.c.bf16 %v4382_v31, %v4381_v29  ;;  %v5327_v29 = vld [vmem:[%s8937_s9 + $0x28] sm:$0xff]   ;;  %v5328_v31 = vld [vmem:[%s8937_s9 + $0x30] sm:$0xff]  }
 0xbd7   : > { %v4395_v56 = vpack.c.bf16 %v4380_v3, %v4379_v22  ;;  %v4912_v35 = vpop.f32.mrb[60].mxu0  ;;  %v5329_v22 = vld [vmem:[%s8937_s9 + $0x38] sm:$0xff]   ;;  %v4421_v3 = vld [vmem:[%s8938_s10 + $0x10] sm:$0xff] }
 0xbd8   : > { %v4341_v21 = vadd.f32 %v4912_v35, %v4224_v44  ;;  %v4332_v52 = vpop.f32.mrb[61].mxu0  ;;  %v4419_v44 = vld [vmem:[%s8938_s10] sm:$0xff] }
 0xbd9   : > { %v4333_v26 = vadd.f32 %v4332_v52, %v4222_v60  ;;  %v4913_v61 = vpop.f32.mrb[62].mxu0  ;;  %4922 = vmatprep.subr.bf16.mxu1 %v4395_v56  ;;  %v4422_v60 = vld [vmem:[%s8938_s10 + $0x18] sm:$0xff] }
 0xbda   : > { %v4344_v10 = vadd.f32 %v4913_v61, %v4225_v28  ;;  %v4335_v47 = vpop.f32.mrb[63].mxu0  ;;  %4923 = vmatpush3.bf16.msra.mxu1 %v4395_v56  ;;  %v4385_v51 = vmax.f32 %v4341_v21, 0.0  ;;  %v4420_v28 = vld [vmem:[%s8938_s10 + $0x8] sm:$0xff] }
 0xbdb   : > { %v4336_v8 = vadd.f32 %v4335_v47, %v4223_v38  ;;  %4924 = vmatprep.subr.bf16.mxu1 %v4396_v2  ;;  %v4383_v7 = vmax.f32 %v4333_v26, 0.0  ;;  %v4423_v47 = vld [vmem:[%s8938_s10 + $0x20] sm:$0xff] }
 0xbdc   : > { %v4386_v55 = vmax.f32 %v4344_v10, 0.0  ;;  %v4425_v10 = vld [vmem:[%s8938_s10 + $0x30] sm:$0xff] }
 0xbdd   : > { %v4384_v62 = vmax.f32 %v4336_v8, 0.0 }
 0xbde   : > { %v4398_v39 = vpack.c.bf16 %v4386_v55, %v4385_v51  ;;  %4925 = vmatpush3.bf16.msra.mxu1 %v4396_v2  ;;  %v4426_v51 = vld [vmem:[%s8938_s10 + $0x38] sm:$0xff] }
 0xbdf   : > { %v4397_v18 = vpack.c.bf16 %v4384_v62, %v4383_v7  ;;  %v4916_v59 = vpop.f32.mrb[64].mxu0  ;;  %v4424_v62 = vld [vmem:[%s8938_s10 + $0x28] sm:$0xff] }
 0xbe0   : > { %v4357_v43 = vadd.f32 %v4916_v59, %v4228_v5  ;;  %v4348_v53 = vpop.f32.mrb[65].mxu0 }
 0xbe1   : > { %4926 = vmatprep.subr.bf16.mxu1 %v4397_v18  ;;  %v4349_v30 = vadd.f32 %v4348_v53, %v4226_v13  ;;  %v4917_v58 = vpop.f32.mrb[66].mxu0 }
 0xbe2   : > { %4927 = vmatpush3.bf16.msra.mxu1 %v4397_v18  ;;  %v4360_v42 = vadd.f32 %v4917_v58, %v4229_v27  ;;  %v4351_v19 = vpop.f32.mrb[67].mxu0  ;;  %v4389_v20 = vmax.f32 %v4357_v43, 0.0  ;;  %v4429_v27 = vld [vmem:[%s8938_s10 + $0x50] sm:$0xff]  ;;  %v4427_v43 = vld [vmem:[%s8938_s10 + $0x40] sm:$0xff] }
 0xbe3   : > { %4928 = vmatprep.subr.bf16.mxu1 %v4398_v39  ;;  %v4352_v0 = vadd.f32 %v4351_v19, %v4227_v4  ;;  %v4387_v23 = vmax.f32 %v4349_v30, 0.0  ;;  %v4430_v4 = vld [vmem:[%s8938_s10 + $0x58] sm:$0xff] }
 0xbe4   : > { %v4390_v11 = vmax.f32 %v4360_v42, 0.0  ;;  %v4428_v42 = vld [vmem:[%s8938_s10 + $0x48] sm:$0xff] }
 0xbe5   : > { %v4388_v63 = vmax.f32 %v4352_v0, 0.0 }
 0xbe6   : > { %4929 = vmatpush3.bf16.msra.mxu1 %v4398_v39  ;;  %v4400_v25 = vpack.c.bf16 %v4390_v11, %v4389_v20 }
 0xbe7   : > { %v4399_v16 = vpack.c.bf16 %v4388_v63, %v4387_v23  ;;  %v4920_v24 = vpop.f32.mrb[68].mxu0  ;;  %v4433_v63 = vld [vmem:[%s8938_s10 + $0x70] sm:$0xff] }
 0xbe8   : > { %v4373_v34 = vadd.f32 %v4920_v24, %v4232_v41  ;;  %v4364_v36 = vpop.f32.mrb[69].mxu0  ;;  %v4431_v41 = vld [vmem:[%s8938_s10 + $0x60] sm:$0xff] }
 0xbe9   : > { %4930 = vmatprep.subr.bf16.mxu1 %v4399_v16  ;;  %v4365_v1 = vadd.f32 %v4364_v36, %v4230_v37  ;;  %v4921_v40 = vpop.f32.mrb[70].mxu0  ;;  %v4434_v37 = vld [vmem:[%s8938_s10 + $0x78] sm:$0xff] }
 0xbea   : > { %4931 = vmatpush3.bf16.msra.mxu1 %v4399_v16  ;;  %v4376_v33 = vadd.f32 %v4921_v40, %v4233_v57  ;;  %v4367_v50 = vpop.f32.mrb[71].mxu0  ;;  %v4393_v48 = vmax.f32 %v4373_v34, 0.0  ;;  %v4432_v57 = vld [vmem:[%s8938_s10 + $0x68] sm:$0xff] }
 0xbeb   : > { %4932 = vmatprep.subr.bf16.mxu1 %v4400_v25  ;;  %v4368_v46 = vadd.f32 %v4367_v50, %v4231_v14  ;;  %v4391_v32 = vmax.f32 %v4365_v1, 0.0 }
 0xbec   : > { %v4394_v45 = vmax.f32 %v4376_v33, 0.0 }
 0xbed   : > { %v4392_v15 = vmax.f32 %v4368_v46, 0.0 }
 0xbee   : > { %4933 = vmatpush3.bf16.msra.mxu1 %v4400_v25  ;;  %v4402_v12 = vpack.c.bf16 %v4394_v45, %v4393_v48 }
 0xbef   : > { %v4401_v17 = vpack.c.bf16 %v4392_v15, %v4391_v32 }
 0xbf1   : > { %4934 = vmatprep.subr.bf16.mxu1 %v4401_v17 }
 0xbf2   : > { %4935 = vmatpush3.bf16.msra.mxu1 %v4401_v17 }
 0xbf3   : > { %4936 = vmatprep.subr.bf16.mxu1 %v4402_v12 }
 0xbf6   : > { %4937 = vmatpush3.bf16.msra.mxu1 %v4402_v12 }
 0xbf9   : > { %4939 = vmatmul.mubr.bf16.vlgmr.msra.gmra.mrb[56].mxu1 %v5323_v9 }
 0xbfa   : > { %4942 = vmatprep.mubr.bf16.mxu1 %v5324_v54 }
 0xc01   : > { %4943 = vmatmul.mubr.bf16.gmra.mrb[60].mxu1 %v5325_v49 }
 0xc02   : > { %4946 = vmatprep.mubr.bf16.mxu1 %v5326_v6 }
 0xc09   : > { %4947 = vmatmul.mubr.bf16.gmra.mrb[64].mxu1 %v5327_v29 }
 0xc0a   : > { %4950 = vmatprep.mubr.bf16.mxu1 %v5328_v31 }
 0xc11   : > { %4951 = vmatmul.mubr.bf16.gmra.mrb[68].mxu1 %v5329_v22 }
 0xccc   : > { %v4940_v2 = vpop.f32.mrb[56].mxu1 }
 0xccd   : > { %v4526_v56 = vadd.f32 %v4940_v2, %v4421_v3  ;;  %v4517_v35 = vpop.f32.mrb[57].mxu1 }
 0xcce   : > { %v4518_v21 = vadd.f32 %v4517_v35, %v4419_v44  ;;  %v4941_v52 = vpop.f32.mrb[58].mxu1 }
 0xccf   : > { %4583 = vst.msk [vmem:[%s8849_s23 + $0x10] sm:$0xff] %vm4580_vm15, %v4526_v56  ;;  %v4529_v38 = vadd.f32 %v4941_v52, %v4422_v60  ;;  %v4520_v26 = vpop.f32.mrb[59].mxu1 }
 0xcd0   : > { %4581 = vst.msk [vmem:[%s8849_s23] sm:$0xff] %vm4580_vm15, %v4518_v21  ;;  %v4521_v61 = vadd.f32 %v4520_v26, %v4420_v28 }
 0xcd1   : > { %4584 = vst.msk [vmem:[%s8849_s23 + $0x18] sm:$0xff] %vm4580_vm15, %v4529_v38 }
 0xcd2   : > { %4582 = vst.msk [vmem:[%s8849_s23 + $0x8] sm:$0xff] %vm4580_vm15, %v4521_v61 }
 0xcd4   : > { %v4944_v8 = vpop.f32.mrb[60].mxu1 }
 0xcd5   : > { %v4542_v55 = vadd.f32 %v4944_v8, %v4425_v10  ;;  %v4533_v7 = vpop.f32.mrb[61].mxu1 }
 0xcd6   : > { %v4534_v5 = vadd.f32 %v4533_v7, %v4423_v47  ;;  %v4945_v39 = vpop.f32.mrb[62].mxu1 }
 0xcd7   : > { %4587 = vst.msk [vmem:[%s8849_s23 + $0x30] sm:$0xff] %vm4580_vm15, %v4542_v55  ;;  %v4545_v13 = vadd.f32 %v4945_v39, %v4426_v51  ;;  %v4536_v18 = vpop.f32.mrb[63].mxu1 }
 0xcd8   : > { %4585 = vst.msk [vmem:[%s8849_s23 + $0x20] sm:$0xff] %vm4580_vm15, %v4534_v5  ;;  %v4537_v59 = vadd.f32 %v4536_v18, %v4424_v62 }
 0xcd9   : > { %4588 = vst.msk [vmem:[%s8849_s23 + $0x38] sm:$0xff] %vm4580_vm15, %v4545_v13 }
 0xcda   : > { %4586 = vst.msk [vmem:[%s8849_s23 + $0x28] sm:$0xff] %vm4580_vm15, %v4537_v59 }
 0xcdc   : > { %v4948_v53 = vpop.f32.mrb[64].mxu1 }
 0xcdd   : > { %v4558_v30 = vadd.f32 %v4948_v53, %v4429_v27  ;;  %v4549_v58 = vpop.f32.mrb[65].mxu1 }
 0xcde   : > { %v4550_v19 = vadd.f32 %v4549_v58, %v4427_v43  ;;  %v4949_v0 = vpop.f32.mrb[66].mxu1 }
 0xcdf   : > { %4591 = vst.msk [vmem:[%s8849_s23 + $0x50] sm:$0xff] %vm4580_vm15, %v4558_v30  ;;  %v4561_v20 = vadd.f32 %v4949_v0, %v4430_v4  ;;  %v4552_v11 = vpop.f32.mrb[67].mxu1 }
 0xce0   : > { %4589 = vst.msk [vmem:[%s8849_s23 + $0x40] sm:$0xff] %vm4580_vm15, %v4550_v19  ;;  %v4553_v23 = vadd.f32 %v4552_v11, %v4428_v42 }
 0xce1   : > { %4592 = vst.msk [vmem:[%s8849_s23 + $0x58] sm:$0xff] %vm4580_vm15, %v4561_v20 }
 0xce2   : > { %4590 = vst.msk [vmem:[%s8849_s23 + $0x48] sm:$0xff] %vm4580_vm15, %v4553_v23 }
 0xce4   : > { %v4952_v25 = vpop.f32.mrb[68].mxu1 }
 0xce5   : > { %v4574_v16 = vadd.f32 %v4952_v25, %v4433_v63  ;;  %v4565_v24 = vpop.f32.mrb[69].mxu1 }
 0xce6   : > { %v4566_v34 = vadd.f32 %v4565_v24, %v4431_v41  ;;  %v4953_v36 = vpop.f32.mrb[70].mxu1 }
 0xce7   : > { %4595 = vst.msk [vmem:[%s8849_s23 + $0x70] sm:$0xff] %vm4580_vm15, %v4574_v16  ;;  %v4577_v14 = vadd.f32 %v4953_v36, %v4434_v37  ;;  %v4568_v1 = vpop.f32.mrb[71].mxu1 }
 0xce8   : > { %4593 = vst.msk [vmem:[%s8849_s23 + $0x60] sm:$0xff] %vm4580_vm15, %v4566_v34  ;;  %v4569_v40 = vadd.f32 %v4568_v1, %v4432_v57 }
 0xce9   : > { %4596 = vst.msk [vmem:[%s8849_s23 + $0x78] sm:$0xff] %vm4580_vm15, %v4577_v14 }
 0xcea   : > { %4594 = vst.msk [vmem:[%s8849_s23 + $0x68] sm:$0xff] %vm4580_vm15, %v4569_v40 }
 0xceb PF: > { %s21_s17 = sadd.s32 1, %s5340_s17  }
 0xcec   : > { %p18_p4 = scmp.ge.s32.totalorder %s21_s17, 4  }
 0xcee   :  { %20 = sbr.rel (!%p18_p4) target bundleno = 1 (0x1), region = 94 }

</bundles_post_ra>
